<compile_context>
chip_gen: v6e
topology: v6e:2x2x1
jax: 0.10.0
libtpu: 0.0.40
codegen_flags: <defaults>
</compile_context>

<pallas_src>
import math

import jax
import jax.numpy as jnp
from jax.experimental import pallas as pl
from jax.experimental.pallas import tpu as pltpu


# --------------------------------------------------------------------------- #
# In-kernel helpers (traced inside the Pallas kernel body)
# --------------------------------------------------------------------------- #
def _conv3x3(x_flat, pad_ref, pat_ref, w_ref, b_ref, H, W):
    """3x3, stride-1, pad-1 conv as a single im2col matmul.

    x_flat:  (H*W, Cin) f32 value (channels-last, spatial-major rows).
    pad_ref: (H+2, W+2, Cin) f32 VMEM scratch (zero halo).
    pat_ref: (H*W, 9*Cin) bf16 VMEM scratch (im2col patch matrix).
    w_ref:   (9*Cin, Cout) bf16, columns ordered (tap, channel).
    b_ref:   (1, Cout) f32.
    returns: (H*W, Cout) f32.
    """
    Cin = pad_ref.shape[-1]
    Hp, Wp = H + 2, W + 2

    # Zero only the 1-pixel halo; the interior is fully overwritten below.
    pad_ref[0:1, :, :] = jnp.zeros((1, Wp, Cin), jnp.float32)
    pad_ref[Hp - 1:Hp, :, :] = jnp.zeros((1, Wp, Cin), jnp.float32)
    pad_ref[:, 0:1, :] = jnp.zeros((Hp, 1, Cin), jnp.float32)
    pad_ref[:, Wp - 1:Wp, :] = jnp.zeros((Hp, 1, Cin), jnp.float32)
    pad_ref[1:H + 1, 1:W + 1, :] = x_flat.reshape(H, W, Cin)

    # im2col: 9 shifted windows -> one (H*W, 9*Cin) bf16 patch matrix.
    for ky in range(3):
        for kx in range(3):
            t = ky * 3 + kx
            tap = pad_ref[ky:ky + H, kx:kx + W, :].reshape(H * W, Cin)
            pat_ref[:, t * Cin:(t + 1) * Cin] = tap.astype(pat_ref.dtype)

    # Single MXU matmul, K = 9*Cin, f32 accumulation.
    out = jnp.dot(pat_ref[...], w_ref[...], preferred_element_type=jnp.float32)
    return out + b_ref[...]


def _maxpool(h_flat, scr_ref, H, W, ks):
    """ks x ks max pool (stride ks) on the VPU via strided VMEM reads.

    h_flat: (H*W, C) f32 value.  scr_ref: (H, W, C) f32 scratch.
    returns: (Ho*Wo, C) f32.
    """
    C = h_flat.shape[-1]
    Ho, Wo = H // ks, W // ks
    scr_ref[...] = h_flat.reshape(H, W, C)

    # max over rows within each ks-group (strided read on the leading dim)
    rm = scr_ref[pl.ds(0, Ho, stride=ks), :, :]
    for r in range(1, ks):
        rm = jnp.maximum(rm, scr_ref[pl.ds(r, Ho, stride=ks), :, :])
    scr_ref[0:Ho, :, :] = rm

    # max over cols within each ks-group (strided read on the sublane dim)
    cm = scr_ref[0:Ho, pl.ds(0, Wo, stride=ks), :]
    for c in range(1, ks):
        cm = jnp.maximum(cm, scr_ref[0:Ho, pl.ds(c, Wo, stride=ks), :])
    return cm.reshape(Ho * Wo, C)


# --------------------------------------------------------------------------- #
# Kernels
# --------------------------------------------------------------------------- #
def _feature_kernel(x_ref, w1_ref, b1_ref, w2_ref, b2_ref, o_ref,
                    pad1_ref, pat1_ref, pool1_ref, pad2_ref, pat2_ref, pool2_ref):
    """Per-image feature extractor: conv3x3 -> maxpool -> ReLU -> conv3x3 -> maxpool."""
    H1, W1 = pad1_ref.shape[0] - 2, pad1_ref.shape[1] - 2
    H2, W2 = pad2_ref.shape[0] - 2, pad2_ref.shape[1] - 2
    ks = H1 // H2

    h = x_ref[0]                                                  # (H1*W1, Cin) f32
    h = _conv3x3(h, pad1_ref, pat1_ref, w1_ref, b1_ref, H1, W1)   # (H1*W1, C1)
    h = _maxpool(h, pool1_ref, H1, W1, ks)                        # (H2*W2, C1)
    h = jnp.maximum(h, 0.0)                                       # ReLU
    h = _conv3x3(h, pad2_ref, pat2_ref, w2_ref, b2_ref, H2, W2)   # (H2*W2, C2)
    h = _maxpool(h, pool2_ref, H2, W2, ks)                        # (H3*W3, C2)
    o_ref[0] = h.astype(o_ref.dtype)


def _head_kernel(f_ref, w1_ref, b1_ref, w2_ref, b2_ref, o_ref):
    """Batch-folded FC head: Linear -> ReLU -> Linear (bf16 MXU operands, f32 accumulation)."""
    f = f_ref[...].astype(jnp.bfloat16)                                        # (N, F)
    h = jnp.dot(f, w1_ref[...], preferred_element_type=jnp.float32)
    h = jnp.maximum(h + b1_ref[...], 0.0)                                      # (N, 128)
    out = jnp.dot(h.astype(jnp.bfloat16), w2_ref[...],
                  preferred_element_type=jnp.float32) + b2_ref[...]            # (N, D)
    o_ref[...] = out.astype(o_ref.dtype)


# --------------------------------------------------------------------------- #
# Wrapper
# --------------------------------------------------------------------------- #
def _full_spec(shape):
    zeros = (0,) * len(shape)
    return pl.BlockSpec(shape, lambda *_, _z=zeros: _z)


def classifier_forward(x_nchw, params, kernel_size):
    """Forward pass of simple_classifier (NCHW input, PyTorch-layout params)."""
    ks = int(kernel_size)
    N, Cin, H, W = x_nchw.shape
    C1 = params["w1"].shape[0]
    C2 = params["w2"].shape[0]
    assert H % ks == 0 and W % ks == 0 and (H // ks) % ks == 0 and (W // ks) % ks == 0, (
        "floor-mode pooling (non-divisible spatial size) not implemented")
    H2, W2 = H // ks, W // ks
    H3, W3 = H2 // ks, W2 // ks
    Dfc = params["fw1"].shape[0]
    D = params["fw2"].shape[0]
    feat_dim = H3 * W3 * C2
    assert params["fw1"].shape[1] == C2 * H3 * W3

    # ---- wrapper-side glue (layout only) ------------------------------------
    x_flat = jnp.transpose(x_nchw, (0, 2, 3, 1)).reshape(N, H * W, Cin)
    # conv weights (Cout, Cin, 3, 3) -> (9*Cin, Cout), rows ordered (tap, channel); bf16 operands
    w1 = jnp.transpose(params["w1"], (2, 3, 1, 0)).reshape(9 * Cin, C1).astype(jnp.bfloat16)
    w2 = jnp.transpose(params["w2"], (2, 3, 1, 0)).reshape(9 * C1, C2).astype(jnp.bfloat16)
    b1 = params["b1"].reshape(1, C1).astype(jnp.float32)
    b2 = params["b2"].reshape(1, C2).astype(jnp.float32)
    # fc1 expects CHW flattening; the kernel emits HWC-flattened features -> permute fc1 columns
    fw1 = params["fw1"].reshape(Dfc, C2, H3, W3)
    fw1 = jnp.transpose(fw1, (2, 3, 1, 0)).reshape(feat_dim, Dfc).astype(jnp.bfloat16)
    fb1 = params["fb1"].reshape(1, Dfc).astype(jnp.float32)
    fw2 = jnp.transpose(params["fw2"], (1, 0)).astype(jnp.bfloat16)            # (Dfc, D)
    fb2 = params["fb2"].reshape(1, D).astype(jnp.float32)

    # ---- kernel 1: conv/pool feature extractor, one image per ("parallel") grid step ----
    feat = pl.pallas_call(
        _feature_kernel,
        out_shape=jax.ShapeDtypeStruct((N, H3 * W3, C2), jnp.float32),
        grid_spec=pltpu.PrefetchScalarGridSpec(
            num_scalar_prefetch=0,
            grid=(N,),
            in_specs=[
                pl.BlockSpec((1, H * W, Cin), lambda n: (n, 0, 0)),   # x (one image)
                _full_spec((9 * Cin, C1)),                            # conv1 weight
                _full_spec((1, C1)),                                  # conv1 bias
                _full_spec((9 * C1, C2)),                             # conv2 weight
                _full_spec((1, C2)),                                  # conv2 bias
            ],
            out_specs=pl.BlockSpec((1, H3 * W3, C2), lambda n: (n, 0, 0)),
            scratch_shapes=[
                pltpu.VMEM((H + 2, W + 2, Cin), jnp.float32),         # pad scratch 1
                pltpu.VMEM((H * W, 9 * Cin), jnp.bfloat16),           # im2col patches 1
                pltpu.VMEM((H, W, C1), jnp.float32),                  # pool scratch 1
                pltpu.VMEM((H2 + 2, W2 + 2, C1), jnp.float32),        # pad scratch 2
                pltpu.VMEM((H2 * W2, 9 * C1), jnp.bfloat16),          # im2col patches 2
                pltpu.VMEM((H2, W2, C2), jnp.float32),                # pool scratch 2
            ],
        ),
        compiler_params=pltpu.CompilerParams(dimension_semantics=("parallel",)),
    )(x_flat, w1, b1, w2, b2)

    # free contiguous reshape (HWC order, matched by the fc1 column permutation above)
    feat2d = feat.reshape(N, feat_dim)

    # ---- kernel 2: batch-folded FC head (lane-dense matmuls) ----------------
    out = pl.pallas_call(
        _head_kernel,
        out_shape=jax.ShapeDtypeStruct((N, D), jnp.float32),
        grid_spec=pltpu.PrefetchScalarGridSpec(
            num_scalar_prefetch=0,
            grid=(1,),
            in_specs=[
                _full_spec((N, feat_dim)),
                _full_spec((feat_dim, Dfc)),
                _full_spec((1, Dfc)),
                _full_spec((Dfc, D)),
                _full_spec((1, D)),
            ],
            out_specs=_full_spec((N, D)),
        ),
        compiler_params=pltpu.CompilerParams(dimension_semantics=("arbitrary",)),
    )(feat2d, fw1, fb1, fw2, fb2)
    return out


# --------------------------------------------------------------------------- #
# Pure-JAX reference mirroring the PyTorch module
# --------------------------------------------------------------------------- #
def _ref_forward(x, params, kernel_size):
    ks = int(kernel_size)

    def conv(v, w, b):
        o = jax.lax.conv_general_dilated(
            v, w, (1, 1), [(1, 1), (1, 1)],
            dimension_numbers=("NCHW", "OIHW", "NCHW"),
            precision=jax.lax.Precision.HIGHEST)
        return o + b[None, :, None, None]

    def maxpool(v):
        return jax.lax.reduce_window(v, -jnp.inf, jax.lax.max,
                                     (1, 1, ks, ks), (1, 1, ks, ks), "VALID")

    h = conv(x, params["w1"], params["b1"])
    h = maxpool(h)
    h = jnp.maximum(h, 0.0)
    h = conv(h, params["w2"], params["b2"])
    h = maxpool(h)
    f = h.reshape(h.shape[0], -1)
    f = jnp.maximum(jnp.dot(f, params["fw1"].T, precision=jax.lax.Precision.HIGHEST)
                    + params["fb1"][None, :], 0.0)
    return (jnp.dot(f, params["fw2"].T, precision=jax.lax.Precision.HIGHEST)
            + params["fb2"][None, :])


if __name__ == "__main__":
    # Small config consistent with the module: img_size=16 -> kernel_size = max(2, round(sqrt(16/32))) = 2
    img_size, img_channels, num_domains = 16, 3, 2
    dim_in, max_conv_dim = 16, 64
    kernel_size = int(max(2, round(math.sqrt(img_size / 32.0))))
    dim_out = min(dim_in * 2, max_conv_dim)
    curr = img_size // kernel_size // kernel_size
    feat_dim = curr * curr * dim_out
    N = 2

    keys = jax.random.split(jax.random.PRNGKey(0), 9)
    params = dict(
        w1=0.2 * jax.random.normal(keys[0], (dim_in, img_channels, 3, 3), jnp.float32),
        b1=0.1 * jax.random.normal(keys[1], (dim_in,), jnp.float32),
        w2=0.1 * jax.random.normal(keys[2], (dim_out, dim_in, 3, 3), jnp.float32),
        b2=0.1 * jax.random.normal(keys[3], (dim_out,), jnp.float32),
        fw1=0.05 * jax.random.normal(keys[4], (128, feat_dim), jnp.float32),
        fb1=0.1 * jax.random.normal(keys[5], (128,), jnp.float32),
        fw2=0.1 * jax.random.normal(keys[6], (num_domains, 128), jnp.float32),
        fb2=0.1 * jax.random.normal(keys[7], (num_domains,), jnp.float32),
    )
    x = jax.random.normal(keys[8], (N, img_channels, img_size, img_size), jnp.float32)

    out = jax.block_until_ready(classifier_forward(x, params, kernel_size))
    ref = jax.block_until_ready(_ref_forward(x, params, kernel_size))

    assert out.shape == (N, num_domains), out.shape
    max_err = float(jnp.max(jnp.abs(out - ref)))
    tol = 5e-2 * (1.0 + float(jnp.max(jnp.abs(ref))))
    assert max_err < tol, f"max abs err {max_err} vs tol {tol}"
    print("KERNEL_OK")
</pallas_src>

<mosaic_0001>
module attributes {stable_mosaic.version = 11 : i64} {
  func.func @_feature_kernel(%arg0: i32, %arg1: memref<1x256x3xf32, #tpu.memory_space<vmem>>, %arg2: memref<27x16xbf16, #tpu.memory_space<vmem>>, %arg3: memref<1x16xf32, #tpu.memory_space<vmem>>, %arg4: memref<144x32xbf16, #tpu.memory_space<vmem>>, %arg5: memref<1x32xf32, #tpu.memory_space<vmem>>, %arg6: memref<1x16x32xf32, #tpu.memory_space<vmem>>, %arg7: memref<18x18x3xf32, #tpu.memory_space<vmem>>, %arg8: memref<256x27xbf16, #tpu.memory_space<vmem>>, %arg9: memref<16x16x16xf32, #tpu.memory_space<vmem>>, %arg10: memref<10x10x16xf32, #tpu.memory_space<vmem>>, %arg11: memref<64x144xbf16, #tpu.memory_space<vmem>>, %arg12: memref<8x8x32xf32, #tpu.memory_space<vmem>>) attributes {dimension_semantics = [#tpu.dimension_semantics<parallel>], iteration_bounds = array<i64: 2>, scalar_prefetch = 0 : i64, scratch_operands = 6 : i64, tpu.core_type = #tpu.core_type<tc>, window_params = [{transform_indices = @transform_0, window_bounds = array<i64: 1, 256, 3>}, {pipeline_mode = #tpu.pipeline_mode<synchronous>, transform_indices = @transform_1, window_bounds = array<i64: 27, 16>}, {pipeline_mode = #tpu.pipeline_mode<synchronous>, transform_indices = @transform_2, window_bounds = array<i64: 1, 16>}, {pipeline_mode = #tpu.pipeline_mode<synchronous>, transform_indices = @transform_3, window_bounds = array<i64: 144, 32>}, {pipeline_mode = #tpu.pipeline_mode<synchronous>, transform_indices = @transform_4, window_bounds = array<i64: 1, 32>}, {transform_indices = @transform_5, window_bounds = array<i64: 1, 16, 32>}]} {
    %c0 = arith.constant 0 : index
    %c0_0 = arith.constant 0 : index
    %c0_1 = arith.constant 0 : index
    %0 = vector.load %arg1[%c0, %c0_0, %c0_1] : memref<1x256x3xf32, #tpu.memory_space<vmem>>, vector<1x256x3xf32>
    %1 = vector.shape_cast %0 : vector<1x256x3xf32> to vector<256x3xf32>
    %cst = arith.constant 0.000000e+00 : f32
    %2 = vector.broadcast %cst : f32 to vector<1x18x3xf32>
    %c0_2 = arith.constant 0 : index
    %c0_3 = arith.constant 0 : index
    %c0_4 = arith.constant 0 : index
    %3 = vector.load %arg7[%c0_2, %c0_3, %c0_4] : memref<18x18x3xf32, #tpu.memory_space<vmem>>, vector<1x18x3xf32>
    tpu.vector_store %arg7[%c0_2, %c0_3, %c0_4], %2 {strides = array<i32>} : memref<18x18x3xf32, #tpu.memory_space<vmem>>, vector<1x18x3xf32>,
    %cst_5 = arith.constant 0.000000e+00 : f32
    %4 = vector.broadcast %cst_5 : f32 to vector<1x18x3xf32>
    %c17 = arith.constant 17 : index
    %c0_6 = arith.constant 0 : index
    %c0_7 = arith.constant 0 : index
    %5 = vector.load %arg7[%c17, %c0_6, %c0_7] : memref<18x18x3xf32, #tpu.memory_space<vmem>>, vector<1x18x3xf32>
    tpu.vector_store %arg7[%c17, %c0_6, %c0_7], %4 {strides = array<i32>} : memref<18x18x3xf32, #tpu.memory_space<vmem>>, vector<1x18x3xf32>,
    %cst_8 = arith.constant 0.000000e+00 : f32
    %6 = vector.broadcast %cst_8 : f32 to vector<18x1x3xf32>
    %c0_9 = arith.constant 0 : index
    %c0_10 = arith.constant 0 : index
    %c0_11 = arith.constant 0 : index
    %7 = vector.load %arg7[%c0_9, %c0_10, %c0_11] : memref<18x18x3xf32, #tpu.memory_space<vmem>>, vector<18x1x3xf32>
    tpu.vector_store %arg7[%c0_9, %c0_10, %c0_11], %6 {strides = array<i32>} : memref<18x18x3xf32, #tpu.memory_space<vmem>>, vector<18x1x3xf32>,
    %cst_12 = arith.constant 0.000000e+00 : f32
    %8 = vector.broadcast %cst_12 : f32 to vector<18x1x3xf32>
    %c0_13 = arith.constant 0 : index
    %c17_14 = arith.constant 17 : index
    %c0_15 = arith.constant 0 : index
    %9 = vector.load %arg7[%c0_13, %c17_14, %c0_15] : memref<18x18x3xf32, #tpu.memory_space<vmem>>, vector<18x1x3xf32>
    tpu.vector_store %arg7[%c0_13, %c17_14, %c0_15], %8 {strides = array<i32>} : memref<18x18x3xf32, #tpu.memory_space<vmem>>, vector<18x1x3xf32>,
    %10 = vector.shape_cast %1 : vector<256x3xf32> to vector<16x16x3xf32>
    %c1 = arith.constant 1 : index
    %c1_16 = arith.constant 1 : index
    %c0_17 = arith.constant 0 : index
    %11 = vector.load %arg7[%c1, %c1_16, %c0_17] : memref<18x18x3xf32, #tpu.memory_space<vmem>>, vector<16x16x3xf32>
    tpu.vector_store %arg7[%c1, %c1_16, %c0_17], %10 {strides = array<i32>} : memref<18x18x3xf32, #tpu.memory_space<vmem>>, vector<16x16x3xf32>,
    %c0_18 = arith.constant 0 : index
    %c0_19 = arith.constant 0 : index
    %c0_20 = arith.constant 0 : index
    %12 = vector.load %arg7[%c0_18, %c0_19, %c0_20] : memref<18x18x3xf32, #tpu.memory_space<vmem>>, vector<16x16x3xf32>
    %13 = vector.shape_cast %12 : vector<16x16x3xf32> to vector<256x3xf32>
    %14 = arith.truncf %13 : vector<256x3xf32> to vector<256x3xbf16>
    %c0_21 = arith.constant 0 : index
    %c0_22 = arith.constant 0 : index
    %15 = vector.load %arg8[%c0_21, %c0_22] : memref<256x27xbf16, #tpu.memory_space<vmem>>, vector<256x3xbf16>
    tpu.vector_store %arg8[%c0_21, %c0_22], %14 {strides = array<i32>} : memref<256x27xbf16, #tpu.memory_space<vmem>>, vector<256x3xbf16>,
    %c0_23 = arith.constant 0 : index
    %c1_24 = arith.constant 1 : index
    %c0_25 = arith.constant 0 : index
    %16 = vector.load %arg7[%c0_23, %c1_24, %c0_25] : memref<18x18x3xf32, #tpu.memory_space<vmem>>, vector<16x16x3xf32>
    %17 = vector.shape_cast %16 : vector<16x16x3xf32> to vector<256x3xf32>
    %18 = arith.truncf %17 : vector<256x3xf32> to vector<256x3xbf16>
    %c0_26 = arith.constant 0 : index
    %c3 = arith.constant 3 : index
    %19 = vector.load %arg8[%c0_26, %c3] : memref<256x27xbf16, #tpu.memory_space<vmem>>, vector<256x3xbf16>
    tpu.vector_store %arg8[%c0_26, %c3], %18 {strides = array<i32>} : memref<256x27xbf16, #tpu.memory_space<vmem>>, vector<256x3xbf16>,
    %c0_27 = arith.constant 0 : index
    %c2 = arith.constant 2 : index
    %c0_28 = arith.constant 0 : index
    %20 = vector.load %arg7[%c0_27, %c2, %c0_28] : memref<18x18x3xf32, #tpu.memory_space<vmem>>, vector<16x16x3xf32>
    %21 = vector.shape_cast %20 : vector<16x16x3xf32> to vector<256x3xf32>
    %22 = arith.truncf %21 : vector<256x3xf32> to vector<256x3xbf16>
    %c0_29 = arith.constant 0 : index
    %c6 = arith.constant 6 : index
    %23 = vector.load %arg8[%c0_29, %c6] : memref<256x27xbf16, #tpu.memory_space<vmem>>, vector<256x3xbf16>
    tpu.vector_store %arg8[%c0_29, %c6], %22 {strides = array<i32>} : memref<256x27xbf16, #tpu.memory_space<vmem>>, vector<256x3xbf16>,
    %c1_30 = arith.constant 1 : index
    %c0_31 = arith.constant 0 : index
    %c0_32 = arith.constant 0 : index
    %24 = vector.load %arg7[%c1_30, %c0_31, %c0_32] : memref<18x18x3xf32, #tpu.memory_space<vmem>>, vector<16x16x3xf32>
    %25 = vector.shape_cast %24 : vector<16x16x3xf32> to vector<256x3xf32>
    %26 = arith.truncf %25 : vector<256x3xf32> to vector<256x3xbf16>
    %c0_33 = arith.constant 0 : index
    %c9 = arith.constant 9 : index
    %27 = vector.load %arg8[%c0_33, %c9] : memref<256x27xbf16, #tpu.memory_space<vmem>>, vector<256x3xbf16>
    tpu.vector_store %arg8[%c0_33, %c9], %26 {strides = array<i32>} : memref<256x27xbf16, #tpu.memory_space<vmem>>, vector<256x3xbf16>,
    %c1_34 = arith.constant 1 : index
    %c1_35 = arith.constant 1 : index
    %c0_36 = arith.constant 0 : index
    %28 = vector.load %arg7[%c1_34, %c1_35, %c0_36] : memref<18x18x3xf32, #tpu.memory_space<vmem>>, vector<16x16x3xf32>
    %29 = vector.shape_cast %28 : vector<16x16x3xf32> to vector<256x3xf32>
    %30 = arith.truncf %29 : vector<256x3xf32> to vector<256x3xbf16>
    %c0_37 = arith.constant 0 : index
    %c12 = arith.constant 12 : index
    %31 = vector.load %arg8[%c0_37, %c12] : memref<256x27xbf16, #tpu.memory_space<vmem>>, vector<256x3xbf16>
    tpu.vector_store %arg8[%c0_37, %c12], %30 {strides = array<i32>} : memref<256x27xbf16, #tpu.memory_space<vmem>>, vector<256x3xbf16>,
    %c1_38 = arith.constant 1 : index
    %c2_39 = arith.constant 2 : index
    %c0_40 = arith.constant 0 : index
    %32 = vector.load %arg7[%c1_38, %c2_39, %c0_40] : memref<18x18x3xf32, #tpu.memory_space<vmem>>, vector<16x16x3xf32>
    %33 = vector.shape_cast %32 : vector<16x16x3xf32> to vector<256x3xf32>
    %34 = arith.truncf %33 : vector<256x3xf32> to vector<256x3xbf16>
    %c0_41 = arith.constant 0 : index
    %c15 = arith.constant 15 : index
    %35 = vector.load %arg8[%c0_41, %c15] : memref<256x27xbf16, #tpu.memory_space<vmem>>, vector<256x3xbf16>
    tpu.vector_store %arg8[%c0_41, %c15], %34 {strides = array<i32>} : memref<256x27xbf16, #tpu.memory_space<vmem>>, vector<256x3xbf16>,
    %c2_42 = arith.constant 2 : index
    %c0_43 = arith.constant 0 : index
    %c0_44 = arith.constant 0 : index
    %36 = vector.load %arg7[%c2_42, %c0_43, %c0_44] : memref<18x18x3xf32, #tpu.memory_space<vmem>>, vector<16x16x3xf32>
    %37 = vector.shape_cast %36 : vector<16x16x3xf32> to vector<256x3xf32>
    %38 = arith.truncf %37 : vector<256x3xf32> to vector<256x3xbf16>
    %c0_45 = arith.constant 0 : index
    %c18 = arith.constant 18 : index
    %39 = vector.load %arg8[%c0_45, %c18] : memref<256x27xbf16, #tpu.memory_space<vmem>>, vector<256x3xbf16>
    tpu.vector_store %arg8[%c0_45, %c18], %38 {strides = array<i32>} : memref<256x27xbf16, #tpu.memory_space<vmem>>, vector<256x3xbf16>,
    %c2_46 = arith.constant 2 : index
    %c1_47 = arith.constant 1 : index
    %c0_48 = arith.constant 0 : index
    %40 = vector.load %arg7[%c2_46, %c1_47, %c0_48] : memref<18x18x3xf32, #tpu.memory_space<vmem>>, vector<16x16x3xf32>
    %41 = vector.shape_cast %40 : vector<16x16x3xf32> to vector<256x3xf32>
    %42 = arith.truncf %41 : vector<256x3xf32> to vector<256x3xbf16>
    %c0_49 = arith.constant 0 : index
    %c21 = arith.constant 21 : index
    %43 = vector.load %arg8[%c0_49, %c21] : memref<256x27xbf16, #tpu.memory_space<vmem>>, vector<256x3xbf16>
    tpu.vector_store %arg8[%c0_49, %c21], %42 {strides = array<i32>} : memref<256x27xbf16, #tpu.memory_space<vmem>>, vector<256x3xbf16>,
    %c2_50 = arith.constant 2 : index
    %c2_51 = arith.constant 2 : index
    %c0_52 = arith.constant 0 : index
    %44 = vector.load %arg7[%c2_50, %c2_51, %c0_52] : memref<18x18x3xf32, #tpu.memory_space<vmem>>, vector<16x16x3xf32>
    %45 = vector.shape_cast %44 : vector<16x16x3xf32> to vector<256x3xf32>
    %46 = arith.truncf %45 : vector<256x3xf32> to vector<256x3xbf16>
    %c0_53 = arith.constant 0 : index
    %c24 = arith.constant 24 : index
    %47 = vector.load %arg8[%c0_53, %c24] : memref<256x27xbf16, #tpu.memory_space<vmem>>, vector<256x3xbf16>
    tpu.vector_store %arg8[%c0_53, %c24], %46 {strides = array<i32>} : memref<256x27xbf16, #tpu.memory_space<vmem>>, vector<256x3xbf16>,
    %c0_54 = arith.constant 0 : index
    %c0_55 = arith.constant 0 : index
    %48 = vector.load %arg8[%c0_54, %c0_55] : memref<256x27xbf16, #tpu.memory_space<vmem>>, vector<256x27xbf16>
    %c0_56 = arith.constant 0 : index
    %c0_57 = arith.constant 0 : index
    %49 = vector.load %arg2[%c0_56, %c0_57] : memref<27x16xbf16, #tpu.memory_space<vmem>>, vector<27x16xbf16>
    %cst_58 = arith.constant dense<0.000000e+00> : vector<256x16xf32>
    %50 = tpu.matmul %48, %49, %cst_58 {dimension_numbers = #tpu.dot_dimension_numbers<[1], [0], [0], [1], [0, 0, 1, 1], [], []>} : vector<256x27xbf16>, vector<27x16xbf16>, vector<256x16xf32> -> vector<256x16xf32>
    %c0_59 = arith.constant 0 : index
    %c0_60 = arith.constant 0 : index
    %51 = vector.load %arg3[%c0_59, %c0_60] : memref<1x16xf32, #tpu.memory_space<vmem>>, vector<1x16xf32>
    %52 = vector.broadcast %51 : vector<1x16xf32> to vector<256x16xf32>
    %53 = arith.addf %50, %52 : vector<256x16xf32>
    %54 = vector.shape_cast %53 : vector<256x16xf32> to vector<16x16x16xf32>
    %c0_61 = arith.constant 0 : index
    %c0_62 = arith.constant 0 : index
    %c0_63 = arith.constant 0 : index
    %55 = vector.load %arg9[%c0_61, %c0_62, %c0_63] : memref<16x16x16xf32, #tpu.memory_space<vmem>>, vector<16x16x16xf32>
    tpu.vector_store %arg9[%c0_61, %c0_62, %c0_63], %54 {strides = array<i32>} : memref<16x16x16xf32, #tpu.memory_space<vmem>>, vector<16x16x16xf32>,
    %c0_64 = arith.constant 0 : index
    %c0_65 = arith.constant 0 : index
    %c0_66 = arith.constant 0 : index
    %56 = tpu.strided_load %arg9[%c0_64, %c0_65, %c0_66] {strides = array<i32: 2, 1, 1>} : memref<16x16x16xf32, #tpu.memory_space<vmem>>, vector<8x16x16xf32>
    %c1_67 = arith.constant 1 : index
    %c0_68 = arith.constant 0 : index
    %c0_69 = arith.constant 0 : index
    %57 = tpu.strided_load %arg9[%c1_67, %c0_68, %c0_69] {strides = array<i32: 2, 1, 1>} : memref<16x16x16xf32, #tpu.memory_space<vmem>>, vector<8x16x16xf32>
    %58 = arith.maximumf %56, %57 : vector<8x16x16xf32>
    %c0_70 = arith.constant 0 : index
    %c0_71 = arith.constant 0 : index
    %c0_72 = arith.constant 0 : index
    %59 = vector.load %arg9[%c0_70, %c0_71, %c0_72] : memref<16x16x16xf32, #tpu.memory_space<vmem>>, vector<8x16x16xf32>
    tpu.vector_store %arg9[%c0_70, %c0_71, %c0_72], %58 {strides = array<i32>} : memref<16x16x16xf32, #tpu.memory_space<vmem>>, vector<8x16x16xf32>,
    %c0_73 = arith.constant 0 : index
    %c0_74 = arith.constant 0 : index
    %c0_75 = arith.constant 0 : index
    %60 = tpu.strided_load %arg9[%c0_73, %c0_74, %c0_75] {strides = array<i32: 1, 2, 1>} : memref<16x16x16xf32, #tpu.memory_space<vmem>>, vector<8x8x16xf32>
    %c0_76 = arith.constant 0 : index
    %c1_77 = arith.constant 1 : index
    %c0_78 = arith.constant 0 : index
    %61 = tpu.strided_load %arg9[%c0_76, %c1_77, %c0_78] {strides = array<i32: 1, 2, 1>} : memref<16x16x16xf32, #tpu.memory_space<vmem>>, vector<8x8x16xf32>
    %62 = arith.maximumf %60, %61 : vector<8x8x16xf32>
    %63 = vector.shape_cast %62 : vector<8x8x16xf32> to vector<64x16xf32>
    %cst_79 = arith.constant 0.000000e+00 : f32
    %64 = vector.broadcast %cst_79 : f32 to vector<64x16xf32>
    %65 = arith.maximumf %63, %64 : vector<64x16xf32>
    %cst_80 = arith.constant 0.000000e+00 : f32
    %66 = vector.broadcast %cst_80 : f32 to vector<1x10x16xf32>
    %c0_81 = arith.constant 0 : index
    %c0_82 = arith.constant 0 : index
    %c0_83 = arith.constant 0 : index
    %67 = vector.load %arg10[%c0_81, %c0_82, %c0_83] : memref<10x10x16xf32, #tpu.memory_space<vmem>>, vector<1x10x16xf32>
    tpu.vector_store %arg10[%c0_81, %c0_82, %c0_83], %66 {strides = array<i32>} : memref<10x10x16xf32, #tpu.memory_space<vmem>>, vector<1x10x16xf32>,
    %cst_84 = arith.constant 0.000000e+00 : f32
    %68 = vector.broadcast %cst_84 : f32 to vector<1x10x16xf32>
    %c9_85 = arith.constant 9 : index
    %c0_86 = arith.constant 0 : index
    %c0_87 = arith.constant 0 : index
    %69 = vector.load %arg10[%c9_85, %c0_86, %c0_87] : memref<10x10x16xf32, #tpu.memory_space<vmem>>, vector<1x10x16xf32>
    tpu.vector_store %arg10[%c9_85, %c0_86, %c0_87], %68 {strides = array<i32>} : memref<10x10x16xf32, #tpu.memory_space<vmem>>, vector<1x10x16xf32>,
    %cst_88 = arith.constant 0.000000e+00 : f32
    %70 = vector.broadcast %cst_88 : f32 to vector<10x1x16xf32>
    %c0_89 = arith.constant 0 : index
    %c0_90 = arith.constant 0 : index
    %c0_91 = arith.constant 0 : index
    %71 = vector.load %arg10[%c0_89, %c0_90, %c0_91] : memref<10x10x16xf32, #tpu.memory_space<vmem>>, vector<10x1x16xf32>
    tpu.vector_store %arg10[%c0_89, %c0_90, %c0_91], %70 {strides = array<i32>} : memref<10x10x16xf32, #tpu.memory_space<vmem>>, vector<10x1x16xf32>,
    %cst_92 = arith.constant 0.000000e+00 : f32
    %72 = vector.broadcast %cst_92 : f32 to vector<10x1x16xf32>
    %c0_93 = arith.constant 0 : index
    %c9_94 = arith.constant 9 : index
    %c0_95 = arith.constant 0 : index
    %73 = vector.load %arg10[%c0_93, %c9_94, %c0_95] : memref<10x10x16xf32, #tpu.memory_space<vmem>>, vector<10x1x16xf32>
    tpu.vector_store %arg10[%c0_93, %c9_94, %c0_95], %72 {strides = array<i32>} : memref<10x10x16xf32, #tpu.memory_space<vmem>>, vector<10x1x16xf32>,
    %74 = vector.shape_cast %65 : vector<64x16xf32> to vector<8x8x16xf32>
    %c1_96 = arith.constant 1 : index
    %c1_97 = arith.constant 1 : index
    %c0_98 = arith.constant 0 : index
    %75 = vector.load %arg10[%c1_96, %c1_97, %c0_98] : memref<10x10x16xf32, #tpu.memory_space<vmem>>, vector<8x8x16xf32>
    tpu.vector_store %arg10[%c1_96, %c1_97, %c0_98], %74 {strides = array<i32>} : memref<10x10x16xf32, #tpu.memory_space<vmem>>, vector<8x8x16xf32>,
    %c0_99 = arith.constant 0 : index
    %c0_100 = arith.constant 0 : index
    %c0_101 = arith.constant 0 : index
    %76 = vector.load %arg10[%c0_99, %c0_100, %c0_101] : memref<10x10x16xf32, #tpu.memory_space<vmem>>, vector<8x8x16xf32>
    %77 = vector.shape_cast %76 : vector<8x8x16xf32> to vector<64x16xf32>
    %78 = arith.truncf %77 : vector<64x16xf32> to vector<64x16xbf16>
    %c0_102 = arith.constant 0 : index
    %c0_103 = arith.constant 0 : index
    %79 = vector.load %arg11[%c0_102, %c0_103] : memref<64x144xbf16, #tpu.memory_space<vmem>>, vector<64x16xbf16>
    tpu.vector_store %arg11[%c0_102, %c0_103], %78 {strides = array<i32>} : memref<64x144xbf16, #tpu.memory_space<vmem>>, vector<64x16xbf16>,
    %c0_104 = arith.constant 0 : index
    %c1_105 = arith.constant 1 : index
    %c0_106 = arith.constant 0 : index
    %80 = vector.load %arg10[%c0_104, %c1_105, %c0_106] : memref<10x10x16xf32, #tpu.memory_space<vmem>>, vector<8x8x16xf32>
    %81 = vector.shape_cast %80 : vector<8x8x16xf32> to vector<64x16xf32>
    %82 = arith.truncf %81 : vector<64x16xf32> to vector<64x16xbf16>
    %c0_107 = arith.constant 0 : index
    %c16 = arith.constant 16 : index
    %83 = vector.load %arg11[%c0_107, %c16] : memref<64x144xbf16, #tpu.memory_space<vmem>>, vector<64x16xbf16>
    tpu.vector_store %arg11[%c0_107, %c16], %82 {strides = array<i32>} : memref<64x144xbf16, #tpu.memory_space<vmem>>, vector<64x16xbf16>,
    %c0_108 = arith.constant 0 : index
    %c2_109 = arith.constant 2 : index
    %c0_110 = arith.constant 0 : index
    %84 = vector.load %arg10[%c0_108, %c2_109, %c0_110] : memref<10x10x16xf32, #tpu.memory_space<vmem>>, vector<8x8x16xf32>
    %85 = vector.shape_cast %84 : vector<8x8x16xf32> to vector<64x16xf32>
    %86 = arith.truncf %85 : vector<64x16xf32> to vector<64x16xbf16>
    %c0_111 = arith.constant 0 : index
    %c32 = arith.constant 32 : index
    %87 = vector.load %arg11[%c0_111, %c32] : memref<64x144xbf16, #tpu.memory_space<vmem>>, vector<64x16xbf16>
    tpu.vector_store %arg11[%c0_111, %c32], %86 {strides = array<i32>} : memref<64x144xbf16, #tpu.memory_space<vmem>>, vector<64x16xbf16>,
    %c1_112 = arith.constant 1 : index
    %c0_113 = arith.constant 0 : index
    %c0_114 = arith.constant 0 : index
    %88 = vector.load %arg10[%c1_112, %c0_113, %c0_114] : memref<10x10x16xf32, #tpu.memory_space<vmem>>, vector<8x8x16xf32>
    %89 = vector.shape_cast %88 : vector<8x8x16xf32> to vector<64x16xf32>
    %90 = arith.truncf %89 : vector<64x16xf32> to vector<64x16xbf16>
    %c0_115 = arith.constant 0 : index
    %c48 = arith.constant 48 : index
    %91 = vector.load %arg11[%c0_115, %c48] : memref<64x144xbf16, #tpu.memory_space<vmem>>, vector<64x16xbf16>
    tpu.vector_store %arg11[%c0_115, %c48], %90 {strides = array<i32>} : memref<64x144xbf16, #tpu.memory_space<vmem>>, vector<64x16xbf16>,
    %c1_116 = arith.constant 1 : index
    %c1_117 = arith.constant 1 : index
    %c0_118 = arith.constant 0 : index
    %92 = vector.load %arg10[%c1_116, %c1_117, %c0_118] : memref<10x10x16xf32, #tpu.memory_space<vmem>>, vector<8x8x16xf32>
    %93 = vector.shape_cast %92 : vector<8x8x16xf32> to vector<64x16xf32>
    %94 = arith.truncf %93 : vector<64x16xf32> to vector<64x16xbf16>
    %c0_119 = arith.constant 0 : index
    %c64 = arith.constant 64 : index
    %95 = vector.load %arg11[%c0_119, %c64] : memref<64x144xbf16, #tpu.memory_space<vmem>>, vector<64x16xbf16>
    tpu.vector_store %arg11[%c0_119, %c64], %94 {strides = array<i32>} : memref<64x144xbf16, #tpu.memory_space<vmem>>, vector<64x16xbf16>,
    %c1_120 = arith.constant 1 : index
    %c2_121 = arith.constant 2 : index
    %c0_122 = arith.constant 0 : index
    %96 = vector.load %arg10[%c1_120, %c2_121, %c0_122] : memref<10x10x16xf32, #tpu.memory_space<vmem>>, vector<8x8x16xf32>
    %97 = vector.shape_cast %96 : vector<8x8x16xf32> to vector<64x16xf32>
    %98 = arith.truncf %97 : vector<64x16xf32> to vector<64x16xbf16>
    %c0_123 = arith.constant 0 : index
    %c80 = arith.constant 80 : index
    %99 = vector.load %arg11[%c0_123, %c80] : memref<64x144xbf16, #tpu.memory_space<vmem>>, vector<64x16xbf16>
    tpu.vector_store %arg11[%c0_123, %c80], %98 {strides = array<i32>} : memref<64x144xbf16, #tpu.memory_space<vmem>>, vector<64x16xbf16>,
    %c2_124 = arith.constant 2 : index
    %c0_125 = arith.constant 0 : index
    %c0_126 = arith.constant 0 : index
    %100 = vector.load %arg10[%c2_124, %c0_125, %c0_126] : memref<10x10x16xf32, #tpu.memory_space<vmem>>, vector<8x8x16xf32>
    %101 = vector.shape_cast %100 : vector<8x8x16xf32> to vector<64x16xf32>
    %102 = arith.truncf %101 : vector<64x16xf32> to vector<64x16xbf16>
    %c0_127 = arith.constant 0 : index
    %c96 = arith.constant 96 : index
    %103 = vector.load %arg11[%c0_127, %c96] : memref<64x144xbf16, #tpu.memory_space<vmem>>, vector<64x16xbf16>
    tpu.vector_store %arg11[%c0_127, %c96], %102 {strides = array<i32>} : memref<64x144xbf16, #tpu.memory_space<vmem>>, vector<64x16xbf16>,
    %c2_128 = arith.constant 2 : index
    %c1_129 = arith.constant 1 : index
    %c0_130 = arith.constant 0 : index
    %104 = vector.load %arg10[%c2_128, %c1_129, %c0_130] : memref<10x10x16xf32, #tpu.memory_space<vmem>>, vector<8x8x16xf32>
    %105 = vector.shape_cast %104 : vector<8x8x16xf32> to vector<64x16xf32>
    %106 = arith.truncf %105 : vector<64x16xf32> to vector<64x16xbf16>
    %c0_131 = arith.constant 0 : index
    %c112 = arith.constant 112 : index
    %107 = vector.load %arg11[%c0_131, %c112] : memref<64x144xbf16, #tpu.memory_space<vmem>>, vector<64x16xbf16>
    tpu.vector_store %arg11[%c0_131, %c112], %106 {strides = array<i32>} : memref<64x144xbf16, #tpu.memory_space<vmem>>, vector<64x16xbf16>,
    %c2_132 = arith.constant 2 : index
    %c2_133 = arith.constant 2 : index
    %c0_134 = arith.constant 0 : index
    %108 = vector.load %arg10[%c2_132, %c2_133, %c0_134] : memref<10x10x16xf32, #tpu.memory_space<vmem>>, vector<8x8x16xf32>
    %109 = vector.shape_cast %108 : vector<8x8x16xf32> to vector<64x16xf32>
    %110 = arith.truncf %109 : vector<64x16xf32> to vector<64x16xbf16>
    %c0_135 = arith.constant 0 : index
    %c128 = arith.constant 128 : index
    %111 = vector.load %arg11[%c0_135, %c128] : memref<64x144xbf16, #tpu.memory_space<vmem>>, vector<64x16xbf16>
    tpu.vector_store %arg11[%c0_135, %c128], %110 {strides = array<i32>} : memref<64x144xbf16, #tpu.memory_space<vmem>>, vector<64x16xbf16>,
    %c0_136 = arith.constant 0 : index
    %c0_137 = arith.constant 0 : index
    %112 = vector.load %arg11[%c0_136, %c0_137] : memref<64x144xbf16, #tpu.memory_space<vmem>>, vector<64x144xbf16>
    %c0_138 = arith.constant 0 : index
    %c0_139 = arith.constant 0 : index
    %113 = vector.load %arg4[%c0_138, %c0_139] : memref<144x32xbf16, #tpu.memory_space<vmem>>, vector<144x32xbf16>
    %cst_140 = arith.constant dense<0.000000e+00> : vector<64x32xf32>
    %114 = tpu.matmul %112, %113, %cst_140 {dimension_numbers = #tpu.dot_dimension_numbers<[1], [0], [0], [1], [0, 0, 1, 1], [], []>} : vector<64x144xbf16>, vector<144x32xbf16>, vector<64x32xf32> -> vector<64x32xf32>
    %c0_141 = arith.constant 0 : index
    %c0_142 = arith.constant 0 : index
    %115 = vector.load %arg5[%c0_141, %c0_142] : memref<1x32xf32, #tpu.memory_space<vmem>>, vector<1x32xf32>
    %116 = vector.broadcast %115 : vector<1x32xf32> to vector<64x32xf32>
    %117 = arith.addf %114, %116 : vector<64x32xf32>
    %118 = vector.shape_cast %117 : vector<64x32xf32> to vector<8x8x32xf32>
    %c0_143 = arith.constant 0 : index
    %c0_144 = arith.constant 0 : index
    %c0_145 = arith.constant 0 : index
    %119 = vector.load %arg12[%c0_143, %c0_144, %c0_145] : memref<8x8x32xf32, #tpu.memory_space<vmem>>, vector<8x8x32xf32>
    tpu.vector_store %arg12[%c0_143, %c0_144, %c0_145], %118 {strides = array<i32>} : memref<8x8x32xf32, #tpu.memory_space<vmem>>, vector<8x8x32xf32>,
    %c0_146 = arith.constant 0 : index
    %c0_147 = arith.constant 0 : index
    %c0_148 = arith.constant 0 : index
    %120 = tpu.strided_load %arg12[%c0_146, %c0_147, %c0_148] {strides = array<i32: 2, 1, 1>} : memref<8x8x32xf32, #tpu.memory_space<vmem>>, vector<4x8x32xf32>
    %c1_149 = arith.constant 1 : index
    %c0_150 = arith.constant 0 : index
    %c0_151 = arith.constant 0 : index
    %121 = tpu.strided_load %arg12[%c1_149, %c0_150, %c0_151] {strides = array<i32: 2, 1, 1>} : memref<8x8x32xf32, #tpu.memory_space<vmem>>, vector<4x8x32xf32>
    %122 = arith.maximumf %120, %121 : vector<4x8x32xf32>
    %c0_152 = arith.constant 0 : index
    %c0_153 = arith.constant 0 : index
    %c0_154 = arith.constant 0 : index
    %123 = vector.load %arg12[%c0_152, %c0_153, %c0_154] : memref<8x8x32xf32, #tpu.memory_space<vmem>>, vector<4x8x32xf32>
    tpu.vector_store %arg12[%c0_152, %c0_153, %c0_154], %122 {strides = array<i32>} : memref<8x8x32xf32, #tpu.memory_space<vmem>>, vector<4x8x32xf32>,
    %c0_155 = arith.constant 0 : index
    %c0_156 = arith.constant 0 : index
    %c0_157 = arith.constant 0 : index
    %124 = tpu.strided_load %arg12[%c0_155, %c0_156, %c0_157] {strides = array<i32: 1, 2, 1>} : memref<8x8x32xf32, #tpu.memory_space<vmem>>, vector<4x4x32xf32>
    %c0_158 = arith.constant 0 : index
    %c1_159 = arith.constant 1 : index
    %c0_160 = arith.constant 0 : index
    %125 = tpu.strided_load %arg12[%c0_158, %c1_159, %c0_160] {strides = array<i32: 1, 2, 1>} : memref<8x8x32xf32, #tpu.memory_space<vmem>>, vector<4x4x32xf32>
    %126 = arith.maximumf %124, %125 : vector<4x4x32xf32>
    %127 = vector.shape_cast %126 : vector<4x4x32xf32> to vector<16x32xf32>
    %c0_161 = arith.constant 0 : index
    %c0_162 = arith.constant 0 : index
    %c0_163 = arith.constant 0 : index
    %128 = vector.load %arg6[%c0_161, %c0_162, %c0_163] : memref<1x16x32xf32, #tpu.memory_space<vmem>>, vector<1x16x32xf32>
    %129 = vector.shape_cast %128 : vector<1x16x32xf32> to vector<16x32xf32>
    %130 = vector.shape_cast %127 : vector<16x32xf32> to vector<1x16x32xf32>
    tpu.vector_store %arg6[%c0_161, %c0_162, %c0_163], %130 {strides = array<i32>} : memref<1x16x32xf32, #tpu.memory_space<vmem>>, vector<1x16x32xf32>,
    return
  }
  func.func @transform_0(%arg0: i32) -> (i32, i32, i32) {
    %c0_i32 = arith.constant 0 : i32
    %c0_i32_0 = arith.constant 0 : i32
    %c0_i32_1 = arith.constant 0 : i32
    return %arg0, %c0_i32, %c0_i32_0 : i32, i32, i32
  }
  func.func @transform_1(%arg0: i32) -> (i32, i32) {
    %c0_i32 = arith.constant 0 : i32
    %c0_i32_0 = arith.constant 0 : i32
    %c0_i32_1 = arith.constant 0 : i32
    return %c0_i32, %c0_i32_0 : i32, i32
  }
  func.func @transform_2(%arg0: i32) -> (i32, i32) {
    %c0_i32 = arith.constant 0 : i32
    %c0_i32_0 = arith.constant 0 : i32
    %c0_i32_1 = arith.constant 0 : i32
    return %c0_i32, %c0_i32_0 : i32, i32
  }
  func.func @transform_3(%arg0: i32) -> (i32, i32) {
    %c0_i32 = arith.constant 0 : i32
    %c0_i32_0 = arith.constant 0 : i32
    %c0_i32_1 = arith.constant 0 : i32
    return %c0_i32, %c0_i32_0 : i32, i32
  }
  func.func @transform_4(%arg0: i32) -> (i32, i32) {
    %c0_i32 = arith.constant 0 : i32
    %c0_i32_0 = arith.constant 0 : i32
    %c0_i32_1 = arith.constant 0 : i32
    return %c0_i32, %c0_i32_0 : i32, i32
  }
  func.func @transform_5(%arg0: i32) -> (i32, i32, i32) {
    %c0_i32 = arith.constant 0 : i32
    %c0_i32_0 = arith.constant 0 : i32
    %c0_i32_1 = arith.constant 0 : i32
    return %arg0, %c0_i32, %c0_i32_0 : i32, i32, i32
  }
}

</mosaic_0001>

<bundles_post_ra>
// kernel: tpu_custom_call.1
= control target key start
LH: loop header
LB: loop body
LE: loop exit
PB: predicated region body
PF: predicated region fallthrough
CT: control target
= control target key end

     0   :  { %10 = vsyncpa [#allocation9], 0  ;;  %s6608_s0 = inlined_call_operand.vmem [shape: f32[2,256,3], index: 0, kind: input, shape index: {}]   ;;  %s6609_s1 = inlined_call_operand.vmem [shape: bf16[27,16], index: 1, kind: input, shape index: {}]   ;;  %s6610_s2 = inlined_call_operand.vmem [shape: f32[1,16], index: 2, kind: input, shape index: {}]   ;;  %s6611_s3 = inlined_call_operand.vmem [shape: bf16[144,32], index: 3, kind: input, shape index: {}]   ;;  %s6612_s4 = inlined_call_operand.vmem [shape: f32[1,32], index: 4, kind: input, shape index: {}]   ;;  %s6613_s5 = inlined_call_operand.hbm [shape: f32[2,16,32], index: 5, kind: output, shape index: {}]  }
   0x1   :  { %12 = vsyncpa [#allocation9 + $0x1], 0  ;;  %s5058_s18 = smov 0   ;;  %s5060_s19 = smov 0  }
   0x2   :  { %s5062_s20 = smov 0   ;;  %s5064_s21 = smov 0  }
   0x3 LB: > { %s5079_s22 = sadd.s32 4294967295, %s5005_s21   ;;  %s4001_s23 = sadd.s32 4294967294, %s5005_s21   ;;  %s5005_s21 = sphi %s5064_s21, %s6619_s21   ;;  %s5001_s20 = sphi %s5062_s20, %s6618_s20   ;;  %s4997_s19 = sphi %s5060_s19, %s6617_s19   ;;  %s4993_s18 = sphi %s5058_s18, %s6616_s18  }
   0x4   : > { %s5083_s24 = sadd.s32 1, %s5005_s21   ;;  %s135_s25 = sadd.s32 1, %s5001_s20 }
   0x5   : > { %s132_s26 = ssub.s32 %s5005_s21, %s5083_s24  ;;  %p145_p0 = scmp.ne.s32.totalorder %s5001_s20, %s4997_s19 }
   0x6   : > { %p133_p1 = scmp.eq.s32.totalorder %s132_s26, 0  ;;  %p146_p2 = scmp.eq.s32.totalorder %s5079_s22, 1 }
   0x7   : > { %p151_p3 = scmp.ne.s32.totalorder %s4997_s19, %s4993_s18  ;;  %p152_p4 = scmp.eq.s32.totalorder %s4001_s23, 1 }
   0x8   : > { %s5094_s27 = scalar_select %p133_p1, %s5001_s20, %s135_s25  }
   0x9   : > { %p5096_p5 = por %p146_p2, %p145_p0  ;;  %p5100_p6 = por %p152_p4, %p151_p3 }
   0xa   : > { %p4004_p7 = scmp.ge.s32.totalorder %s5005_s21, 1  ;;  %p190_p8 = scmp.lt.s32.totalorder %s5005_s21, 3 }
   0xc   : > { %p191_p9 = pnand %p4004_p7, %p190_p8 }
   0xd   : > { %p218_p10 = scmp.lt.s32.totalorder (!%p191_p9), %s5079_s22, 1  ;;  %s5008_s10 = smov (!%p191_p9), 3  }
   0xe   : > { %194 = sbr.rel (%p191_p9) target bundleno = 1287 (0x507), region = 40  ;;  %s5009_s11 = smov (!%p191_p9), 6  }
   0xf   : > { %s5010_s12 = smov (!%p191_p9), 9   ;;  %s5011_s13 = smov (!%p191_p9), 12  }
  0x10   : > { %s5012_s14 = smov (!%p191_p9), 15   ;;  %s5013_s15 = smov (!%p191_p9), 18  }
  0x11   : > { %s5014_s16 = smov (!%p191_p9), 21   ;;  %s5016_s25 = smov (!%p191_p9), 24  }
  0x12   : > { %s5017_s8 = smov (!%p191_p9), 16   ;;  %s5022_s23 = smov (!%p191_p9), 80  }
  0x13   : > { %vm256_vm0 = vcmask 23552   ;;  %vm265_vm1 = vcmask 16384   ;;  %vm259_vm2 = vcmask 17408   ;;  %v5007_v0 = vmov 0.0   ;;  %s219_s30 = scalar_select %p218_p10, %s5079_s22, 1 }
  0x14   : > { %257 = vst.msk [vmem:[#allocation2] sm:$0xff] %vm256_vm0, %v5007_v0  ;;  %258 = vst.msk [vmem:[#allocation2 + $0x8] sm:$0xff] %vm256_vm0, %v5007_v0  ;;  %vm495_vm3 = vcmask 19456   ;;  %vm2768_vm4 = vcmask 1044480   ;;  %vm2769_vm5 = vcmask 1045504   ;;  %vm752_vm6 = vcmask 44056  }
  0x15   : > { %262 = vst.msk [vmem:[#allocation2 + $0x198] sm:$0xff] %vm256_vm0, %v5007_v0  ;;  %263 = vst.msk [vmem:[#allocation2 + $0x1a0] sm:$0xff] %vm256_vm0, %v5007_v0  ;;  %s4430_s6 = sshll.u32 %s219_s30, 8  ;;  %vm1009_vm7 = vcmask 68656   ;;  %vm1266_vm8 = vcmask 93256   ;;  %vm1523_vm9 = vcmask 117856  }
  0x16   : > { %267 = vst.msk [vmem:[#allocation2 + $0x18] sm:$0x1] %vm265_vm1, %v5007_v0  ;;  %268 = vst.msk [vmem:[#allocation2 + $0x30] sm:$0x1] %vm265_vm1, %v5007_v0  ;;  %s5195_s9 = scalar_lea.vmem %s6608_s0, %s4430_s6  ;;  %vm1780_vm10 = vcmask 142456   ;;  %vm2038_vm11 = vcmask 167056  }
  0x17   : > { %269 = vst.msk [vmem:[#allocation2 + $0x48] sm:$0x1] %vm265_vm1, %v5007_v0  ;;  %270 = vst.msk [vmem:[#allocation2 + $0x60] sm:$0x1] %vm265_vm1, %v5007_v0  ;;  %v224_v1 = vld [vmem:[%s5195_s9] sm:$0xff]  ;;  %v225_v2 = vld [vmem:[%s5195_s9 + $0x8] sm:$0xff] }
  0x18   : > { %271 = vst.msk [vmem:[#allocation2 + $0x78] sm:$0x1] %vm265_vm1, %v5007_v0  ;;  %272 = vst.msk [vmem:[#allocation2 + $0x90] sm:$0x1] %vm265_vm1, %v5007_v0  ;;  %v226_v3 = vld [vmem:[%s5195_s9 + $0x10] sm:$0xff]  ;;  %v227_v8 = vld [vmem:[%s5195_s9 + $0x18] sm:$0xff] }
  0x19   : > { %273 = vst.msk [vmem:[#allocation2 + $0xa8] sm:$0x1] %vm265_vm1, %v5007_v0  ;;  %274 = vst.msk [vmem:[#allocation2 + $0xc0] sm:$0x1] %vm265_vm1, %v5007_v0  ;;  %v228_v9 = vld [vmem:[%s5195_s9 + $0x20] sm:$0xff]  ;;  %v229_v12 = vld [vmem:[%s5195_s9 + $0x28] sm:$0xff] }
  0x1a   : > { %275 = vst.msk [vmem:[#allocation2 + $0xd8] sm:$0x1] %vm265_vm1, %v5007_v0  ;;  %276 = vst.msk [vmem:[#allocation2 + $0xf0] sm:$0x1] %vm265_vm1, %v5007_v0  ;;  %v230_v13 = vld [vmem:[%s5195_s9 + $0x30] sm:$0xff]  ;;  %v231_v14 = vld [vmem:[%s5195_s9 + $0x38] sm:$0xff] }
  0x1b   : > { %277 = vst.msk [vmem:[#allocation2 + $0x108] sm:$0x1] %vm265_vm1, %v5007_v0  ;;  %278 = vst.msk [vmem:[#allocation2 + $0x120] sm:$0x1] %vm265_vm1, %v5007_v0  ;;  %v528_v4 = vld [vmem:[#allocation2 + $0x1] sm:$0xff]  ;;  %v234_v51 = vld [vmem:[%s5195_s9 + $0x50] sm:$0xff] }
  0x1c   : > { %279 = vst.msk [vmem:[#allocation2 + $0x138] sm:$0x1] %vm265_vm1, %v5007_v0  ;;  %280 = vst.msk [vmem:[#allocation2 + $0x150] sm:$0x1] %vm265_vm1, %v5007_v0  ;;  %v4463_v6 = vpack.c.bf16 %v528_v4, %v528_v4  ;;  %v785_v11 = vld [vmem:[#allocation2 + $0x2] sm:$0xff]  ;;  %v235_v52 = vld [vmem:[%s5195_s9 + $0x58] sm:$0xff] }
  0x1d   : > { %281 = vst.msk [vmem:[#allocation2 + $0x168] sm:$0x1] %vm265_vm1, %v5007_v0  ;;  %282 = vst.msk [vmem:[#allocation2 + $0x180] sm:$0x1] %vm265_vm1, %v5007_v0  ;;  %v232_v16 = vld [vmem:[%s5195_s9 + $0x40] sm:$0xff]  ;;  %v233_v17 = vld [vmem:[%s5195_s9 + $0x48] sm:$0xff]  ;;  %v4495_v23 = vpack.c.bf16 %v785_v11, %v785_v11 }
  0x1e   : > { %285 = vst.msk [vmem:[#allocation2 + $0x29] sm:$0x1] %vm265_vm1, %v5007_v0  ;;  %286 = vst.msk [vmem:[#allocation2 + $0x41] sm:$0x1] %vm265_vm1, %v5007_v0  ;;  %656 = vrot.lane.b32.xlu0 %v4463_v6, %s5008_s10  ;;  %v336_v20 = vld [vmem:[#allocation2 + $0x8] sm:$0xff]  ;;  %vm2295_vm12 = vcmask 191656  }
  0x1f   : > { %287 = vst.msk [vmem:[#allocation2 + $0x59] sm:$0x1] %vm265_vm1, %v5007_v0  ;;  %288 = vst.msk [vmem:[#allocation2 + $0x71] sm:$0x1] %vm265_vm1, %v5007_v0  ;;  %v4432_v21 = vpack.c.bf16 %v336_v20, %v336_v20  ;;  %vm2552_vm13 = vcmask 216256   ;;  %vm2719_vm14 = vcmask 220160  }
  0x20   : > { %289 = vst.msk [vmem:[#allocation2 + $0x89] sm:$0x1] %vm265_vm1, %v5007_v0  ;;  %290 = vst.msk [vmem:[#allocation2 + $0xa1] sm:$0x1] %vm265_vm1, %v5007_v0  ;;  %vm2936_vm15 = vcmask 130048   ;;  %s5023_s7 = smov 96  }
  0x21   : > { %291 = vst.msk [vmem:[#allocation2 + $0xb9] sm:$0x1] %vm265_vm1, %v5007_v0  ;;  %292 = vst.msk [vmem:[#allocation2 + $0xd1] sm:$0x1] %vm265_vm1, %v5007_v0 }
  0x22   : > { %293 = vst.msk [vmem:[#allocation2 + $0xe9] sm:$0x1] %vm265_vm1, %v5007_v0  ;;  %294 = vst.msk [vmem:[#allocation2 + $0x101] sm:$0x1] %vm265_vm1, %v5007_v0 }
  0x23   : > { %295 = vst.msk [vmem:[#allocation2 + $0x119] sm:$0x1] %vm265_vm1, %v5007_v0  ;;  %296 = vst.msk [vmem:[#allocation2 + $0x131] sm:$0x1] %vm265_vm1, %v5007_v0 }
  0x24   : > { %297 = vst.msk [vmem:[#allocation2 + $0x149] sm:$0x1] %vm265_vm1, %v5007_v0  ;;  %298 = vst.msk [vmem:[#allocation2 + $0x161] sm:$0x1] %vm265_vm1, %v5007_v0 }
  0x25   : > { %299 = vst.msk [vmem:[#allocation2 + $0x179] sm:$0x1] %vm265_vm1, %v5007_v0  ;;  %300 = vst.msk [vmem:[#allocation2 + $0x191] sm:$0x1] %vm265_vm1, %v5007_v0 }
  0x26   : > { %260 = vst.msk [vmem:[#allocation2 + $0x10] sm:$0x3] %vm259_vm2, %v5007_v0  ;;  %264 = vst.msk [vmem:[#allocation2 + $0x1a8] sm:$0x3] %vm259_vm2, %v5007_v0  ;;  %vm3157_vm2 = vcmask 125952  }
  0x27   : > { %266 = vst.msk [vmem:[#allocation2] sm:$0x1] %vm265_vm1, %v5007_v0  ;;  %284 = vst.msk [vmem:[#allocation2 + $0x11] sm:$0x1] %vm265_vm1, %v5007_v0 }
  0x28   : > { %301 = vst.msk [vmem:[#allocation2 + $0x1a9] sm:$0x1] %vm265_vm1, %v5007_v0  ;;  %283 = vst.msk [vmem:[#allocation2 + $0x198] sm:$0x1] %vm265_vm1, %v5007_v0  ;;  %vm3087_vm1 = vcmask 122880  }
  0x29   : > { %303 = vst.msk [vmem:[#allocation2 + $0x19] sm:$0xff] %vm256_vm0, %v224_v1  ;;  %304 = vst.msk [vmem:[#allocation2 + $0x21] sm:$0xff] %vm256_vm0, %v225_v2  ;;  %v236_v1 = vld [vmem:[%s5195_s9 + $0x60] sm:$0xff] }
  0x2a   : > { %305 = vst.msk [vmem:[#allocation2 + $0x31] sm:$0xff] %vm256_vm0, %v226_v3  ;;  %306 = vst.msk [vmem:[#allocation2 + $0x39] sm:$0xff] %vm256_vm0, %v227_v8  ;;  %v237_v3 = vld [vmem:[%s5195_s9 + $0x68] sm:$0xff] }
  0x2b   : > { %307 = vst.msk [vmem:[#allocation2 + $0x49] sm:$0xff] %vm256_vm0, %v228_v9  ;;  %308 = vst.msk [vmem:[#allocation2 + $0x51] sm:$0xff] %vm256_vm0, %v229_v12  ;;  %v4905_v12 = vld [vmem:[%s6609_s1 + $0x8] sm:$0x3f]  }
  0x2c   : > { %309 = vst.msk [vmem:[#allocation2 + $0x61] sm:$0xff] %vm256_vm0, %v230_v13  ;;  %310 = vst.msk [vmem:[#allocation2 + $0x69] sm:$0xff] %vm256_vm0, %v231_v14  ;;  %v5015_v13 = vmov 65535  }
  0x2d   : > { %v529_v5 = vld [vmem:[#allocation2 + $0x9] sm:$0xff]  ;;  %311 = vst.msk [vmem:[#allocation2 + $0x79] sm:$0xff] %vm256_vm0, %v232_v16  ;;  %312 = vst.msk [vmem:[#allocation2 + $0x81] sm:$0xff] %vm256_vm0, %v233_v17  ;;  %v2770_v14 = vsel %vm2768_vm4, 4294967295, %v5015_v13  ;;  %vm3287_vm4 = vcmask 388352  }
  0x2e   : > { %v786_v7 = vld [vmem:[#allocation2 + $0xa] sm:$0xff]  ;;  %v4464_v15 = vpack.c.bf16 %v529_v5, %v529_v5  ;;  %v335_v18 = vld [vmem:[#allocation2] sm:$0xff]  ;;  %497 = vst.msk [vmem:[#allocation3 + $0x4] sm:$0xf] %vm495_vm3, %v4432_v21 }
  0x2f   : > { %v4496_v10 = vpack.c.bf16 %v786_v7, %v786_v7  ;;  %v4431_v19 = vpack.c.bf16 %v335_v18, %v335_v18  ;;  %313 = vst.msk [vmem:[#allocation2 + $0x91] sm:$0xff] %vm256_vm0, %v234_v51  ;;  %314 = vst.msk [vmem:[#allocation2 + $0x99] sm:$0xff] %vm256_vm0, %v235_v52  ;;  %v4907_v18 = vld [vmem:[%s6609_s1] sm:$0xff]  }
  0x30   : > { %658 = vrot.lane.b32.xlu0 %v4464_v15, %s5008_s10  ;;  %v530_v22 = vld [vmem:[#allocation2 + $0x19] sm:$0xff]  ;;  %v531_v24 = vld [vmem:[#allocation2 + $0x21] sm:$0xff]  ;;  %315 = vst.msk [vmem:[#allocation2 + $0xa9] sm:$0xff] %vm256_vm0, %v236_v1  ;;  %316 = vst.msk [vmem:[#allocation2 + $0xb1] sm:$0xff] %vm256_vm0, %v237_v3  ;;  %v2771_v15 = vsel %vm2769_vm5, %v2770_v14, 0  ;;  %vm3352_vm5 = vcmask 519552  }
  0x31   : > { %915 = vrot.lane.b32.xlu1 %v4496_v10, %s5009_s11  ;;  %496 = vst.msk [vmem:[#allocation3] sm:$0xf] %vm495_vm3, %v4431_v19  ;;  %v4465_v25 = vpack.c.bf16 %v530_v22, %v530_v22  ;;  %v787_v26 = vld [vmem:[#allocation2 + $0x1a] sm:$0xff]  ;;  %v1044_v31 = vld [vmem:[#allocation2 + $0x30] sm:$0xff]  ;;  %v4466_v33 = vpack.c.bf16 %v531_v24, %v531_v24  ;;  %v788_v37 = vld [vmem:[#allocation2 + $0x22] sm:$0xff]  ;;  %v2773_v16 = vand.u32 %v4905_v12, %v2771_v15 }
  0x32   : > { %v1042_v27 = vld [vmem:[#allocation2 + $0x18] sm:$0xff]  ;;  %v1043_v28 = vld [vmem:[#allocation2 + $0x20] sm:$0xff]  ;;  %v5223_v34 = vpack.c.bf16 %v1044_v31, %v1044_v31  ;;  %v4497_v36 = vpack.c.bf16 %v787_v26, %v787_v26  ;;  %v1816_v38 = vld [vmem:[#allocation2 + $0x48] sm:$0xff]  ;;  %v4498_v44 = vpack.c.bf16 %v788_v37, %v788_v37  ;;  %3081 = vst.msk [vmem:[#allocation5] sm:$0xff] %vm2936_vm15, %v5007_v0 }
  0x33   : > { %v4527_v29 = vpack.c.bf16 %v1042_v27, %v1042_v27  ;;  %v4528_v30 = vpack.c.bf16 %v1043_v28, %v1043_v28  ;;  %v1045_v32 = vld [vmem:[#allocation2 + $0x38] sm:$0xff]  ;;  %v1817_v39 = vld [vmem:[#allocation2 + $0x50] sm:$0xff]  ;;  %v5230_v40 = vpack.c.bf16 %v1816_v38, %v1816_v38  ;;  %v1048_v42 = vld [vmem:[#allocation2 + $0x60] sm:$0xff]  ;;  %4810 = vmatprep.subr.bf16.mxu0 %v2773_v16  ;;  %3085 = vst.msk [vmem:[#allocation5 + $0x90] sm:$0xff] %vm2936_vm15, %v5007_v0 }
  0x34   : > { %v5225_v35 = vpack.c.bf16 %v1045_v32, %v1045_v32  ;;  %913 = vrot.lane.b32.xlu0 %v4495_v23, %s5009_s11  ;;  %v5232_v41 = vpack.c.bf16 %v1817_v39, %v1817_v39  ;;  %500 = vst.msk [vmem:[#allocation3 + $0x10] sm:$0xf] %vm495_vm3, %v5223_v34  ;;  %v1049_v43 = vld [vmem:[#allocation2 + $0x68] sm:$0xff]  ;;  %v5239_v45 = vpack.c.bf16 %v1048_v42, %v1048_v42  ;;  %v1820_v47 = vld [vmem:[#allocation2 + $0x78] sm:$0xff]  ;;  %v1821_v48 = vld [vmem:[#allocation2 + $0x80] sm:$0xff] }
  0x35   : > { %660 = vrot.lane.b32.xlu1 %v4465_v25, %s5008_s10  ;;  %498 = vst.msk [vmem:[#allocation3 + $0x8] sm:$0xf] %vm495_vm3, %v4527_v29  ;;  %499 = vst.msk [vmem:[#allocation3 + $0xc] sm:$0xf] %vm495_vm3, %v4528_v30  ;;  %v5241_v46 = vpack.c.bf16 %v1049_v43, %v1049_v43  ;;  %v5248_v49 = vpack.c.bf16 %v1820_v47, %v1820_v47  ;;  %v5250_v50 = vpack.c.bf16 %v1821_v48, %v1821_v48  ;;  %v1301_v53 = vld [vmem:[#allocation2 + $0x31] sm:$0xff]  ;;  %v1302_v59 = vld [vmem:[#allocation2 + $0x39] sm:$0xff] }
  0x36   : > { %501 = vst.msk [vmem:[#allocation3 + $0x14] sm:$0xf] %vm495_vm3, %v5225_v35  ;;  %502 = vst.msk [vmem:[#allocation3 + $0x18] sm:$0xf] %vm495_vm3, %v5230_v40  ;;  %v1052_v54 = vld [vmem:[#allocation2 + $0x90] sm:$0xff]  ;;  %v1053_v55 = vld [vmem:[#allocation2 + $0x98] sm:$0xff]  ;;  %v4561_v58 = vpack.c.bf16 %v1301_v53, %v1301_v53  ;;  %v4562_v60 = vpack.c.bf16 %v1302_v59, %v1302_v59  ;;  %4811 = vmatpush3.bf16.msra.mxu0 %v2773_v16 }
  0x37   : > { %503 = vst.msk [vmem:[#allocation3 + $0x1c] sm:$0xf] %vm495_vm3, %v5232_v41  ;;  %504 = vst.msk [vmem:[#allocation3 + $0x20] sm:$0xf] %vm495_vm3, %v5239_v45  ;;  %v5271_v56 = vpack.c.bf16 %v1052_v54, %v1052_v54  ;;  %v5273_v57 = vpack.c.bf16 %v1053_v55, %v1053_v55  ;;  %v1558_v61 = vld [vmem:[#allocation2 + $0x32] sm:$0xff]  ;;  %v1559_v63 = vld [vmem:[#allocation2 + $0x3a] sm:$0xff]  ;;  %4812 = vmatprep.subr.bf16.mxu0 %v4907_v18 }
  0x38   : > { %917 = vrot.lane.b32.xlu0 %v4497_v36, %s5009_s11  ;;  %505 = vst.msk [vmem:[#allocation3 + $0x24] sm:$0xf] %vm495_vm3, %v5241_v46  ;;  %506 = vst.msk [vmem:[#allocation3 + $0x28] sm:$0xf] %vm495_vm3, %v5248_v49  ;;  %v4593_v62 = vpack.c.bf16 %v1558_v61, %v1558_v61  ;;  %v4594_v2 = vpack.c.bf16 %v1559_v63, %v1559_v63  ;;  %v1824_v4 = vld [vmem:[#allocation2 + $0xa8] sm:$0xff]  ;;  %v1825_v6 = vld [vmem:[#allocation2 + $0xb0] sm:$0xff] }
  0x39   : > { %662 = vrot.lane.b32.xlu1 %v4466_v33, %s5008_s10  ;;  %507 = vst.msk [vmem:[#allocation3 + $0x2c] sm:$0xf] %vm495_vm3, %v5250_v50  ;;  %508 = vst.msk [vmem:[#allocation3 + $0x30] sm:$0xf] %vm495_vm3, %v5271_v56  ;;  %v5295_v5 = vpack.c.bf16 %v1824_v4, %v1824_v4  ;;  %v2073_v7 = vld [vmem:[#allocation2 + $0x49] sm:$0xff]  ;;  %v5299_v8 = vpack.c.bf16 %v1825_v6, %v1825_v6  ;;  %v2074_v10 = vld [vmem:[#allocation2 + $0x51] sm:$0xff] }
  0x3a   : > { %509 = vst.msk [vmem:[#allocation3 + $0x34] sm:$0xf] %vm495_vm3, %v5273_v57  ;;  %v4657_v9 = vpack.c.bf16 %v2073_v7, %v2073_v7  ;;  %v4658_v11 = vpack.c.bf16 %v2074_v10, %v2074_v10  ;;  %v2330_v17 = vld [vmem:[#allocation2 + $0x4a] sm:$0xff]  ;;  %v2331_v20 = vld [vmem:[#allocation2 + $0x52] sm:$0xff]  ;;  %4813 = vmatpush3.bf16.msra.mxu0 %v4907_v18  ;;  %v1305_v27 = vld [vmem:[#allocation2 + $0x61] sm:$0xff] }
  0x3b   : > { %510 = vst.msk [vmem:[#allocation3 + $0x38] sm:$0xf] %vm495_vm3, %v5295_v5  ;;  %511 = vst.msk [vmem:[#allocation3 + $0x3c] sm:$0xf] %vm495_vm3, %v5299_v8  ;;  %v4689_v19 = vpack.c.bf16 %v2330_v17, %v2330_v17  ;;  %v4690_v21 = vpack.c.bf16 %v2331_v20, %v2331_v20  ;;  %v238_v22 = vld [vmem:[%s5195_s9 + $0x70] sm:$0xff]  ;;  %v239_v23 = vld [vmem:[%s5195_s9 + $0x78] sm:$0xff] }
  0x3c   : > { %1170 = vrot.lane.b32.xlu0 %v4527_v29, %s5010_s12  ;;  %317 = vst.msk [vmem:[#allocation2 + $0xc1] sm:$0xff] %vm256_vm0, %v238_v22  ;;  %318 = vst.msk [vmem:[#allocation2 + $0xc9] sm:$0xff] %vm256_vm0, %v239_v23  ;;  %v4565_v29 = vpack.c.bf16 %v1305_v27, %v1305_v27  ;;  %v1562_v32 = vld [vmem:[#allocation2 + $0x62] sm:$0xff]  ;;  %v2334_v52 = vld [vmem:[#allocation2 + $0x7a] sm:$0xff] }
  0x3d   : > { %919 = vrot.lane.b32.xlu1 %v4498_v44, %s5009_s11  ;;  %v241_v37 = vld [vmem:[%s5195_s9 + $0x88] sm:$0xff]  ;;  %v5403_v54 = vpack.c.bf16 %v2334_v52, %v2334_v52  ;;  %v242_v4 = vld [vmem:[%s5195_s9 + $0x90] sm:$0xff]  ;;  %v243_v6 = vld [vmem:[%s5195_s9 + $0x98] sm:$0xff]  ;;  %3088 = vst.msk [vmem:[#allocation5] sm:$0x1] %vm3087_vm1, %v5007_v0 }
  0x3e   : > { %320 = vst.msk [vmem:[#allocation2 + $0xe1] sm:$0xff] %vm256_vm0, %v241_v37  ;;  %v2335_v55 = vld [vmem:[#allocation2 + $0x82] sm:$0xff]  ;;  %321 = vst.msk [vmem:[#allocation2 + $0xf1] sm:$0xff] %vm256_vm0, %v242_v4  ;;  %v1309_v16 = vld [vmem:[#allocation2 + $0x91] sm:$0xff] }
  0x3f   : > { %322 = vst.msk [vmem:[#allocation2 + $0xf9] sm:$0xff] %vm256_vm0, %v243_v6  ;;  %v1310_v18 = vld [vmem:[#allocation2 + $0x99] sm:$0xff] }
  0x40   : > { %1174 = vrot.lane.b32.xlu0 %v5223_v34, %s5010_s12  ;;  %v1566_v23 = vld [vmem:[#allocation2 + $0x92] sm:$0xff]  ;;  %v1567_v27 = vld [vmem:[#allocation2 + $0x9a] sm:$0xff]  ;;  %3089 = vst.msk [vmem:[#allocation5 + $0x10] sm:$0x1] %vm3087_vm1, %v5007_v0  ;;  %3090 = vst.msk [vmem:[#allocation5 + $0x20] sm:$0x1] %vm3087_vm1, %v5007_v0 }
  0x41   : > { %1172 = vrot.lane.b32.xlu1 %v4528_v30, %s5010_s12  ;;  %v1306_v30 = vld [vmem:[#allocation2 + $0x69] sm:$0xff]  ;;  %3091 = vst.msk [vmem:[#allocation5 + $0x30] sm:$0x1] %vm3087_vm1, %v5007_v0  ;;  %3092 = vst.msk [vmem:[#allocation5 + $0x40] sm:$0x1] %vm3087_vm1, %v5007_v0 }
  0x42   : > { %v4566_v31 = vpack.c.bf16 %v1306_v30, %v1306_v30  ;;  %3093 = vst.msk [vmem:[#allocation5 + $0x50] sm:$0x1] %vm3087_vm1, %v5007_v0  ;;  %3094 = vst.msk [vmem:[#allocation5 + $0x60] sm:$0x1] %vm3087_vm1, %v5007_v0 }
  0x43   : > { %v1056_v24 = vld [vmem:[#allocation2 + $0xc0] sm:$0xff]  ;;  %v1057_v26 = vld [vmem:[#allocation2 + $0xc8] sm:$0xff]  ;;  %3095 = vst.msk [vmem:[#allocation5 + $0x70] sm:$0x1] %vm3087_vm1, %v5007_v0  ;;  %3096 = vst.msk [vmem:[#allocation5 + $0x80] sm:$0x1] %vm3087_vm1, %v5007_v0 }
  0x44   : > { %1427 = vrot.lane.b32.xlu0 %v4465_v25, %s5011_s13  ;;  %v5337_v25 = vpack.c.bf16 %v1056_v24, %v1056_v24  ;;  %v5341_v28 = vpack.c.bf16 %v1057_v26, %v1057_v26  ;;  %v5476_v26 = vpack.c.bf16 %v1566_v23, %v1566_v23  ;;  %v1314_v23 = vld [vmem:[#allocation2 + $0xc9] sm:$0xff]  ;;  %3097 = vst.msk [vmem:[#allocation5 + $0x90] sm:$0x1] %vm3087_vm1, %v5007_v0  ;;  %3099 = vst.msk [vmem:[#allocation5 + $0x19] sm:$0x1] %vm3087_vm1, %v5007_v0 }
  0x45   : > { %1176 = vrot.lane.b32.xlu1 %v5225_v35, %s5010_s12  ;;  %v1060_v12 = vld [vmem:[#allocation2 + $0xf0] sm:$0xff]  ;;  %3100 = vst.msk [vmem:[#allocation5 + $0x29] sm:$0x1] %vm3087_vm1, %v5007_v0  ;;  %3101 = vst.msk [vmem:[#allocation5 + $0x39] sm:$0x1] %vm3087_vm1, %v5007_v0 }
  0x46   : > { %512 = vst.msk [vmem:[#allocation3 + $0x40] sm:$0xf] %vm495_vm3, %v5337_v25  ;;  %513 = vst.msk [vmem:[#allocation3 + $0x44] sm:$0xf] %vm495_vm3, %v5341_v28  ;;  %v5444_v13 = vpack.c.bf16 %v1060_v12, %v1060_v12  ;;  %v1061_v14 = vld [vmem:[#allocation2 + $0xf8] sm:$0xff] }
  0x47   : > { %v247_v12 = vld [vmem:[%s5195_s9 + $0xb8] sm:$0xff]  ;;  %3102 = vst.msk [vmem:[#allocation5 + $0x49] sm:$0x1] %vm3087_vm1, %v5007_v0  ;;  %3103 = vst.msk [vmem:[#allocation5 + $0x59] sm:$0x1] %vm3087_vm1, %v5007_v0 }
  0x48   : > { %1431 = vrot.lane.b32.xlu0 %v4561_v58, %s5011_s13  ;;  %516 = vst.msk [vmem:[#allocation3 + $0x50] sm:$0xf] %vm495_vm3, %v5444_v13 }
  0x49   : > { %1429 = vrot.lane.b32.xlu1 %v4466_v33, %s5011_s13  ;;  %v5354_v33 = vpack.c.bf16 %v1562_v32, %v1562_v32  ;;  %v5483_v32 = vpack.c.bf16 %v1567_v27, %v1567_v27  ;;  %326 = vst.msk [vmem:[#allocation2 + $0x129] sm:$0xff] %vm256_vm0, %v247_v12  ;;  %v5604_v27 = vpack.c.bf16 %v1314_v23, %v1314_v23 }
  0x4a   : > { %3104 = vst.msk [vmem:[#allocation5 + $0x69] sm:$0x1] %vm3087_vm1, %v5007_v0  ;;  %3105 = vst.msk [vmem:[#allocation5 + $0x79] sm:$0x1] %vm3087_vm1, %v5007_v0 }
  0x4b   : > { %3106 = vst.msk [vmem:[#allocation5 + $0x89] sm:$0x1] %vm3087_vm1, %v5007_v0 }
  0x4c   : > { %1684 = vrot.lane.b32.xlu0 %v4497_v36, %s5012_s14 }
  0x4d   : > { %1433 = vrot.lane.b32.xlu1 %v4562_v60, %s5011_s13 }
  0x50   : > { %1688 = vrot.lane.b32.xlu0 %v4593_v62, %s5012_s14 }
  0x51   : > { %1686 = vrot.lane.b32.xlu1 %v4498_v44, %s5012_s14  ;;  %v2078_v44 = vld [vmem:[#allocation2 + $0x81] sm:$0xff] }
  0x52   : > { %v5388_v47 = vpack.c.bf16 %v2078_v44, %v2078_v44  ;;  %v2081_v44 = vld [vmem:[#allocation2 + $0xa9] sm:$0xff] }
  0x54   : > { %1942 = vrot.lane.b32.xlu0 %v5223_v34, %s5013_s15  ;;  %v1563_v34 = vld [vmem:[#allocation2 + $0x6a] sm:$0xff] }
  0x55   : > { %1690 = vrot.lane.b32.xlu1 %v4594_v2, %s5012_s14  ;;  %v5358_v36 = vpack.c.bf16 %v1563_v34, %v1563_v34 }
  0x58   : > { %1946 = vrot.lane.b32.xlu0 %v5230_v40, %s5013_s15 }
  0x59   : > { %1944 = vrot.lane.b32.xlu1 %v5225_v35, %s5013_s15  ;;  %v240_v35 = vld [vmem:[%s5195_s9 + $0x80] sm:$0xff] }
  0x5a   : > { %319 = vst.msk [vmem:[#allocation2 + $0xd9] sm:$0xff] %vm256_vm0, %v240_v35 }
  0x5c   : > { %2199 = vrot.lane.b32.xlu0 %v4561_v58, %s5014_s16 }
  0x5d   : > { %1948 = vrot.lane.b32.xlu1 %v5232_v41, %s5013_s15 }
  0x60   : > { %2203 = vrot.lane.b32.xlu0 %v4657_v9, %s5014_s16 }
  0x61   : > { %2201 = vrot.lane.b32.xlu1 %v4562_v60, %s5014_s16  ;;  %v1828_v38 = vld [vmem:[#allocation2 + $0xd8] sm:$0xff] }
  0x62   : > { %v5371_v39 = vpack.c.bf16 %v1828_v38, %v1828_v38 }
  0x64   : > { %2456 = vrot.lane.b32.xlu0 %v4593_v62, %s5016_s25  ;;  %514 = vst.msk [vmem:[#allocation3 + $0x48] sm:$0xf] %vm495_vm3, %v5371_v39 }
  0x65   : > { %2205 = vrot.lane.b32.xlu1 %v4658_v11, %s5014_s16 }
  0x68   : > { %664 = vrot.lane.b32.xlu0 %v4561_v58, %s5008_s10 }
  0x69   : > { %2458 = vrot.lane.b32.xlu1 %v4594_v2, %s5016_s25 }
  0x6c   : > { %2460 = vrot.lane.b32.xlu0 %v4689_v19, %s5016_s25 }
  0x6d   : > { %666 = vrot.lane.b32.xlu1 %v4562_v60, %s5008_s10  ;;  %v5408_v60 = vpack.c.bf16 %v2335_v55, %v2335_v55 }
  0x70   : > { %668 = vrot.lane.b32.xlu0 %v4657_v9, %s5008_s10 }
  0x71   : > { %2462 = vrot.lane.b32.xlu1 %v4690_v21, %s5016_s25 }
  0x74   : > { %921 = vrot.lane.b32.xlu0 %v4593_v62, %s5009_s11 }
  0x75   : > { %670 = vrot.lane.b32.xlu1 %v4658_v11, %s5008_s10 }
  0x78   : > { %925 = vrot.lane.b32.xlu0 %v4689_v19, %s5009_s11 }
  0x79   : > { %923 = vrot.lane.b32.xlu1 %v4594_v2, %s5009_s11 }
  0x7c   : > { %1178 = vrot.lane.b32.xlu0 %v5230_v40, %s5010_s12  ;;  %v1829_v40 = vld [vmem:[#allocation2 + $0xe0] sm:$0xff] }
  0x7d   : > { %927 = vrot.lane.b32.xlu1 %v4690_v21, %s5009_s11  ;;  %v5375_v42 = vpack.c.bf16 %v1829_v40, %v1829_v40 }
  0x7f   : > { %515 = vst.msk [vmem:[#allocation3 + $0x4c] sm:$0xf] %vm495_vm3, %v5375_v42 }
  0x80   : > { %1182 = vrot.lane.b32.xlu0 %v5239_v45, %s5010_s12 }
  0x81   : > { %1180 = vrot.lane.b32.xlu1 %v5232_v41, %s5010_s12  ;;  %v2077_v41 = vld [vmem:[#allocation2 + $0x79] sm:$0xff] }
  0x82   : > { %v5384_v43 = vpack.c.bf16 %v2077_v41, %v2077_v41 }
  0x84   : > { %1435 = vrot.lane.b32.xlu0 %v4657_v9, %s5011_s13 }
  0x85   : > { %1184 = vrot.lane.b32.xlu1 %v5241_v46, %s5010_s12 }
  0x88   : > { %1439 = vrot.lane.b32.xlu0 %v4565_v29, %s5011_s13 }
  0x89   : > { %1437 = vrot.lane.b32.xlu1 %v4658_v11, %s5011_s13 }
  0x8c   : > { %1692 = vrot.lane.b32.xlu0 %v4689_v19, %s5012_s14 }
  0x8d   : > { %1441 = vrot.lane.b32.xlu1 %v4566_v31, %s5011_s13 }
  0x90   : > { %1696 = vrot.lane.b32.xlu0 %v5354_v33, %s5012_s14 }
  0x91   : > { %1694 = vrot.lane.b32.xlu1 %v4690_v21, %s5012_s14  ;;  %v5466_v21 = vpack.c.bf16 %v1310_v18, %v1310_v18 }
  0x94   : > { %1950 = vrot.lane.b32.xlu0 %v5239_v45, %s5013_s15  ;;  %v657_v45 = vpop.permute.xlu0 %656 }
  0x95   : > { %1698 = vrot.lane.b32.xlu1 %v5358_v36, %s5012_s14  ;;  %753 = vst.msk [vmem:[#allocation3] sm:$0xf] %vm752_vm6, %v657_v45 }
  0x98   : > { %1954 = vrot.lane.b32.xlu0 %v5248_v49, %s5013_s15 }
  0x99   : > { %1952 = vrot.lane.b32.xlu1 %v5241_v46, %s5013_s15 }
  0x9c   : > { %2207 = vrot.lane.b32.xlu0 %v4565_v29, %s5014_s16 }
  0x9d   : > { %1956 = vrot.lane.b32.xlu1 %v5250_v50, %s5013_s15 }
  0xa0   : > { %2211 = vrot.lane.b32.xlu0 %v5384_v43, %s5014_s16 }
  0xa1   : > { %2209 = vrot.lane.b32.xlu1 %v4566_v31, %s5014_s16 }
  0xa2   : > { %v659_v48 = vpop.permute.xlu0 %658 }
  0xa3   : > { %v916_v46 = vpop.permute.xlu1 %915  ;;  %754 = vst.msk [vmem:[#allocation3 + $0x4] sm:$0xf] %vm752_vm6, %v659_v48 }
  0xa4   : > { %2464 = vrot.lane.b32.xlu0 %v5354_v33, %s5016_s25  ;;  %1011 = vst.msk [vmem:[#allocation3 + $0x4] sm:$0xf] %vm1009_vm7, %v916_v46  ;;  %v2082_v46 = vld [vmem:[#allocation2 + $0xb1] sm:$0xff] }
  0xa5   : > { %2213 = vrot.lane.b32.xlu1 %v5388_v47, %s5014_s16 }
  0xa6   : > { %v914_v53 = vpop.permute.xlu0 %913 }
  0xa7   : > { %v661_v51 = vpop.permute.xlu1 %660  ;;  %1010 = vst.msk [vmem:[#allocation3] sm:$0xf] %vm1009_vm7, %v914_v53 }
  0xa8   : > { %755 = vst.msk [vmem:[#allocation3 + $0x8] sm:$0xf] %vm752_vm6, %v661_v51  ;;  %672 = vrot.lane.b32.xlu0 %v4565_v29, %s5008_s10  ;;  %v5522_v51 = vpack.c.bf16 %v2082_v46, %v2082_v46 }
  0xa9   : > { %2466 = vrot.lane.b32.xlu1 %v5358_v36, %s5016_s25 }
  0xaa   : > { %v918_v59 = vpop.permute.xlu0 %917 }
  0xab   : > { %v663_v58 = vpop.permute.xlu1 %662  ;;  %1012 = vst.msk [vmem:[#allocation3 + $0x8] sm:$0xf] %vm1009_vm7, %v918_v59 }
  0xac   : > { %756 = vst.msk [vmem:[#allocation3 + $0xc] sm:$0xf] %vm752_vm6, %v663_v58  ;;  %2468 = vrot.lane.b32.xlu0 %v5403_v54, %s5016_s25  ;;  %v2338_v58 = vld [vmem:[#allocation2 + $0xaa] sm:$0xff] }
  0xad   : > { %674 = vrot.lane.b32.xlu1 %v4566_v31, %s5008_s10  ;;  %v244_v31 = vld [vmem:[%s5195_s9 + $0xa0] sm:$0xff] }
  0xae   : > { %v1171_v62 = vpop.permute.xlu0 %1170  ;;  %323 = vst.msk [vmem:[#allocation2 + $0x109] sm:$0xff] %vm256_vm0, %v244_v31 }
  0xaf   : > { %v920_v61 = vpop.permute.xlu1 %919  ;;  %1267 = vst.msk [vmem:[#allocation3] sm:$0xf] %vm1266_vm8, %v1171_v62 }
  0xb0   : > { %1013 = vst.msk [vmem:[#allocation3 + $0xc] sm:$0xf] %vm1009_vm7, %v920_v61  ;;  %676 = vrot.lane.b32.xlu0 %v5384_v43, %s5008_s10  ;;  %v2339_v61 = vld [vmem:[#allocation2 + $0xb2] sm:$0xff] }
  0xb1   : > { %2470 = vrot.lane.b32.xlu1 %v5408_v60, %s5016_s25 }
  0xb2   : > { %v1175_v1 = vpop.permute.xlu0 %1174 }
  0xb3   : > { %v1173_v63 = vpop.permute.xlu1 %1172  ;;  %1269 = vst.msk [vmem:[#allocation3 + $0x8] sm:$0xf] %vm1266_vm8, %v1175_v1 }
  0xb4   : > { %1268 = vst.msk [vmem:[#allocation3 + $0x4] sm:$0xf] %vm1266_vm8, %v1173_v63  ;;  %929 = vrot.lane.b32.xlu0 %v5354_v33, %s5009_s11  ;;  %v245_v33 = vld [vmem:[%s5195_s9 + $0xa8] sm:$0xff] }
  0xb5   : > { %678 = vrot.lane.b32.xlu1 %v5388_v47, %s5008_s10  ;;  %324 = vst.msk [vmem:[#allocation2 + $0x111] sm:$0xff] %vm256_vm0, %v245_v33  ;;  %v1832_v38 = vld [vmem:[#allocation2 + $0x108] sm:$0xff] }
  0xb6   : > { %v1428_v3 = vpop.permute.xlu0 %1427  ;;  %v5500_v40 = vpack.c.bf16 %v1832_v38, %v1832_v38  ;;  %v1571_v33 = vld [vmem:[#allocation2 + $0xca] sm:$0xff] }
  0xb7   : > { %v1177_v2 = vpop.permute.xlu1 %1176  ;;  %1524 = vst.msk [vmem:[#allocation3] sm:$0xf] %vm1523_vm9, %v1428_v3  ;;  %v249_v38 = vld [vmem:[%s5195_s9 + $0xc8] sm:$0xff] }
  0xb8   : > { %1270 = vst.msk [vmem:[#allocation3 + $0xc] sm:$0xf] %vm1266_vm8, %v1177_v2  ;;  %933 = vrot.lane.b32.xlu0 %v5403_v54, %s5009_s11  ;;  %v5546_v2 = vpack.c.bf16 %v2339_v61, %v2339_v61 }
  0xb9   : > { %931 = vrot.lane.b32.xlu1 %v5358_v36, %s5009_s11  ;;  %518 = vst.msk [vmem:[#allocation3 + $0x58] sm:$0xf] %vm495_vm3, %v5500_v40 }
  0xba   : > { %v1432_v9 = vpop.permute.xlu0 %1431  ;;  %328 = vst.msk [vmem:[#allocation2 + $0x141] sm:$0xff] %vm256_vm0, %v249_v38  ;;  %v1575_v38 = vld [vmem:[#allocation2 + $0xfa] sm:$0xff] }
  0xbb   : > { %v1430_v7 = vpop.permute.xlu1 %1429  ;;  %1526 = vst.msk [vmem:[#allocation3 + $0x8] sm:$0xf] %vm1523_vm9, %v1432_v9 }
  0xbc   : > { %1525 = vst.msk [vmem:[#allocation3 + $0x4] sm:$0xf] %vm1523_vm9, %v1430_v7  ;;  %1186 = vrot.lane.b32.xlu0 %v5248_v49, %s5010_s12  ;;  %v5448_v49 = vpack.c.bf16 %v1061_v14, %v1061_v14  ;;  %v1833_v41 = vld [vmem:[#allocation2 + $0x110] sm:$0xff] }
  0xbd   : > { %935 = vrot.lane.b32.xlu1 %v5408_v60, %s5009_s11 }
  0xbe   : > { %v1685_v11 = vpop.permute.xlu0 %1684  ;;  %517 = vst.msk [vmem:[#allocation3 + $0x54] sm:$0xf] %vm495_vm3, %v5448_v49 }
  0xbf   : > { %v1434_v10 = vpop.permute.xlu1 %1433  ;;  %1781 = vst.msk [vmem:[#allocation3] sm:$0xf] %vm1780_vm10, %v1685_v11  ;;  %v246_v11 = vld [vmem:[%s5195_s9 + $0xb0] sm:$0xff] }
  0xc0   : > { %1527 = vst.msk [vmem:[#allocation3 + $0xc] sm:$0xf] %vm1523_vm9, %v1434_v10  ;;  %1190 = vrot.lane.b32.xlu0 %v5271_v56, %s5010_s12 }
  0xc1   : > { %1188 = vrot.lane.b32.xlu1 %v5250_v50, %s5010_s12  ;;  %v5460_v50 = vpack.c.bf16 %v1309_v16, %v1309_v16  ;;  %325 = vst.msk [vmem:[#allocation2 + $0x121] sm:$0xff] %vm256_vm0, %v246_v11 }
  0xc2   : > { %v1689_v17 = vpop.permute.xlu0 %1688 }
  0xc3   : > { %v1687_v15 = vpop.permute.xlu1 %1686  ;;  %1783 = vst.msk [vmem:[#allocation3 + $0x8] sm:$0xf] %vm1780_vm10, %v1689_v17 }
  0xc4   : > { %1782 = vst.msk [vmem:[#allocation3 + $0x4] sm:$0xf] %vm1780_vm10, %v1687_v15  ;;  %1443 = vrot.lane.b32.xlu0 %v5384_v43, %s5011_s13 }
  0xc5   : > { %1192 = vrot.lane.b32.xlu1 %v5273_v57, %s5010_s12 }
  0xc6   : > { %v1943_v20 = vpop.permute.xlu0 %1942 }
  0xc7   : > { %v1691_v19 = vpop.permute.xlu1 %1690  ;;  %2039 = vst.msk [vmem:[#allocation3] sm:$0xf] %vm2038_vm11, %v1943_v20 }
  0xc8   : > { %1784 = vst.msk [vmem:[#allocation3 + $0xc] sm:$0xf] %vm1780_vm10, %v1691_v19  ;;  %1447 = vrot.lane.b32.xlu0 %v5460_v50, %s5011_s13  ;;  %v1065_v19 = vld [vmem:[#allocation2 + $0x128] sm:$0xff] }
  0xc9   : > { %1445 = vrot.lane.b32.xlu1 %v5388_v47, %s5011_s13 }
  0xca   : > { %v1947_v24 = vpop.permute.xlu0 %1946 }
  0xcb   : > { %v1945_v22 = vpop.permute.xlu1 %1944  ;;  %2041 = vst.msk [vmem:[#allocation3 + $0x8] sm:$0xf] %vm2038_vm11, %v1947_v24 }
  0xcc   : > { %2040 = vst.msk [vmem:[#allocation3 + $0x4] sm:$0xf] %vm2038_vm11, %v1945_v22  ;;  %1700 = vrot.lane.b32.xlu0 %v5403_v54, %s5012_s14  ;;  %v5586_v22 = vpack.c.bf16 %v1065_v19, %v1065_v19 }
  0xcd   : > { %1449 = vrot.lane.b32.xlu1 %v5466_v21, %s5011_s13 }
  0xce   : > { %v2200_v30 = vpop.permute.xlu0 %2199  ;;  %521 = vst.msk [vmem:[#allocation3 + $0x64] sm:$0xf] %vm495_vm3, %v5586_v22 }
  0xcf   : > { %v1949_v29 = vpop.permute.xlu1 %1948  ;;  %2296 = vst.msk [vmem:[#allocation3] sm:$0xf] %vm2295_vm12, %v2200_v30  ;;  %v1570_v30 = vld [vmem:[#allocation2 + $0xc2] sm:$0xff] }
  0xd0   : > { %2042 = vst.msk [vmem:[#allocation3 + $0xc] sm:$0xf] %vm2038_vm11, %v1949_v29  ;;  %1704 = vrot.lane.b32.xlu0 %v5476_v26, %s5012_s14 }
  0xd1   : > { %1702 = vrot.lane.b32.xlu1 %v5408_v60, %s5012_s14  ;;  %v5539_v60 = vpack.c.bf16 %v2338_v58, %v2338_v58 }
  0xd2   : > { %v2204_v35 = vpop.permute.xlu0 %2203 }
  0xd3   : > { %v2202_v34 = vpop.permute.xlu1 %2201  ;;  %2298 = vst.msk [vmem:[#allocation3 + $0x8] sm:$0xf] %vm2295_vm12, %v2204_v35 }
  0xd4   : > { %2297 = vst.msk [vmem:[#allocation3 + $0x4] sm:$0xf] %vm2295_vm12, %v2202_v34  ;;  %1958 = vrot.lane.b32.xlu0 %v5271_v56, %s5013_s15  ;;  %v5504_v56 = vpack.c.bf16 %v1833_v41, %v1833_v41 }
  0xd5   : > { %1706 = vrot.lane.b32.xlu1 %v5483_v32, %s5012_s14 }
  0xd6   : > { %v2457_v37 = vpop.permute.xlu0 %2456  ;;  %519 = vst.msk [vmem:[#allocation3 + $0x5c] sm:$0xf] %vm495_vm3, %v5504_v56 }
  0xd7   : > { %v2206_v36 = vpop.permute.xlu1 %2205  ;;  %2553 = vst.msk [vmem:[#allocation3] sm:$0xf] %vm2552_vm13, %v2457_v37  ;;  %v5621_v37 = vpack.c.bf16 %v1571_v33, %v1571_v33 }
  0xd8   : > { %2299 = vst.msk [vmem:[#allocation3 + $0xc] sm:$0xf] %vm2295_vm12, %v2206_v36  ;;  %1962 = vrot.lane.b32.xlu0 %v5295_v5, %s5013_s15  ;;  %v248_v36 = vld [vmem:[%s5195_s9 + $0xc0] sm:$0xff] }
  0xd9   : > { %1960 = vrot.lane.b32.xlu1 %v5273_v57, %s5013_s15  ;;  %v5516_v57 = vpack.c.bf16 %v2081_v44, %v2081_v44  ;;  %327 = vst.msk [vmem:[#allocation2 + $0x139] sm:$0xff] %vm256_vm0, %v248_v36 }
  0xda   : > { %v665_v45 = vpop.permute.xlu0 %664 }
  0xdb   : > { %v2459_v43 = vpop.permute.xlu1 %2458  ;;  %757 = vst.msk [vmem:[#allocation3 + $0x10] sm:$0xf] %vm752_vm6, %v665_v45 }
  0xdc   : > { %2554 = vst.msk [vmem:[#allocation3 + $0x4] sm:$0xf] %vm2552_vm13, %v2459_v43  ;;  %2215 = vrot.lane.b32.xlu0 %v5460_v50, %s5014_s16 }
  0xdd   : > { %1964 = vrot.lane.b32.xlu1 %v5299_v8, %s5013_s15 }
  0xde   : > { %v2461_v48 = vpop.permute.xlu0 %2460 }
  0xdf   : > { %v667_v47 = vpop.permute.xlu1 %666  ;;  %2555 = vst.msk [vmem:[#allocation3 + $0x8] sm:$0xf] %vm2552_vm13, %v2461_v48 }
  0xe0   : > { %758 = vst.msk [vmem:[#allocation3 + $0x14] sm:$0xf] %vm752_vm6, %v667_v47  ;;  %2219 = vrot.lane.b32.xlu0 %v5516_v57, %s5014_s16  ;;  %v1837_v47 = vld [vmem:[#allocation2 + $0x140] sm:$0xff] }
  0xe1   : > { %2217 = vrot.lane.b32.xlu1 %v5466_v21, %s5014_s16 }
  0xe2   : > { %v669_v54 = vpop.permute.xlu0 %668 }
  0xe3   : > { %v2463_v52 = vpop.permute.xlu1 %2462  ;;  %v4906_v53 = vld [vmem:[#allocation3] sm:$0xff]   ;;  %759 = vst.msk [vmem:[#allocation3 + $0x18] sm:$0xf] %vm752_vm6, %v669_v54 }
  0xe4   : > { %2556 = vst.msk [vmem:[#allocation3 + $0xc] sm:$0xf] %vm2552_vm13, %v2463_v52  ;;  %4814 = vmatprep.mubr.msk.bf16.mxu0 %vm2719_vm14, %v4906_v53  ;;  %2472 = vrot.lane.b32.xlu0 %v5476_v26, %s5016_s25  ;;  %v5642_v52 = vpack.c.bf16 %v1837_v47, %v1837_v47  ;;  %v2086_v53 = vld [vmem:[#allocation2 + $0xe1] sm:$0xff] }
  0xe5   : > { %2221 = vrot.lane.b32.xlu1 %v5522_v51, %s5014_s16  ;;  %v5660_v58 = vpack.c.bf16 %v2086_v53, %v2086_v53 }
  0xe6   : > { %v922_v59 = vpop.permute.xlu0 %921  ;;  %523 = vst.msk [vmem:[#allocation3 + $0x6c] sm:$0xf] %vm495_vm3, %v5642_v52 }
  0xe7   : > { %v671_v55 = vpop.permute.xlu1 %670  ;;  %1014 = vst.msk [vmem:[#allocation3 + $0x10] sm:$0xf] %vm1009_vm7, %v922_v59 }
  0xe8   : > { %760 = vst.msk [vmem:[#allocation3 + $0x1c] sm:$0xf] %vm752_vm6, %v671_v55  ;;  %680 = vrot.lane.b32.xlu0 %v5460_v50, %s5008_s10  ;;  %v1064_v50 = vld [vmem:[#allocation2 + $0x120] sm:$0xff] }
  0xe9   : > { %2474 = vrot.lane.b32.xlu1 %v5483_v32, %s5016_s25  ;;  %v5582_v18 = vpack.c.bf16 %v1064_v50, %v1064_v50  ;;  %v251_v50 = vld [vmem:[%s5195_s9 + $0xd8] sm:$0xff] }
  0xea   : > { %v926_v1 = vpop.permute.xlu0 %925  ;;  %330 = vst.msk [vmem:[#allocation2 + $0x159] sm:$0xff] %vm256_vm0, %v251_v50 }
  0xeb   : > { %v924_v62 = vpop.permute.xlu1 %923  ;;  %v4908_v63 = vld [vmem:[#allocation3 + $0x8] sm:$0xff]   ;;  %1016 = vst.msk [vmem:[#allocation3 + $0x18] sm:$0xf] %vm1009_vm7, %v926_v1 }
  0xec   : > { %1015 = vst.msk [vmem:[#allocation3 + $0x14] sm:$0xf] %vm1009_vm7, %v924_v62  ;;  %4815 = vmatmul.mubr.msk.bf16.vlgmr.msra.gmra.mxu0 %vm2719_vm14, %v4908_v63  ;;  %2476 = vrot.lane.b32.xlu0 %v5539_v60, %s5016_s25  ;;  %v2342_v63 = vld [vmem:[#allocation2 + $0xda] sm:$0xff] }
  0xed   : > { %682 = vrot.lane.b32.xlu1 %v5466_v21, %s5008_s10  ;;  %v1313_v21 = vld [vmem:[#allocation2 + $0xc1] sm:$0xff]  ;;  %520 = vst.msk [vmem:[#allocation3 + $0x60] sm:$0xf] %vm495_vm3, %v5582_v18 }
  0xee   : > { %v1179_v4 = vpop.permute.xlu0 %1178 }
  0xef   : > { %v928_v3 = vpop.permute.xlu1 %927  ;;  %1271 = vst.msk [vmem:[#allocation3 + $0x10] sm:$0xf] %vm1266_vm8, %v1179_v4 }
  0xf0   : > { %1017 = vst.msk [vmem:[#allocation3 + $0x1c] sm:$0xf] %vm1009_vm7, %v928_v3  ;;  %684 = vrot.lane.b32.xlu0 %v5516_v57, %s5008_s10  ;;  %v2343_v3 = vld [vmem:[#allocation2 + $0xe2] sm:$0xff] }
  0xf1   : > { %2478 = vrot.lane.b32.xlu1 %v5546_v2, %s5016_s25 }
  0xf2   : > { %v1183_v7 = vpop.permute.xlu0 %1182 }
  0xf3   : > { %v1181_v6 = vpop.permute.xlu1 %1180  ;;  %1273 = vst.msk [vmem:[#allocation3 + $0x18] sm:$0xf] %vm1266_vm8, %v1183_v7 }
  0xf4   : > { %1272 = vst.msk [vmem:[#allocation3 + $0x14] sm:$0xf] %vm1266_vm8, %v1181_v6  ;;  %937 = vrot.lane.b32.xlu0 %v5476_v26, %s5009_s11 }
  0xf5   : > { %686 = vrot.lane.b32.xlu1 %v5522_v51, %s5008_s10 }
  0xf6   : > { %v1436_v10 = vpop.permute.xlu0 %1435 }
  0xf7   : > { %v1185_v9 = vpop.permute.xlu1 %1184  ;;  %1528 = vst.msk [vmem:[#allocation3 + $0x10] sm:$0xf] %vm1523_vm9, %v1436_v10 }
  0xf8   : > { %1274 = vst.msk [vmem:[#allocation3 + $0x1c] sm:$0xf] %vm1266_vm8, %v1185_v9  ;;  %941 = vrot.lane.b32.xlu0 %v5539_v60, %s5009_s11  ;;  %v5684_v9 = vpack.c.bf16 %v2343_v3, %v2343_v3 }
  0xf9   : > { %939 = vrot.lane.b32.xlu1 %v5483_v32, %s5009_s11  ;;  %v5614_v32 = vpack.c.bf16 %v1570_v30, %v1570_v30  ;;  %v1318_v30 = vld [vmem:[#allocation2 + $0xf9] sm:$0xff] }
  0xfa   : > { %v1440_v15 = vpop.permute.xlu0 %1439  ;;  %v5746_v33 = vpack.c.bf16 %v1318_v30, %v1318_v30  ;;  %v1321_v30 = vld [vmem:[#allocation2 + $0x121] sm:$0xff] }
  0xfb   : > { %v1438_v14 = vpop.permute.xlu1 %1437  ;;  %1530 = vst.msk [vmem:[#allocation3 + $0x18] sm:$0xf] %vm1523_vm9, %v1440_v15 }
  0xfc   : > { %1529 = vst.msk [vmem:[#allocation3 + $0x14] sm:$0xf] %vm1523_vm9, %v1438_v14  ;;  %1194 = vrot.lane.b32.xlu0 %v5295_v5, %s5010_s12 }
  0xfd   : > { %943 = vrot.lane.b32.xlu1 %v5546_v2, %s5009_s11 }
  0xfe   : > { %v1693_v17 = vpop.permute.xlu0 %1692 }
  0xff   : > { %v1442_v16 = vpop.permute.xlu1 %1441  ;;  %1785 = vst.msk [vmem:[#allocation3 + $0x10] sm:$0xf] %vm1780_vm10, %v1693_v17  ;;  %v250_v17 = vld [vmem:[%s5195_s9 + $0xd0] sm:$0xff] }
 0x100   : > { %1531 = vst.msk [vmem:[#allocation3 + $0x1c] sm:$0xf] %vm1523_vm9, %v1442_v16  ;;  %1198 = vrot.lane.b32.xlu0 %v5337_v25, %s5010_s12 }
 0x101   : > { %1196 = vrot.lane.b32.xlu1 %v5299_v8, %s5010_s12  ;;  %v5598_v8 = vpack.c.bf16 %v1313_v21, %v1313_v21  ;;  %329 = vst.msk [vmem:[#allocation2 + $0x151] sm:$0xff] %vm256_vm0, %v250_v17 }
 0x102   : > { %v1697_v5 = vpop.permute.xlu0 %1696 }
 0x103   : > { %v1695_v20 = vpop.permute.xlu1 %1694  ;;  %1787 = vst.msk [vmem:[#allocation3 + $0x18] sm:$0xf] %vm1780_vm10, %v1697_v5 }
 0x104   : > { %1786 = vst.msk [vmem:[#allocation3 + $0x14] sm:$0xf] %vm1780_vm10, %v1695_v20  ;;  %1451 = vrot.lane.b32.xlu0 %v5516_v57, %s5011_s13  ;;  %v1836_v57 = vld [vmem:[#allocation2 + $0x138] sm:$0xff] }
 0x105   : > { %1200 = vrot.lane.b32.xlu1 %v5341_v28, %s5010_s12  ;;  %v5638_v46 = vpack.c.bf16 %v1836_v57, %v1836_v57  ;;  %v253_v57 = vld [vmem:[%s5195_s9 + $0xe8] sm:$0xff] }
 0x106   : > { %v1951_v26 = vpop.permute.xlu0 %1950  ;;  %332 = vst.msk [vmem:[#allocation2 + $0x171] sm:$0xff] %vm256_vm0, %v253_v57 }
 0x107   : > { %v1699_v24 = vpop.permute.xlu1 %1698  ;;  %2043 = vst.msk [vmem:[#allocation3 + $0x10] sm:$0xf] %vm2038_vm11, %v1951_v26 }
 0x108   : > { %1788 = vst.msk [vmem:[#allocation3 + $0x1c] sm:$0xf] %vm1780_vm10, %v1699_v24  ;;  %1455 = vrot.lane.b32.xlu0 %v5598_v8, %s5011_s13  ;;  %v1069_v24 = vld [vmem:[#allocation2 + $0x158] sm:$0xff] }
 0x109   : > { %1453 = vrot.lane.b32.xlu1 %v5522_v51, %s5011_s13  ;;  %v2085_v51 = vld [vmem:[#allocation2 + $0xd9] sm:$0xff]  ;;  %522 = vst.msk [vmem:[#allocation3 + $0x68] sm:$0xf] %vm495_vm3, %v5638_v46 }
 0x10a   : > { %v1955_v31 = vpop.permute.xlu0 %1954 }
 0x10b   : > { %v1953_v29 = vpop.permute.xlu1 %1952  ;;  %2045 = vst.msk [vmem:[#allocation3 + $0x18] sm:$0xf] %vm2038_vm11, %v1955_v31 }
 0x10c   : > { %2044 = vst.msk [vmem:[#allocation3 + $0x14] sm:$0xf] %vm2038_vm11, %v1953_v29  ;;  %1708 = vrot.lane.b32.xlu0 %v5539_v60, %s5012_s14  ;;  %v5728_v29 = vpack.c.bf16 %v1069_v24, %v1069_v24 }
 0x10d   : > { %1457 = vrot.lane.b32.xlu1 %v5604_v27, %s5011_s13 }
 0x10e   : > { %v2208_v35 = vpop.permute.xlu0 %2207  ;;  %525 = vst.msk [vmem:[#allocation3 + $0x74] sm:$0xf] %vm495_vm3, %v5728_v29 }
 0x10f   : > { %v1957_v34 = vpop.permute.xlu1 %1956  ;;  %2300 = vst.msk [vmem:[#allocation3 + $0x10] sm:$0xf] %vm2295_vm12, %v2208_v35  ;;  %v1574_v35 = vld [vmem:[#allocation2 + $0xf2] sm:$0xff] }
 0x110   : > { %2046 = vst.msk [vmem:[#allocation3 + $0x1c] sm:$0xf] %vm2038_vm11, %v1957_v34  ;;  %1712 = vrot.lane.b32.xlu0 %v5614_v32, %s5012_s14 }
 0x111   : > { %1710 = vrot.lane.b32.xlu1 %v5546_v2, %s5012_s14  ;;  %v5677_v2 = vpack.c.bf16 %v2342_v63, %v2342_v63 }
 0x112   : > { %v2212_v43 = vpop.permute.xlu0 %2211 }
 0x113   : > { %v2210_v41 = vpop.permute.xlu1 %2209  ;;  %2302 = vst.msk [vmem:[#allocation3 + $0x18] sm:$0xf] %vm2295_vm12, %v2212_v43 }
 0x114   : > { %2301 = vst.msk [vmem:[#allocation3 + $0x14] sm:$0xf] %vm2295_vm12, %v2210_v41  ;;  %1966 = vrot.lane.b32.xlu0 %v5337_v25, %s5013_s15 }
 0x115   : > { %1714 = vrot.lane.b32.xlu1 %v5621_v37, %s5012_s14 }
 0x116   : > { %v2465_v45 = vpop.permute.xlu0 %2464 }
 0x117   : > { %v2214_v44 = vpop.permute.xlu1 %2213  ;;  %2557 = vst.msk [vmem:[#allocation3 + $0x10] sm:$0xf] %vm2552_vm13, %v2465_v45  ;;  %v5799_v45 = vpack.c.bf16 %v1575_v38, %v1575_v38 }
 0x118   : > { %2303 = vst.msk [vmem:[#allocation3 + $0x1c] sm:$0xf] %vm2295_vm12, %v2214_v44  ;;  %1970 = vrot.lane.b32.xlu0 %v5371_v39, %s5013_s15  ;;  %v252_v44 = vld [vmem:[%s5195_s9 + $0xe0] sm:$0xff] }
 0x119   : > { %1968 = vrot.lane.b32.xlu1 %v5341_v28, %s5013_s15  ;;  %v5654_v28 = vpack.c.bf16 %v2085_v51, %v2085_v51  ;;  %331 = vst.msk [vmem:[#allocation2 + $0x169] sm:$0xff] %vm256_vm0, %v252_v44 }
 0x11a   : > { %v673_v25 = vpop.permute.xlu0 %672 }
 0x11b   : > { %v2467_v48 = vpop.permute.xlu1 %2466  ;;  %761 = vst.msk [vmem:[#allocation3 + $0x20] sm:$0xf] %vm752_vm6, %v673_v25 }
 0x11c   : > { %2558 = vst.msk [vmem:[#allocation3 + $0x14] sm:$0xf] %vm2552_vm13, %v2467_v48  ;;  %2223 = vrot.lane.b32.xlu0 %v5598_v8, %s5014_s16 }
 0x11d   : > { %1972 = vrot.lane.b32.xlu1 %v5375_v42, %s5013_s15 }
 0x11e   : > { %v2469_v55 = vpop.permute.xlu0 %2468 }
 0x11f   : > { %v675_v54 = vpop.permute.xlu1 %674  ;;  %2559 = vst.msk [vmem:[#allocation3 + $0x18] sm:$0xf] %vm2552_vm13, %v2469_v55 }
 0x120   : > { %762 = vst.msk [vmem:[#allocation3 + $0x24] sm:$0xf] %vm752_vm6, %v675_v54  ;;  %2227 = vrot.lane.b32.xlu0 %v5654_v28, %s5014_s16  ;;  %v1841_v54 = vld [vmem:[#allocation2 + $0x170] sm:$0xff] }
 0x121   : > { %2225 = vrot.lane.b32.xlu1 %v5604_v27, %s5014_s16 }
 0x122   : > { %v677_v61 = vpop.permute.xlu0 %676 }
 0x123   : > { %v2471_v59 = vpop.permute.xlu1 %2470  ;;  %v4909_v60 = vld [vmem:[#allocation3 + $0x10] sm:$0xff]   ;;  %763 = vst.msk [vmem:[#allocation3 + $0x28] sm:$0xf] %vm752_vm6, %v677_v61 }
 0x124   : > { %2560 = vst.msk [vmem:[#allocation3 + $0x1c] sm:$0xf] %vm2552_vm13, %v2471_v59  ;;  %4818 = vmatprep.mubr.msk.bf16.mxu0 %vm2719_vm14, %v4909_v60  ;;  %2480 = vrot.lane.b32.xlu0 %v5614_v32, %s5016_s25  ;;  %v5820_v59 = vpack.c.bf16 %v1841_v54, %v1841_v54  ;;  %v2090_v60 = vld [vmem:[#allocation2 + $0x111] sm:$0xff] }
 0x125   : > { %2229 = vrot.lane.b32.xlu1 %v5660_v58, %s5014_s16  ;;  %v5838_v63 = vpack.c.bf16 %v2090_v60, %v2090_v60 }
 0x126   : > { %v930_v1 = vpop.permute.xlu0 %929  ;;  %527 = vst.msk [vmem:[#allocation3 + $0x7c] sm:$0xf] %vm495_vm3, %v5820_v59 }
 0x127   : > { %v679_v62 = vpop.permute.xlu1 %678  ;;  %1018 = vst.msk [vmem:[#allocation3 + $0x20] sm:$0xf] %vm1009_vm7, %v930_v1 }
 0x128   : > { %764 = vst.msk [vmem:[#allocation3 + $0x2c] sm:$0xf] %vm752_vm6, %v679_v62  ;;  %688 = vrot.lane.b32.xlu0 %v5598_v8, %s5008_s10  ;;  %v1068_v8 = vld [vmem:[#allocation2 + $0x150] sm:$0xff] }
 0x129   : > { %2482 = vrot.lane.b32.xlu1 %v5621_v37, %s5016_s25  ;;  %v5724_v23 = vpack.c.bf16 %v1068_v8, %v1068_v8  ;;  %v255_v8 = vld [vmem:[%s5195_s9 + $0xf8] sm:$0xff] }
 0x12a   : > { %v934_v7 = vpop.permute.xlu0 %933  ;;  %334 = vst.msk [vmem:[#allocation2 + $0x189] sm:$0xff] %vm256_vm0, %v255_v8 }
 0x12b   : > { %v932_v4 = vpop.permute.xlu1 %931  ;;  %v4910_v6 = vld [vmem:[#allocation3 + $0x18] sm:$0xff]   ;;  %1020 = vst.msk [vmem:[#allocation3 + $0x28] sm:$0xf] %vm1009_vm7, %v934_v7 }
 0x12c   : > { %1019 = vst.msk [vmem:[#allocation3 + $0x24] sm:$0xf] %vm1009_vm7, %v932_v4  ;;  %4819 = vmatmul.mubr.msk.bf16.gmra.mxu0 %vm2719_vm14, %v4910_v6  ;;  %2484 = vrot.lane.b32.xlu0 %v5677_v2, %s5016_s25  ;;  %v2346_v6 = vld [vmem:[#allocation2 + $0x10a] sm:$0xff] }
 0x12d   : > { %690 = vrot.lane.b32.xlu1 %v5604_v27, %s5008_s10  ;;  %v1317_v27 = vld [vmem:[#allocation2 + $0xf1] sm:$0xff]  ;;  %524 = vst.msk [vmem:[#allocation3 + $0x70] sm:$0xf] %vm495_vm3, %v5724_v23 }
 0x12e   : > { %v1187_v11 = vpop.permute.xlu0 %1186 }
 0x12f   : > { %v936_v10 = vpop.permute.xlu1 %935  ;;  %1275 = vst.msk [vmem:[#allocation3 + $0x20] sm:$0xf] %vm1266_vm8, %v1187_v11 }
 0x130   : > { %1021 = vst.msk [vmem:[#allocation3 + $0x2c] sm:$0xf] %vm1009_vm7, %v936_v10  ;;  %692 = vrot.lane.b32.xlu0 %v5654_v28, %s5008_s10  ;;  %v2347_v10 = vld [vmem:[#allocation2 + $0x112] sm:$0xff] }
 0x131   : > { %2486 = vrot.lane.b32.xlu1 %v5684_v9, %s5016_s25 }
 0x132   : > { %v1191_v14 = vpop.permute.xlu0 %1190 }
 0x133   : > { %v1189_v12 = vpop.permute.xlu1 %1188  ;;  %1277 = vst.msk [vmem:[#allocation3 + $0x28] sm:$0xf] %vm1266_vm8, %v1191_v14 }
 0x134   : > { %1276 = vst.msk [vmem:[#allocation3 + $0x24] sm:$0xf] %vm1266_vm8, %v1189_v12  ;;  %945 = vrot.lane.b32.xlu0 %v5614_v32, %s5009_s11 }
 0x135   : > { %694 = vrot.lane.b32.xlu1 %v5660_v58, %s5008_s10 }
 0x136   : > { %v1444_v16 = vpop.permute.xlu0 %1443 }
 0x137   : > { %v1193_v15 = vpop.permute.xlu1 %1192  ;;  %1532 = vst.msk [vmem:[#allocation3 + $0x20] sm:$0xf] %vm1523_vm9, %v1444_v16 }
 0x138   : > { %1278 = vst.msk [vmem:[#allocation3 + $0x2c] sm:$0xf] %vm1266_vm8, %v1193_v15  ;;  %949 = vrot.lane.b32.xlu0 %v5677_v2, %s5009_s11  ;;  %v5862_v15 = vpack.c.bf16 %v2347_v10, %v2347_v10 }
 0x139   : > { %947 = vrot.lane.b32.xlu1 %v5621_v37, %s5009_s11  ;;  %v5792_v37 = vpack.c.bf16 %v1574_v35, %v1574_v35 }
 0x13a   : > { %v1448_v20 = vpop.permute.xlu0 %1447 }
 0x13b   : > { %v1446_v19 = vpop.permute.xlu1 %1445  ;;  %1534 = vst.msk [vmem:[#allocation3 + $0x28] sm:$0xf] %vm1523_vm9, %v1448_v20 }
 0x13c   : > { %1533 = vst.msk [vmem:[#allocation3 + $0x24] sm:$0xf] %vm1523_vm9, %v1446_v19  ;;  %1202 = vrot.lane.b32.xlu0 %v5371_v39, %s5010_s12 }
 0x13d   : > { %951 = vrot.lane.b32.xlu1 %v5684_v9, %s5009_s11 }
 0x13e   : > { %v1701_v5 = vpop.permute.xlu0 %1700 }
 0x13f   : > { %v1450_v21 = vpop.permute.xlu1 %1449  ;;  %1789 = vst.msk [vmem:[#allocation3 + $0x20] sm:$0xf] %vm1780_vm10, %v1701_v5  ;;  %v254_v5 = vld [vmem:[%s5195_s9 + $0xf0] sm:$0xff]  ;;  %s5018_s9 = smov 32  }
 0x140   : > { %1535 = vst.msk [vmem:[#allocation3 + $0x2c] sm:$0xf] %vm1523_vm9, %v1450_v21  ;;  %1206 = vrot.lane.b32.xlu0 %v5444_v13, %s5010_s12 }
 0x141   : > { %1204 = vrot.lane.b32.xlu1 %v5375_v42, %s5010_s12  ;;  %v5740_v42 = vpack.c.bf16 %v1317_v27, %v1317_v27  ;;  %333 = vst.msk [vmem:[#allocation2 + $0x181] sm:$0xff] %vm256_vm0, %v254_v5  ;;  %vm3082_vm0 = vcmask 123904  }
 0x142   : > { %v1705_v39 = vpop.permute.xlu0 %1704  ;;  %3083 = vst.msk [vmem:[#allocation5 + $0x8] sm:$0x3] %vm3082_vm0, %v5007_v0  ;;  %3086 = vst.msk [vmem:[#allocation5 + $0x98] sm:$0x3] %vm3082_vm0, %v5007_v0 }
 0x143   : > { %v1703_v26 = vpop.permute.xlu1 %1702  ;;  %1791 = vst.msk [vmem:[#allocation3 + $0x28] sm:$0xf] %vm1780_vm10, %v1705_v39 }
 0x144   : > { %1790 = vst.msk [vmem:[#allocation3 + $0x24] sm:$0xf] %vm1780_vm10, %v1703_v26  ;;  %1459 = vrot.lane.b32.xlu0 %v5654_v28, %s5011_s13  ;;  %v1840_v28 = vld [vmem:[#allocation2 + $0x168] sm:$0xff] }
 0x145   : > { %1208 = vrot.lane.b32.xlu1 %v5448_v49, %s5010_s12  ;;  %v5816_v53 = vpack.c.bf16 %v1840_v28, %v1840_v28  ;;  %v2093_v28 = vld [vmem:[#allocation2 + $0x139] sm:$0xff]  ;;  %3098 = vst.msk [vmem:[#allocation5 + $0x9] sm:$0x1] %vm3087_vm1, %v5007_v0  ;;  %3107 = vst.msk [vmem:[#allocation5 + $0x99] sm:$0x1] %vm3087_vm1, %v5007_v0 }
 0x146   : > { %v1959_v32 = vpop.permute.xlu0 %1958  ;;  %v5984_v0 = vld [vmem:[%s6610_s2] ss:$0 sm:$0xff] }
 0x147   : > { %v1707_v31 = vpop.permute.xlu1 %1706  ;;  %2047 = vst.msk [vmem:[#allocation3 + $0x20] sm:$0xf] %vm2038_vm11, %v1959_v32  ;;  %v1322_v32 = vld [vmem:[#allocation2 + $0x129] sm:$0xff] }
 0x148   : > { %1792 = vst.msk [vmem:[#allocation3 + $0x2c] sm:$0xf] %vm1780_vm10, %v1707_v31  ;;  %1463 = vrot.lane.b32.xlu0 %v5740_v42, %s5011_s13 }
 0x149   : > { %1461 = vrot.lane.b32.xlu1 %v5660_v58, %s5011_s13  ;;  %v2089_v58 = vld [vmem:[#allocation2 + $0x109] sm:$0xff]  ;;  %526 = vst.msk [vmem:[#allocation3 + $0x78] sm:$0xf] %vm495_vm3, %v5816_v53  ;;  %vm3222_vm3 = vcmask 257152  }
 0x14a   : > { %v1963_v36 = vpop.permute.xlu0 %1962 }
 0x14b   : > { %v1961_v34 = vpop.permute.xlu1 %1960  ;;  %2049 = vst.msk [vmem:[#allocation3 + $0x28] sm:$0xf] %vm2038_vm11, %v1963_v36  ;;  %v1578_v36 = vld [vmem:[#allocation2 + $0x122] sm:$0xff] }
 0x14c   : > { %2048 = vst.msk [vmem:[#allocation3 + $0x24] sm:$0xf] %vm2038_vm11, %v1961_v34  ;;  %1716 = vrot.lane.b32.xlu0 %v5677_v2, %s5012_s14  ;;  %v5912_v34 = vpack.c.bf16 %v1322_v32, %v1322_v32  ;;  %v5922_v38 = vpack.c.bf16 %v1578_v36, %v1578_v36 }
 0x14d   : > { %1465 = vrot.lane.b32.xlu1 %v5746_v33, %s5011_s13 }
 0x14e   : > { %v2216_v43 = vpop.permute.xlu0 %2215 }
 0x14f   : > { %v1965_v41 = vpop.permute.xlu1 %1964  ;;  %2304 = vst.msk [vmem:[#allocation3 + $0x20] sm:$0xf] %vm2295_vm12, %v2216_v43 }
 0x150   : > { %2050 = vst.msk [vmem:[#allocation3 + $0x2c] sm:$0xf] %vm2038_vm11, %v1965_v41  ;;  %1720 = vrot.lane.b32.xlu0 %v5792_v37, %s5012_s14  ;;  %v1579_v41 = vld [vmem:[#allocation2 + $0x12a] sm:$0xff] }
 0x151   : > { %1718 = vrot.lane.b32.xlu1 %v5684_v9, %s5012_s14  ;;  %v5855_v9 = vpack.c.bf16 %v2346_v6, %v2346_v6 }
 0x152   : > { %v2220_v48 = vpop.permute.xlu0 %2219 }
 0x153   : > { %v2218_v47 = vpop.permute.xlu1 %2217  ;;  %2306 = vst.msk [vmem:[#allocation3 + $0x28] sm:$0xf] %vm2295_vm12, %v2220_v48 }
 0x154   : > { %2305 = vst.msk [vmem:[#allocation3 + $0x24] sm:$0xf] %vm2295_vm12, %v2218_v47  ;;  %1974 = vrot.lane.b32.xlu0 %v5444_v13, %s5013_s15 }
 0x155   : > { %1722 = vrot.lane.b32.xlu1 %v5799_v45, %s5012_s14 }
 0x156   : > { %v2473_v25 = vpop.permute.xlu0 %2472 }
 0x157   : > { %v2222_v51 = vpop.permute.xlu1 %2221  ;;  %2561 = vst.msk [vmem:[#allocation3 + $0x20] sm:$0xf] %vm2552_vm13, %v2473_v25 }
 0x158   : > { %2307 = vst.msk [vmem:[#allocation3 + $0x2c] sm:$0xf] %vm2295_vm12, %v2222_v51  ;;  %1978 = vrot.lane.b32.xlu0 %v5500_v40, %s5013_s15 }
 0x159   : > { %1976 = vrot.lane.b32.xlu1 %v5448_v49, %s5013_s15  ;;  %v5832_v49 = vpack.c.bf16 %v2089_v58, %v2089_v58 }
 0x15a   : > { %v681_v13 = vpop.permute.xlu0 %680 }
 0x15b   : > { %v2475_v55 = vpop.permute.xlu1 %2474  ;;  %765 = vst.msk [vmem:[#allocation3 + $0x30] sm:$0xf] %vm752_vm6, %v681_v13 }
 0x15c   : > { %2562 = vst.msk [vmem:[#allocation3 + $0x24] sm:$0xf] %vm2552_vm13, %v2475_v55  ;;  %2231 = vrot.lane.b32.xlu0 %v5740_v42, %s5014_s16  ;;  %v2094_v55 = vld [vmem:[#allocation2 + $0x141] sm:$0xff] }
 0x15d   : > { %1980 = vrot.lane.b32.xlu1 %v5504_v56, %s5013_s15  ;;  %v5956_v13 = vpack.c.bf16 %v2094_v55, %v2094_v55 }
 0x15e   : > { %v2477_v62 = vpop.permute.xlu0 %2476 }
 0x15f   : > { %v683_v61 = vpop.permute.xlu1 %682  ;;  %2563 = vst.msk [vmem:[#allocation3 + $0x28] sm:$0xf] %vm2552_vm13, %v2477_v62 }
 0x160   : > { %766 = vst.msk [vmem:[#allocation3 + $0x34] sm:$0xf] %vm752_vm6, %v683_v61  ;;  %2235 = vrot.lane.b32.xlu0 %v5832_v49, %s5014_s16 }
 0x161   : > { %2233 = vrot.lane.b32.xlu1 %v5746_v33, %s5014_s16 }
 0x162   : > { %v685_v3 = vpop.permute.xlu0 %684 }
 0x163   : > { %v2479_v1 = vpop.permute.xlu1 %2478  ;;  %v4911_v2 = vld [vmem:[#allocation3 + $0x20] sm:$0xff]   ;;  %767 = vst.msk [vmem:[#allocation3 + $0x38] sm:$0xf] %vm752_vm6, %v685_v3  ;;  %v2351_v3 = vld [vmem:[#allocation2 + $0x142] sm:$0xff] }
 0x164   : > { %2564 = vst.msk [vmem:[#allocation3 + $0x2c] sm:$0xf] %vm2552_vm13, %v2479_v1  ;;  %4822 = vmatprep.mubr.msk.bf16.mxu0 %vm2719_vm14, %v4911_v2  ;;  %2488 = vrot.lane.b32.xlu0 %v5792_v37, %s5016_s25  ;;  %v5991_v10 = vpack.c.bf16 %v2351_v3, %v2351_v3 }
 0x165   : > { %2237 = vrot.lane.b32.xlu1 %v5838_v63, %s5014_s16 }
 0x166   : > { %v938_v7 = vpop.permute.xlu0 %937 }
 0x167   : > { %v687_v4 = vpop.permute.xlu1 %686  ;;  %1022 = vst.msk [vmem:[#allocation3 + $0x30] sm:$0xf] %vm1009_vm7, %v938_v7 }
 0x168   : > { %768 = vst.msk [vmem:[#allocation3 + $0x3c] sm:$0xf] %vm752_vm6, %v687_v4  ;;  %696 = vrot.lane.b32.xlu0 %v5740_v42, %s5008_s10 }
 0x169   : > { %2490 = vrot.lane.b32.xlu1 %v5799_v45, %s5016_s25 }
 0x16a   : > { %v942_v14 = vpop.permute.xlu0 %941 }
 0x16b   : > { %v940_v11 = vpop.permute.xlu1 %939  ;;  %v4912_v12 = vld [vmem:[#allocation3 + $0x28] sm:$0xff]   ;;  %1024 = vst.msk [vmem:[#allocation3 + $0x38] sm:$0xf] %vm1009_vm7, %v942_v14 }
 0x16c   : > { %1023 = vst.msk [vmem:[#allocation3 + $0x34] sm:$0xf] %vm1009_vm7, %v940_v11  ;;  %4823 = vmatmul.mubr.msk.bf16.gmra.mxu0 %vm2719_vm14, %v4912_v12  ;;  %2492 = vrot.lane.b32.xlu0 %v5855_v9, %s5016_s25 }
 0x16d   : > { %698 = vrot.lane.b32.xlu1 %v5746_v33, %s5008_s10 }
 0x16e   : > { %v1195_v17 = vpop.permute.xlu0 %1194 }
 0x16f   : > { %v944_v16 = vpop.permute.xlu1 %943  ;;  %1279 = vst.msk [vmem:[#allocation3 + $0x30] sm:$0xf] %vm1266_vm8, %v1195_v17 }
 0x170   : > { %1025 = vst.msk [vmem:[#allocation3 + $0x3c] sm:$0xf] %vm1009_vm7, %v944_v16  ;;  %700 = vrot.lane.b32.xlu0 %v5832_v49, %s5008_s10 }
 0x171   : > { %2494 = vrot.lane.b32.xlu1 %v5862_v15, %s5016_s25 }
 0x172   : > { %v1199_v19 = vpop.permute.xlu0 %1198 }
 0x173   : > { %v1197_v50 = vpop.permute.xlu1 %1196  ;;  %1281 = vst.msk [vmem:[#allocation3 + $0x38] sm:$0xf] %vm1266_vm8, %v1199_v19 }
 0x174   : > { %1280 = vst.msk [vmem:[#allocation3 + $0x34] sm:$0xf] %vm1266_vm8, %v1197_v50  ;;  %953 = vrot.lane.b32.xlu0 %v5792_v37, %s5009_s11 }
 0x175   : > { %702 = vrot.lane.b32.xlu1 %v5838_v63, %s5008_s10 }
 0x176   : > { %v1452_v21 = vpop.permute.xlu0 %1451 }
 0x177   : > { %v1201_v20 = vpop.permute.xlu1 %1200  ;;  %1536 = vst.msk [vmem:[#allocation3 + $0x30] sm:$0xf] %vm1523_vm9, %v1452_v21 }
 0x178   : > { %1282 = vst.msk [vmem:[#allocation3 + $0x3c] sm:$0xf] %vm1266_vm8, %v1201_v20  ;;  %957 = vrot.lane.b32.xlu0 %v5855_v9, %s5009_s11 }
 0x179   : > { %955 = vrot.lane.b32.xlu1 %v5799_v45, %s5009_s11  ;;  %v5928_v45 = vpack.c.bf16 %v1579_v41, %v1579_v41 }
 0x17a   : > { %v1456_v26 = vpop.permute.xlu0 %1455 }
 0x17b   : > { %v1454_v24 = vpop.permute.xlu1 %1453  ;;  %1538 = vst.msk [vmem:[#allocation3 + $0x38] sm:$0xf] %vm1523_vm9, %v1456_v26 }
 0x17c   : > { %1537 = vst.msk [vmem:[#allocation3 + $0x34] sm:$0xf] %vm1523_vm9, %v1454_v24  ;;  %1210 = vrot.lane.b32.xlu0 %v5500_v40, %s5010_s12  ;;  %v5906_v40 = vpack.c.bf16 %v1321_v30, %v1321_v30 }
 0x17d   : > { %959 = vrot.lane.b32.xlu1 %v5862_v15, %s5009_s11 }
 0x17e   : > { %v1709_v39 = vpop.permute.xlu0 %1708 }
 0x17f   : > { %v1458_v27 = vpop.permute.xlu1 %1457  ;;  %1793 = vst.msk [vmem:[#allocation3 + $0x30] sm:$0xf] %vm1780_vm10, %v1709_v39 }
 0x180   : > { %1539 = vst.msk [vmem:[#allocation3 + $0x3c] sm:$0xf] %vm1523_vm9, %v1458_v27  ;;  %1214 = vrot.lane.b32.xlu0 %v5582_v18, %s5010_s12 }
 0x181   : > { %1212 = vrot.lane.b32.xlu1 %v5504_v56, %s5010_s12 }
 0x182   : > { %v1713_v31 = vpop.permute.xlu0 %1712 }
 0x183   : > { %v1711_v42 = vpop.permute.xlu1 %1710  ;;  %1795 = vst.msk [vmem:[#allocation3 + $0x38] sm:$0xf] %vm1780_vm10, %v1713_v31 }
 0x184   : > { %1794 = vst.msk [vmem:[#allocation3 + $0x34] sm:$0xf] %vm1780_vm10, %v1711_v42  ;;  %1467 = vrot.lane.b32.xlu0 %v5832_v49, %s5011_s13 }
 0x185   : > { %1216 = vrot.lane.b32.xlu1 %v5586_v22, %s5010_s12 }
 0x186   : > { %v1967_v33 = vpop.permute.xlu0 %1966 }
 0x187   : > { %v1715_v56 = vpop.permute.xlu1 %1714  ;;  %2051 = vst.msk [vmem:[#allocation3 + $0x30] sm:$0xf] %vm2038_vm11, %v1967_v33 }
 0x188   : > { %1796 = vst.msk [vmem:[#allocation3 + $0x3c] sm:$0xf] %vm1780_vm10, %v1715_v56  ;;  %1471 = vrot.lane.b32.xlu0 %v5906_v40, %s5011_s13 }
 0x189   : > { %1469 = vrot.lane.b32.xlu1 %v5838_v63, %s5011_s13  ;;  %v2350_v63 = vld [vmem:[#allocation2 + $0x13a] sm:$0xff] }
 0x18a   : > { %v1971_v37 = vpop.permute.xlu0 %1970  ;;  %v5979_v2 = vpack.c.bf16 %v2350_v63, %v2350_v63  ;;  %v2097_v63 = vld [vmem:[#allocation2 + $0x169] sm:$0xff] }
 0x18b   : > { %v1969_v35 = vpop.permute.xlu1 %1968  ;;  %2053 = vst.msk [vmem:[#allocation3 + $0x38] sm:$0xf] %vm2038_vm11, %v1971_v37  ;;  %v1326_v37 = vld [vmem:[#allocation2 + $0x159] sm:$0xff] }
 0x18c   : > { %2052 = vst.msk [vmem:[#allocation3 + $0x34] sm:$0xf] %vm2038_vm11, %v1969_v35  ;;  %1724 = vrot.lane.b32.xlu0 %v5855_v9, %s5012_s14  ;;  %v1325_v35 = vld [vmem:[#allocation2 + $0x151] sm:$0xff] }
 0x18d   : > { %1473 = vrot.lane.b32.xlu1 %v5912_v34, %s5011_s13 }
 0x18e   : > { %v2224_v44 = vpop.permute.xlu0 %2223 }
 0x18f   : > { %v1973_v43 = vpop.permute.xlu1 %1972  ;;  %2308 = vst.msk [vmem:[#allocation3 + $0x30] sm:$0xf] %vm2295_vm12, %v2224_v44 }
 0x190   : > { %2054 = vst.msk [vmem:[#allocation3 + $0x3c] sm:$0xf] %vm2038_vm11, %v1973_v43  ;;  %1728 = vrot.lane.b32.xlu0 %v5922_v38, %s5012_s14 }
 0x191   : > { %1726 = vrot.lane.b32.xlu1 %v5862_v15, %s5012_s14 }
 0x192   : > { %v2228_v47 = vpop.permute.xlu0 %2227 }
 0x193   : > { %v2226_v57 = vpop.permute.xlu1 %2225  ;;  %2310 = vst.msk [vmem:[#allocation3 + $0x38] sm:$0xf] %vm2295_vm12, %v2228_v47 }
 0x194   : > { %2309 = vst.msk [vmem:[#allocation3 + $0x34] sm:$0xf] %vm2295_vm12, %v2226_v57  ;;  %1982 = vrot.lane.b32.xlu0 %v5582_v18, %s5013_s15  ;;  %v5950_v18 = vpack.c.bf16 %v2093_v28, %v2093_v28  ;;  %v1583_v28 = vld [vmem:[#allocation2 + $0x15a] sm:$0xff] }
 0x195   : > { %1730 = vrot.lane.b32.xlu1 %v5928_v45, %s5012_s14  ;;  %v6064_v55 = vpack.c.bf16 %v1583_v28, %v1583_v28  ;;  %v1330_v28 = vld [vmem:[#allocation2 + $0x189] sm:$0xff] }
 0x196   : > { %v2481_v51 = vpop.permute.xlu0 %2480 }
 0x197   : > { %v2230_v48 = vpop.permute.xlu1 %2229  ;;  %2565 = vst.msk [vmem:[#allocation3 + $0x30] sm:$0xf] %vm2552_vm13, %v2481_v51 }
 0x198   : > { %2311 = vst.msk [vmem:[#allocation3 + $0x3c] sm:$0xf] %vm2295_vm12, %v2230_v48  ;;  %1986 = vrot.lane.b32.xlu0 %v5638_v46, %s5013_s15  ;;  %v1582_v48 = vld [vmem:[#allocation2 + $0x152] sm:$0xff] }
 0x199   : > { %1984 = vrot.lane.b32.xlu1 %v5586_v22, %s5013_s15 }
 0x19a   : > { %v689_v54 = vpop.permute.xlu0 %688 }
 0x19b   : > { %v2483_v25 = vpop.permute.xlu1 %2482  ;;  %769 = vst.msk [vmem:[#allocation3 + $0x40] sm:$0xf] %vm752_vm6, %v689_v54 }
 0x19c   : > { %2566 = vst.msk [vmem:[#allocation3 + $0x34] sm:$0xf] %vm2552_vm13, %v2483_v25  ;;  %2239 = vrot.lane.b32.xlu0 %v5906_v40, %s5014_s16  ;;  %v6058_v25 = vpack.c.bf16 %v1582_v48, %v1582_v48 }
 0x19d   : > { %1988 = vrot.lane.b32.xlu1 %v5642_v52, %s5013_s15 }
 0x19e   : > { %v2485_v58 = vpop.permute.xlu0 %2484 }
 0x19f   : > { %v691_v22 = vpop.permute.xlu1 %690  ;;  %2567 = vst.msk [vmem:[#allocation3 + $0x38] sm:$0xf] %vm2552_vm13, %v2485_v58 }
 0x1a0   : > { %770 = vst.msk [vmem:[#allocation3 + $0x44] sm:$0xf] %vm752_vm6, %v691_v22  ;;  %2243 = vrot.lane.b32.xlu0 %v5950_v18, %s5014_s16 }
 0x1a1   : > { %2241 = vrot.lane.b32.xlu1 %v5912_v34, %s5014_s16 }
 0x1a2   : > { %v693_v61 = vpop.permute.xlu0 %692 }
 0x1a3   : > { %v2487_v49 = vpop.permute.xlu1 %2486  ;;  %v4913_v60 = vld [vmem:[#allocation3 + $0x30] sm:$0xff]   ;;  %771 = vst.msk [vmem:[#allocation3 + $0x48] sm:$0xf] %vm752_vm6, %v693_v61 }
 0x1a4   : > { %2568 = vst.msk [vmem:[#allocation3 + $0x3c] sm:$0xf] %vm2552_vm13, %v2487_v49  ;;  %4826 = vmatprep.mubr.msk.bf16.mxu0 %vm2719_vm14, %v4913_v60  ;;  %2496 = vrot.lane.b32.xlu0 %v5922_v38, %s5016_s25 }
 0x1a5   : > { %2245 = vrot.lane.b32.xlu1 %v5956_v13, %s5014_s16 }
 0x1a6   : > { %v946_v1 = vpop.permute.xlu0 %945 }
 0x1a7   : > { %v695_v62 = vpop.permute.xlu1 %694  ;;  %1026 = vst.msk [vmem:[#allocation3 + $0x40] sm:$0xf] %vm1009_vm7, %v946_v1  ;;  %v6090_v1 = vpack.c.bf16 %v2097_v63, %v2097_v63 }
 0x1a8   : > { %772 = vst.msk [vmem:[#allocation3 + $0x4c] sm:$0xf] %vm752_vm6, %v695_v62  ;;  %704 = vrot.lane.b32.xlu0 %v5906_v40, %s5008_s10 }
 0x1a9   : > { %2498 = vrot.lane.b32.xlu1 %v5928_v45, %s5016_s25 }
 0x1aa   : > { %v950_v7 = vpop.permute.xlu0 %949 }
 0x1ab   : > { %v948_v4 = vpop.permute.xlu1 %947  ;;  %v4914_v6 = vld [vmem:[#allocation3 + $0x38] sm:$0xff]   ;;  %1028 = vst.msk [vmem:[#allocation3 + $0x48] sm:$0xf] %vm1009_vm7, %v950_v7 }
 0x1ac   : > { %1027 = vst.msk [vmem:[#allocation3 + $0x44] sm:$0xf] %vm1009_vm7, %v948_v4  ;;  %v4816_v9 = vpop.f32.mrf.mxu0  ;;  %4827 = vmatmul.mubr.msk.bf16.gmra.mxu0 %vm2719_vm14, %v4914_v6  ;;  %2500 = vrot.lane.b32.xlu0 %v5979_v2, %s5016_s25 }
 0x1ad   : > { %706 = vrot.lane.b32.xlu1 %v5912_v34, %s5008_s10  ;;  %v2818_v11 = vadd.f32 %v4816_v9, %v5984_v0 }
 0x1ae   : > { %v2809_v14 = vpop.f32.mrf.mxu0  ;;  %v1203_v16 = vpop.permute.xlu0 %1202 }
 0x1af   : > { %v952_v12 = vpop.permute.xlu1 %951  ;;  %2939 = vst.msk [vmem:[#allocation4 + $0x10] sm:$0xff] %vm2936_vm15, %v2818_v11  ;;  %v2810_v15 = vadd.f32 %v5984_v0, %v2809_v14  ;;  %v2354_v11 = vld [vmem:[#allocation2 + $0x16a] sm:$0xff] }
 0x1b0   : > { %1029 = vst.msk [vmem:[#allocation3 + $0x4c] sm:$0xf] %vm1009_vm7, %v952_v12  ;;  %v4817_v17 = vpop.f32.mrf.mxu0  ;;  %708 = vrot.lane.b32.xlu0 %v5950_v18, %s5008_s10  ;;  %v6113_v14 = vpack.c.bf16 %v2354_v11, %v2354_v11 }
 0x1b1   : > { %1283 = vst.msk [vmem:[#allocation3 + $0x40] sm:$0xf] %vm1266_vm8, %v1203_v16  ;;  %2502 = vrot.lane.b32.xlu1 %v5991_v10, %s5016_s25  ;;  %v2821_v50 = vadd.f32 %v4817_v17, %v5984_v0 }
 0x1b2   : > { %2937 = vst.msk [vmem:[#allocation4] sm:$0xff] %vm2936_vm15, %v2810_v15  ;;  %v2812_v20 = vpop.f32.mrf.mxu0  ;;  %v1207_v5 = vpop.permute.xlu0 %1206  ;;  %v2355_v15 = vld [vmem:[#allocation2 + $0x172] sm:$0xff] }
 0x1b3   : > { %v1205_v19 = vpop.permute.xlu1 %1204  ;;  %2940 = vst.msk [vmem:[#allocation4 + $0x18] sm:$0xff] %vm2936_vm15, %v2821_v50  ;;  %v2813_v21 = vadd.f32 %v5984_v0, %v2812_v20  ;;  %v6120_v20 = vpack.c.bf16 %v2355_v15, %v2355_v15 }
 0x1b4   : > { %1284 = vst.msk [vmem:[#allocation3 + $0x44] sm:$0xf] %vm1266_vm8, %v1205_v19  ;;  %1285 = vst.msk [vmem:[#allocation3 + $0x48] sm:$0xf] %vm1266_vm8, %v1207_v5  ;;  %961 = vrot.lane.b32.xlu0 %v5922_v38, %s5009_s11 }
 0x1b5   : > { %710 = vrot.lane.b32.xlu1 %v5956_v13, %s5008_s10  ;;  %2938 = vst.msk [vmem:[#allocation4 + $0x8] sm:$0xff] %vm2936_vm15, %v2813_v21 }
 0x1b6   : > { %v1460_v24 = vpop.permute.xlu0 %1459  ;;  %v2986_v27 = vld [vmem:[#allocation4 + $0x10] sm:$0xff] }
 0x1b7   : > { %v1209_v8 = vpop.permute.xlu1 %1208  ;;  %1540 = vst.msk [vmem:[#allocation3 + $0x40] sm:$0xf] %vm1523_vm9, %v1460_v24 }
 0x1b8   : > { %1286 = vst.msk [vmem:[#allocation3 + $0x4c] sm:$0xf] %vm1266_vm8, %v1209_v8  ;;  %965 = vrot.lane.b32.xlu0 %v5979_v2, %s5009_s11 }
 0x1b9   : > { %v2969_v26 = vld [vmem:[#allocation4] sm:$0xff]  ;;  %963 = vrot.lane.b32.xlu1 %v5928_v45, %s5009_s11  ;;  %v6047_v45 = vpack.c.bf16 %v1326_v37, %v1326_v37 }
 0x1ba   : > { %v3002_v39 = vmax.f32 %v2969_v26, %v2986_v27  ;;  %v1464_v30 = vpop.permute.xlu0 %1463  ;;  %v2987_v40 = vld [vmem:[#allocation4 + $0x18] sm:$0xff] }
 0x1bb   : > { %v1462_v42 = vpop.permute.xlu1 %1461  ;;  %1542 = vst.msk [vmem:[#allocation3 + $0x48] sm:$0xf] %vm1523_vm9, %v1464_v30 }
 0x1bc   : > { %3018 = vst.msk [vmem:[#allocation4] sm:$0xff] %vm2936_vm15, %v3002_v39  ;;  %v2970_v31 = vld [vmem:[#allocation4 + $0x8] sm:$0xff]  ;;  %1218 = vrot.lane.b32.xlu0 %v5638_v46, %s5010_s12  ;;  %v6041_v46 = vpack.c.bf16 %v1325_v35, %v1325_v35 }
 0x1bd   : > { %1541 = vst.msk [vmem:[#allocation3 + $0x44] sm:$0xf] %vm1523_vm9, %v1462_v42  ;;  %967 = vrot.lane.b32.xlu1 %v5991_v10, %s5009_s11  ;;  %v3003_v32 = vmax.f32 %v2970_v31, %v2987_v40 }
 0x1be   : > { %v1717_v33 = vpop.permute.xlu0 %1716 }
 0x1bf   : > { %v1466_v56 = vpop.permute.xlu1 %1465  ;;  %3019 = vst.msk [vmem:[#allocation4 + $0x8] sm:$0xff] %vm2936_vm15, %v3003_v32 }
 0x1c0   : > { %1543 = vst.msk [vmem:[#allocation3 + $0x4c] sm:$0xf] %vm1523_vm9, %v1466_v56  ;;  %1222 = vrot.lane.b32.xlu0 %v5724_v23, %s5010_s12 }
 0x1c1   : > { %1797 = vst.msk [vmem:[#allocation3 + $0x40] sm:$0xf] %vm1780_vm10, %v1717_v33  ;;  %1220 = vrot.lane.b32.xlu1 %v5642_v52, %s5010_s12 }
 0x1c2   : > { %v1721_v36 = vpop.permute.xlu0 %1720 }
 0x1c3   : > { %v1719_v34 = vpop.permute.xlu1 %1718  ;;  %1799 = vst.msk [vmem:[#allocation3 + $0x48] sm:$0xf] %vm1780_vm10, %v1721_v36 }
 0x1c4   : > { %1798 = vst.msk [vmem:[#allocation3 + $0x44] sm:$0xf] %vm1780_vm10, %v1719_v34  ;;  %1475 = vrot.lane.b32.xlu0 %v5950_v18, %s5011_s13 }
 0x1c5   : > { %1224 = vrot.lane.b32.xlu1 %v5728_v29, %s5010_s12 }
 0x1c6   : > { %v3034_v52 = vld [vmem:[#allocation4] ss:$2 sm:$0xff]  ;;  %v3050_v38 = vld [vmem:[#allocation4 + $0x1] ss:$2 sm:$0xff]  ;;  %v1975_v44 = vpop.permute.xlu0 %1974 }
 0x1c7   : > { %v1723_v41 = vpop.permute.xlu1 %1722  ;;  %v3065_v43 = vmax.f32 %v3034_v52, %v3050_v38  ;;  %2055 = vst.msk [vmem:[#allocation3 + $0x40] sm:$0xf] %vm2038_vm11, %v1975_v44  ;;  %v1073_v44 = vld [vmem:[#allocation2 + $0x188] sm:$0xff] }
 0x1c8   : > { %1800 = vst.msk [vmem:[#allocation3 + $0x4c] sm:$0xf] %vm1780_vm10, %v1723_v41  ;;  %1479 = vrot.lane.b32.xlu0 %v6041_v46, %s5011_s13 }
 0x1c9   : > { %1477 = vrot.lane.b32.xlu1 %v5956_v13, %s5011_s13  ;;  %v3073_v57 = vmax.f32 %v3065_v43, 0.0 }
 0x1ca   : > { %v1979_v51 = vpop.permute.xlu0 %1978 }
 0x1cb   : > { %v1977_v47 = vpop.permute.xlu1 %1976  ;;  %3109 = vst.msk [vmem:[#allocation5 + $0x11] sm:$0xff] %vm2936_vm15, %v3073_v57 }
 0x1cc   : > { %2056 = vst.msk [vmem:[#allocation3 + $0x44] sm:$0xf] %vm2038_vm11, %v1977_v47  ;;  %2057 = vst.msk [vmem:[#allocation3 + $0x48] sm:$0xf] %vm2038_vm11, %v1979_v51  ;;  %1732 = vrot.lane.b32.xlu0 %v5979_v2, %s5012_s14  ;;  %v2098_v2 = vld [vmem:[#allocation2 + $0x171] sm:$0xff]  ;;  %v4558_v47 = vpack.c.bf16 %v1073_v44, %v1073_v44  ;;  %v1329_v51 = vld [vmem:[#allocation2 + $0x181] sm:$0xff] }
 0x1cd   : > { %1481 = vrot.lane.b32.xlu1 %v6047_v45, %s5011_s13  ;;  %v6096_v4 = vpack.c.bf16 %v2098_v2, %v2098_v2 }
 0x1ce   : > { %v2232_v18 = vpop.permute.xlu0 %2231 }
 0x1cf   : > { %v1981_v54 = vpop.permute.xlu1 %1980  ;;  %2312 = vst.msk [vmem:[#allocation3 + $0x40] sm:$0xf] %vm2295_vm12, %v2232_v18 }
 0x1d0   : > { %2058 = vst.msk [vmem:[#allocation3 + $0x4c] sm:$0xf] %vm2038_vm11, %v1981_v54  ;;  %1736 = vrot.lane.b32.xlu0 %v6058_v25, %s5012_s14 }
 0x1d1   : > { %1734 = vrot.lane.b32.xlu1 %v5991_v10, %s5012_s14 }
 0x1d2   : > { %v3296_v58 = vld [vmem:[#allocation5 + $0x10] sm:$0xff]  ;;  %v2236_v13 = vpop.permute.xlu0 %2235 }
 0x1d3   : > { %v2234_v22 = vpop.permute.xlu1 %2233  ;;  %v6069_v49 = vpack.c.bf16 %v3296_v58, %v3296_v58  ;;  %2314 = vst.msk [vmem:[#allocation3 + $0x48] sm:$0xf] %vm2295_vm12, %v2236_v13  ;;  %v4590_v58 = vpack.c.bf16 %v1330_v28, %v1330_v28  ;;  %v3232_v28 = vld [vmem:[#allocation5 + $0x12] sm:$0xff] }
 0x1d4   : > { %2313 = vst.msk [vmem:[#allocation3 + $0x44] sm:$0xf] %vm2295_vm12, %v2234_v22  ;;  %1990 = vrot.lane.b32.xlu0 %v5724_v23, %s5013_s15 }
 0x1d5   : > { %1738 = vrot.lane.b32.xlu1 %v6064_v55, %s5012_s14  ;;  %3159 = vst.msk [vmem:[#allocation6 + $0x8] sm:$0xf] %vm3157_vm2, %v6069_v49 }
 0x1d6   : > { %v2489_v61 = vpop.permute.xlu0 %2488 }
 0x1d7   : > { %v2238_v60 = vpop.permute.xlu1 %2237  ;;  %2569 = vst.msk [vmem:[#allocation3 + $0x40] sm:$0xf] %vm2552_vm13, %v2489_v61  ;;  %v1586_v61 = vld [vmem:[#allocation2 + $0x182] sm:$0xff] }
 0x1d8   : > { %2315 = vst.msk [vmem:[#allocation3 + $0x4c] sm:$0xf] %vm2295_vm12, %v2238_v60  ;;  %1994 = vrot.lane.b32.xlu0 %v5816_v53, %s5013_s15  ;;  %v4621_v63 = vpack.c.bf16 %v1586_v61, %v1586_v61 }
 0x1d9   : > { %1992 = vrot.lane.b32.xlu1 %v5728_v29, %s5013_s15 }
 0x1da   : > { %v697_v23 = vpop.permute.xlu0 %696 }
 0x1db   : > { %v2491_v62 = vpop.permute.xlu1 %2490  ;;  %773 = vst.msk [vmem:[#allocation3 + $0x50] sm:$0xf] %vm752_vm6, %v697_v23  ;;  %v1587_v23 = vld [vmem:[#allocation2 + $0x18a] sm:$0xff] }
 0x1dc   : > { %2570 = vst.msk [vmem:[#allocation3 + $0x44] sm:$0xf] %vm2552_vm13, %v2491_v62  ;;  %2247 = vrot.lane.b32.xlu0 %v6041_v46, %s5014_s16 }
 0x1dd   : > { %1996 = vrot.lane.b32.xlu1 %v5820_v59, %s5013_s15 }
 0x1de   : > { %v2493_v3 = vpop.permute.xlu0 %2492 }
 0x1df   : > { %v699_v29 = vpop.permute.xlu1 %698  ;;  %2571 = vst.msk [vmem:[#allocation3 + $0x48] sm:$0xf] %vm2552_vm13, %v2493_v3 }
 0x1e0   : > { %774 = vst.msk [vmem:[#allocation3 + $0x54] sm:$0xf] %vm752_vm6, %v699_v29  ;;  %2251 = vrot.lane.b32.xlu0 %v6090_v1, %s5014_s16  ;;  %v4622_v29 = vpack.c.bf16 %v1587_v23, %v1587_v23 }
 0x1e1   : > { %2249 = vrot.lane.b32.xlu1 %v6047_v45, %s5014_s16 }
 0x1e2   : > { %v701_v9 = vpop.permute.xlu0 %700 }
 0x1e3   : > { %v2495_v6 = vpop.permute.xlu1 %2494  ;;  %v4915_v7 = vld [vmem:[#allocation3 + $0x40] sm:$0xff]   ;;  %775 = vst.msk [vmem:[#allocation3 + $0x58] sm:$0xf] %vm752_vm6, %v701_v9 }
 0x1e4   : > { %2572 = vst.msk [vmem:[#allocation3 + $0x4c] sm:$0xf] %vm2552_vm13, %v2495_v6  ;;  %4830 = vmatprep.mubr.msk.bf16.mxu0 %vm2719_vm14, %v4915_v7  ;;  %2504 = vrot.lane.b32.xlu0 %v6058_v25, %s5016_s25 }
 0x1e5   : > { %2253 = vrot.lane.b32.xlu1 %v6096_v4, %s5014_s16 }
 0x1e6   : > { %v954_v12 = vpop.permute.xlu0 %953 }
 0x1e7   : > { %v703_v10 = vpop.permute.xlu1 %702  ;;  %1030 = vst.msk [vmem:[#allocation3 + $0x50] sm:$0xf] %vm1009_vm7, %v954_v12 }
 0x1e8   : > { %776 = vst.msk [vmem:[#allocation3 + $0x5c] sm:$0xf] %vm752_vm6, %v703_v10  ;;  %712 = vrot.lane.b32.xlu0 %v6041_v46, %s5008_s10  ;;  %v1072_v46 = vld [vmem:[#allocation2 + $0x180] sm:$0xff] }
 0x1e9   : > { %2506 = vrot.lane.b32.xlu1 %v6064_v55, %s5016_s25  ;;  %v4557_v43 = vpack.c.bf16 %v1072_v46, %v1072_v46 }
 0x1ea   : > { %v958_v50 = vpop.permute.xlu0 %957 }
 0x1eb   : > { %v956_v16 = vpop.permute.xlu1 %955  ;;  %v4916_v17 = vld [vmem:[#allocation3 + $0x48] sm:$0xff]   ;;  %1032 = vst.msk [vmem:[#allocation3 + $0x58] sm:$0xf] %vm1009_vm7, %v958_v50 }
 0x1ec   : > { %1031 = vst.msk [vmem:[#allocation3 + $0x54] sm:$0xf] %vm1009_vm7, %v956_v16  ;;  %v4820_v19 = vpop.f32.mrf.mxu0  ;;  %4831 = vmatmul.mubr.msk.bf16.gmra.mxu0 %vm2719_vm14, %v4916_v17  ;;  %2508 = vrot.lane.b32.xlu0 %v6113_v14, %s5016_s25 }
 0x1ed   : > { %714 = vrot.lane.b32.xlu1 %v6047_v45, %s5008_s10  ;;  %v2834_v21 = vadd.f32 %v4820_v19, %v5984_v0  ;;  %v2101_v19 = vld [vmem:[#allocation2 + $0x199] sm:$0xff] }
 0x1ee   : > { %v2825_v8 = vpop.f32.mrf.mxu0  ;;  %v1211_v26 = vpop.permute.xlu0 %1210 }
 0x1ef   : > { %v960_v5 = vpop.permute.xlu1 %959  ;;  %2943 = vst.msk [vmem:[#allocation4 + $0x30] sm:$0xff] %vm2936_vm15, %v2834_v21  ;;  %v2826_v24 = vadd.f32 %v5984_v0, %v2825_v8  ;;  %v4685_v21 = vpack.c.bf16 %v2101_v19, %v2101_v19 }
 0x1f0   : > { %1033 = vst.msk [vmem:[#allocation3 + $0x5c] sm:$0xf] %vm1009_vm7, %v960_v5  ;;  %v4821_v27 = vpop.f32.mrf.mxu0  ;;  %716 = vrot.lane.b32.xlu0 %v6090_v1, %s5008_s10  ;;  %v2102_v5 = vld [vmem:[#allocation2 + $0x1a1] sm:$0xff] }
 0x1f1   : > { %1287 = vst.msk [vmem:[#allocation3 + $0x50] sm:$0xf] %vm1266_vm8, %v1211_v26  ;;  %2510 = vrot.lane.b32.xlu1 %v6120_v20, %s5016_s25  ;;  %v2837_v39 = vadd.f32 %v4821_v27, %v5984_v0  ;;  %v3117_v26 = vld [vmem:[#allocation5] sm:$0xff]  ;;  %v4686_v27 = vpack.c.bf16 %v2102_v5, %v2102_v5 }
 0x1f2   : > { %2941 = vst.msk [vmem:[#allocation4 + $0x20] sm:$0xff] %vm2936_vm15, %v2826_v24  ;;  %v2828_v30 = vpop.f32.mrf.mxu0  ;;  %v1215_v40 = vpop.permute.xlu0 %1214 }
 0x1f3   : > { %v1213_v42 = vpop.permute.xlu1 %1212  ;;  %2944 = vst.msk [vmem:[#allocation4 + $0x38] sm:$0xff] %vm2936_vm15, %v2837_v39  ;;  %v2829_v31 = vadd.f32 %v5984_v0, %v2828_v30  ;;  %v4719_v39 = vpack.c.bf16 %v3117_v26, %v3117_v26 }
 0x1f4   : > { %1288 = vst.msk [vmem:[#allocation3 + $0x54] sm:$0xf] %vm1266_vm8, %v1213_v42  ;;  %1289 = vst.msk [vmem:[#allocation3 + $0x58] sm:$0xf] %vm1266_vm8, %v1215_v40  ;;  %969 = vrot.lane.b32.xlu0 %v6058_v25, %s5009_s11  ;;  %v4589_v25 = vpack.c.bf16 %v1329_v51, %v1329_v51 }
 0x1f5   : > { %718 = vrot.lane.b32.xlu1 %v6096_v4, %s5008_s10  ;;  %2942 = vst.msk [vmem:[#allocation4 + $0x28] sm:$0xff] %vm2936_vm15, %v2829_v31  ;;  %v2358_v31 = vld [vmem:[#allocation2 + $0x19a] sm:$0xff]  ;;  %s5024_s10 = smov 112  }
 0x1f6   : > { %v1468_v56 = vpop.permute.xlu0 %1467  ;;  %v2988_v33 = vld [vmem:[#allocation4 + $0x30] sm:$0xff]  ;;  %3158 = vst.msk [vmem:[#allocation6] sm:$0xf] %vm3157_vm2, %v4719_v39  ;;  %v4929_v39 = vld [vmem:[%s6611_s3 + $0x8] sm:$0xff]  }
 0x1f7   : > { %v1217_v32 = vpop.permute.xlu1 %1216  ;;  %1544 = vst.msk [vmem:[#allocation3 + $0x50] sm:$0xf] %vm1523_vm9, %v1468_v56  ;;  %v2359_v56 = vld [vmem:[#allocation2 + $0x1a2] sm:$0xff] }
 0x1f8   : > { %1290 = vst.msk [vmem:[#allocation3 + $0x5c] sm:$0xf] %vm1266_vm8, %v1217_v32  ;;  %973 = vrot.lane.b32.xlu0 %v6113_v14, %s5009_s11  ;;  %v4717_v32 = vpack.c.bf16 %v2358_v31, %v2358_v31  ;;  %v4930_v31 = vld [vmem:[%s6611_s3] sm:$0xff]  }
 0x1f9   : > { %v2971_v34 = vld [vmem:[#allocation4 + $0x20] sm:$0xff]  ;;  %971 = vrot.lane.b32.xlu1 %v6064_v55, %s5009_s11 }
 0x1fa   : > { %v3004_v35 = vmax.f32 %v2971_v34, %v2988_v33  ;;  %v1472_v37 = vpop.permute.xlu0 %1471  ;;  %v2989_v52 = vld [vmem:[#allocation4 + $0x38] sm:$0xff]  ;;  %v3166_v34 = vld [vmem:[#allocation5 + $0x1] sm:$0xff] }
 0x1fb   : > { %v1470_v36 = vpop.permute.xlu1 %1469  ;;  %1546 = vst.msk [vmem:[#allocation3 + $0x58] sm:$0xf] %vm1523_vm9, %v1472_v37  ;;  %v4727_v46 = vpack.c.bf16 %v3166_v34, %v3166_v34 }
 0x1fc   : > { %3020 = vst.msk [vmem:[#allocation4 + $0x10] sm:$0xff] %vm2936_vm15, %v3004_v35  ;;  %v2972_v38 = vld [vmem:[#allocation4 + $0x28] sm:$0xff]  ;;  %1226 = vrot.lane.b32.xlu0 %v5816_v53, %s5010_s12 }
 0x1fd   : > { %1545 = vst.msk [vmem:[#allocation3 + $0x54] sm:$0xf] %vm1523_vm9, %v1470_v36  ;;  %975 = vrot.lane.b32.xlu1 %v6120_v20, %s5009_s11  ;;  %v3005_v41 = vmax.f32 %v2972_v38, %v2989_v52  ;;  %v4718_v36 = vpack.c.bf16 %v2359_v56, %v2359_v56  ;;  %v3231_v38 = vld [vmem:[#allocation5 + $0x2] sm:$0xff]  ;;  %v4931_v56 = vld [vmem:[%s6611_s3 + $0x40] sm:$0xff]  }
 0x1fe   : > { %v1725_v57 = vpop.permute.xlu0 %1724 }
 0x1ff   : > { %v1474_v45 = vpop.permute.xlu1 %1473  ;;  %3021 = vst.msk [vmem:[#allocation4 + $0x18] sm:$0xff] %vm2936_vm15, %v3005_v41 }
 0x200   : > { %1547 = vst.msk [vmem:[#allocation3 + $0x5c] sm:$0xf] %vm1523_vm9, %v1474_v45  ;;  %1230 = vrot.lane.b32.xlu0 %v4557_v43, %s5010_s12 }
 0x201   : > { %1801 = vst.msk [vmem:[#allocation3 + $0x50] sm:$0xf] %vm1780_vm10, %v1725_v57  ;;  %1228 = vrot.lane.b32.xlu1 %v5820_v59, %s5010_s12  ;;  %v4735_v57 = vpack.c.bf16 %v3231_v38, %v3231_v38 }
 0x202   : > { %v1729_v53 = vpop.permute.xlu0 %1728 }
 0x203   : > { %v1727_v48 = vpop.permute.xlu1 %1726  ;;  %1803 = vst.msk [vmem:[#allocation3 + $0x58] sm:$0xf] %vm1780_vm10, %v1729_v53 }
 0x204   : > { %1802 = vst.msk [vmem:[#allocation3 + $0x54] sm:$0xf] %vm1780_vm10, %v1727_v48  ;;  %1483 = vrot.lane.b32.xlu0 %v6090_v1, %s5011_s13 }
 0x205   : > { %1232 = vrot.lane.b32.xlu1 %v4558_v47, %s5010_s12  ;;  %s5020_s12 = smov 48  }
 0x206   : > { %v3036_v18 = vld [vmem:[#allocation4 + $0x10] ss:$2 sm:$0xff]  ;;  %v3052_v59 = vld [vmem:[#allocation4 + $0x11] ss:$2 sm:$0xff]  ;;  %v1983_v55 = vpop.permute.xlu0 %1982 }
 0x207   : > { %v1731_v54 = vpop.permute.xlu1 %1730  ;;  %v3066_v22 = vmax.f32 %v3036_v18, %v3052_v59  ;;  %2059 = vst.msk [vmem:[#allocation3 + $0x50] sm:$0xf] %vm2038_vm11, %v1983_v55  ;;  %v4923_v59 = vld [vmem:[%s6611_s3 + $0x38] sm:$0xff]  }
 0x208   : > { %1804 = vst.msk [vmem:[#allocation3 + $0x5c] sm:$0xf] %vm1780_vm10, %v1731_v54  ;;  %1487 = vrot.lane.b32.xlu0 %v4589_v25, %s5011_s13 }
 0x209   : > { %1485 = vrot.lane.b32.xlu1 %v6096_v4, %s5011_s13  ;;  %v3074_v13 = vmax.f32 %v3066_v22, 0.0  ;;  %v1844_v4 = vld [vmem:[#allocation2 + $0x198] sm:$0xff] }
 0x20a   : > { %v1987_v62 = vpop.permute.xlu0 %1986  ;;  %v4653_v12 = vpack.c.bf16 %v1844_v4, %v1844_v4 }
 0x20b   : > { %v1985_v60 = vpop.permute.xlu1 %1984  ;;  %3110 = vst.msk [vmem:[#allocation5 + $0x21] sm:$0xff] %vm2936_vm15, %v3074_v13  ;;  %v5019_v13 = vmov 0  }
 0x20c   : > { %2060 = vst.msk [vmem:[#allocation3 + $0x54] sm:$0xf] %vm2038_vm11, %v1985_v60  ;;  %2061 = vst.msk [vmem:[#allocation3 + $0x58] sm:$0xf] %vm2038_vm11, %v1987_v62  ;;  %1740 = vrot.lane.b32.xlu0 %v6113_v14, %s5012_s14  ;;  %v1845_v14 = vld [vmem:[#allocation2 + $0x1a0] sm:$0xff]  ;;  %3805 = vmatprep.subr.bf16.mxu1 %v5019_v13  ;;  %v4924_v62 = vld [vmem:[%s6611_s3 + $0x30] sm:$0xff]  }
 0x20d   : > { %1489 = vrot.lane.b32.xlu1 %v4590_v58, %s5011_s13  ;;  %v4654_v17 = vpack.c.bf16 %v1845_v14, %v1845_v14  ;;  %3806 = vmatpush1.bf16.msra.mxu1 %v4923_v59 }
 0x20e   : > { %v2240_v2 = vpop.permute.xlu0 %2239  ;;  %3807 = vmatprep.subr.bf16.mxu1 %v5019_v13 }
 0x20f   : > { %v1989_v1 = vpop.permute.xlu1 %1988  ;;  %2316 = vst.msk [vmem:[#allocation3 + $0x50] sm:$0xf] %vm2295_vm12, %v2240_v2 }
 0x210   : > { %2062 = vst.msk [vmem:[#allocation3 + $0x5c] sm:$0xf] %vm2038_vm11, %v1989_v1  ;;  %1744 = vrot.lane.b32.xlu0 %v4621_v63, %s5012_s14 }
 0x211   : > { %1742 = vrot.lane.b32.xlu1 %v6120_v20, %s5012_s14  ;;  %3808 = vmatpush1.bf16.msra.mxu1 %v4924_v62 }
 0x212   : > { %v3297_v6 = vld [vmem:[#allocation5 + $0x20] sm:$0xff]  ;;  %v2244_v9 = vpop.permute.xlu0 %2243  ;;  %3809 = vmatprep.subr.bf16.mxu1 %v5019_v13 }
 0x213   : > { %v2242_v3 = vpop.permute.xlu1 %2241  ;;  %v3427_v7 = vld [vmem:[#allocation5 + $0x22] sm:$0xff]  ;;  %v6185_v10 = vpack.c.bf16 %v3297_v6, %v3297_v6  ;;  %2318 = vst.msk [vmem:[#allocation3 + $0x58] sm:$0xf] %vm2295_vm12, %v2244_v9 }
 0x214   : > { %2317 = vst.msk [vmem:[#allocation3 + $0x54] sm:$0xf] %vm2295_vm12, %v2242_v3  ;;  %v6187_v11 = vpack.c.bf16 %v3427_v7, %v3427_v7  ;;  %1998 = vrot.lane.b32.xlu0 %v4557_v43, %s5013_s15  ;;  %v3167_v43 = vld [vmem:[#allocation5 + $0x11] sm:$0xff]  ;;  %v3362_v1 = vld [vmem:[#allocation5 + $0x21] sm:$0xff] }
 0x215   : > { %1746 = vrot.lane.b32.xlu1 %v4622_v29, %s5012_s14  ;;  %3160 = vst.msk [vmem:[#allocation6 + $0x10] sm:$0xf] %vm3157_vm2, %v6185_v10  ;;  %v4728_v51 = vpack.c.bf16 %v3167_v43, %v3167_v43  ;;  %v4925_v3 = vld [vmem:[%s6611_s3 + $0x28] sm:$0xff]   ;;  %v4752_v6 = vpack.c.bf16 %v3362_v1, %v3362_v1 }
 0x216   : > { %3662 = vst.msk [vmem:[#allocation6 + $0x4] sm:$0xf] %vm3157_vm2, %v6187_v11  ;;  %v2497_v16 = vpop.permute.xlu0 %2496  ;;  %3810 = vmatpush1.bf16.msra.mxu1 %v4925_v3 }
 0x217   : > { %v2246_v15 = vpop.permute.xlu1 %2245  ;;  %2573 = vst.msk [vmem:[#allocation3 + $0x50] sm:$0xf] %vm2552_vm13, %v2497_v16  ;;  %3811 = vmatprep.subr.bf16.mxu1 %v5019_v13 }
 0x218   : > { %2319 = vst.msk [vmem:[#allocation3 + $0x5c] sm:$0xf] %vm2295_vm12, %v2246_v15  ;;  %2002 = vrot.lane.b32.xlu0 %v4653_v12, %s5013_s15  ;;  %v4926_v15 = vld [vmem:[%s6611_s3 + $0x20] sm:$0xff]  }
 0x219   : > { %2000 = vrot.lane.b32.xlu1 %v4558_v47, %s5013_s15 }
 0x21a   : > { %v705_v20 = vpop.permute.xlu0 %704  ;;  %3812 = vmatpush1.bf16.msra.mxu1 %v4926_v15 }
 0x21b   : > { %v2499_v50 = vpop.permute.xlu1 %2498  ;;  %777 = vst.msk [vmem:[#allocation3 + $0x60] sm:$0xf] %vm752_vm6, %v705_v20  ;;  %3813 = vmatprep.subr.bf16.mxu1 %v5019_v13 }
 0x21c   : > { %2574 = vst.msk [vmem:[#allocation3 + $0x54] sm:$0xf] %vm2552_vm13, %v2499_v50  ;;  %2255 = vrot.lane.b32.xlu0 %v4589_v25, %s5014_s16  ;;  %v4927_v50 = vld [vmem:[%s6611_s3 + $0x18] sm:$0xff]  }
 0x21d   : > { %2004 = vrot.lane.b32.xlu1 %v4654_v17, %s5013_s15  ;;  %s5021_s15 = smov 64  }
 0x21e   : > { %v2501_v24 = vpop.permute.xlu0 %2500  ;;  %3814 = vmatpush1.bf16.msra.mxu1 %v4927_v50 }
 0x21f   : > { %v707_v8 = vpop.permute.xlu1 %706  ;;  %2575 = vst.msk [vmem:[#allocation3 + $0x58] sm:$0xf] %vm2552_vm13, %v2501_v24  ;;  %3815 = vmatprep.subr.bf16.mxu1 %v5019_v13 }
 0x220   : > { %778 = vst.msk [vmem:[#allocation3 + $0x64] sm:$0xf] %vm752_vm6, %v707_v8  ;;  %2259 = vrot.lane.b32.xlu0 %v4685_v21, %s5014_s16  ;;  %v4928_v21 = vld [vmem:[%s6611_s3 + $0x10] sm:$0xff]  }
 0x221   : > { %2257 = vrot.lane.b32.xlu1 %v4590_v58, %s5014_s16  ;;  %v4736_v58 = vpack.c.bf16 %v3232_v28, %v3232_v28 }
 0x222   : > { %v709_v40 = vpop.permute.xlu0 %708  ;;  %3816 = vmatpush1.bf16.msra.mxu1 %v4928_v21 }
 0x223   : > { %v2503_v42 = vpop.permute.xlu1 %2502  ;;  %v4917_v30 = vld [vmem:[#allocation3 + $0x50] sm:$0xff]   ;;  %779 = vst.msk [vmem:[#allocation3 + $0x68] sm:$0xf] %vm752_vm6, %v709_v40  ;;  %3817 = vmatprep.subr.bf16.mxu1 %v5019_v13 }
 0x224   : > { %2576 = vst.msk [vmem:[#allocation3 + $0x5c] sm:$0xf] %vm2552_vm13, %v2503_v42  ;;  %4834 = vmatprep.mubr.msk.bf16.mxu0 %vm2719_vm14, %v4917_v30  ;;  %2512 = vrot.lane.b32.xlu0 %v4621_v63, %s5016_s25 }
 0x225   : > { %2261 = vrot.lane.b32.xlu1 %v4686_v27, %s5014_s16 }
 0x226   : > { %v962_v35 = vpop.permute.xlu0 %961  ;;  %3818 = vmatpush1.bf16.msra.mxu1 %v4929_v39 }
 0x227   : > { %v711_v33 = vpop.permute.xlu1 %710  ;;  %1034 = vst.msk [vmem:[#allocation3 + $0x60] sm:$0xf] %vm1009_vm7, %v962_v35  ;;  %3819 = vmatprep.subr.bf16.mxu1 %v5019_v13 }
 0x228   : > { %780 = vst.msk [vmem:[#allocation3 + $0x6c] sm:$0xf] %vm752_vm6, %v711_v33  ;;  %2516 = vrot.lane.b32.xlu0 %v4717_v32, %s5016_s25 }
 0x229   : > { %2514 = vrot.lane.b32.xlu1 %v4622_v29, %s5016_s25 }
 0x22a   : > { %v966_v41 = vpop.permute.xlu0 %965  ;;  %3820 = vmatpush1.bf16.msra.mxu1 %v4930_v31 }
 0x22b   : > { %v964_v37 = vpop.permute.xlu1 %963  ;;  %v4918_v52 = vld [vmem:[#allocation3 + $0x58] sm:$0xff]   ;;  %1036 = vst.msk [vmem:[#allocation3 + $0x68] sm:$0xf] %vm1009_vm7, %v966_v41  ;;  %3835 = vmatprep.subr.bf16.mxu1 %v5019_v13 }
 0x22c   : > { %1035 = vst.msk [vmem:[#allocation3 + $0x64] sm:$0xf] %vm1009_vm7, %v964_v37  ;;  %v4824_v44 = vpop.f32.mrf.mxu0  ;;  %4835 = vmatmul.mubr.msk.bf16.gmra.mxu0 %vm2719_vm14, %v4918_v52  ;;  %3198 = vrot.lane.b32.xlu0 %v4727_v46, %s5017_s8 }
 0x22d   : > { %2518 = vrot.lane.b32.xlu1 %v4718_v36, %s5016_s25  ;;  %v2850_v45 = vadd.f32 %v4824_v44, %v5984_v0  ;;  %s5025_s25 = smov [#allocation8]  }
 0x22e   : > { %v2841_v48 = vpop.f32.mrf.mxu0  ;;  %v1219_v25 = vpop.permute.xlu0 %1218  ;;  %3836 = vmatpush2.bf16.msra.mxu1 %v4931_v56  ;;  %s4949_s26 = sshll.u32 %s5025_s25, 4  ;;  %s4950_s26 = int_to_ptr.vmem [resolvable:$false] %s4949_s26 }
 0x22f   : > { %v968_v47 = vpop.permute.xlu1 %967  ;;  %2947 = vst.msk [vmem:[#allocation4 + $0x50] sm:$0xff] %vm2936_vm15, %v2850_v45  ;;  %v2842_v53 = vadd.f32 %v5984_v0, %v2841_v48  ;;  %s4951_s30 = scalar_lea.vmem %s4950_s26, 512 }
 0x230   : > { %1037 = vst.msk [vmem:[#allocation3 + $0x6c] sm:$0xf] %vm1009_vm7, %v968_v47  ;;  %v4825_v54 = vpop.f32.mrf.mxu0  ;;  %3263 = vrot.lane.b32.xlu0 %v4735_v57, %s5018_s9 }
 0x231   : > { %1291 = vst.msk [vmem:[#allocation3 + $0x60] sm:$0xf] %vm1266_vm8, %v1219_v25  ;;  %3200 = vrot.lane.b32.xlu1 %v4728_v51, %s5017_s8  ;;  %v2853_v18 = vadd.f32 %v4825_v54, %v5984_v0 }
 0x232   : > { %2945 = vst.msk [vmem:[#allocation4 + $0x40] sm:$0xff] %vm2936_vm15, %v2842_v53  ;;  %v2844_v22 = vpop.f32.mrf.mxu0  ;;  %v1223_v61 = vpop.permute.xlu0 %1222 }
 0x233   : > { %v1221_v55 = vpop.permute.xlu1 %1220  ;;  %2948 = vst.msk [vmem:[#allocation4 + $0x58] sm:$0xff] %vm2936_vm15, %v2853_v18  ;;  %v2845_v60 = vadd.f32 %v5984_v0, %v2844_v22 }
 0x234   : > { %1292 = vst.msk [vmem:[#allocation3 + $0x64] sm:$0xf] %vm1266_vm8, %v1221_v55  ;;  %1293 = vst.msk [vmem:[#allocation3 + $0x68] sm:$0xf] %vm1266_vm8, %v1223_v61  ;;  %3328 = vrot.lane.b32.xlu0 %v6069_v49, %s5020_s12 }
 0x235   : > { %3265 = vrot.lane.b32.xlu1 %v4736_v58, %s5018_s9  ;;  %2946 = vst.msk [vmem:[#allocation4 + $0x48] sm:$0xff] %vm2936_vm15, %v2845_v60 }
 0x236   : > { %v1476_v23 = vpop.permute.xlu0 %1475  ;;  %v2990_v2 = vld [vmem:[#allocation4 + $0x50] sm:$0xff] }
 0x237   : > { %v1225_v63 = vpop.permute.xlu1 %1224  ;;  %1548 = vst.msk [vmem:[#allocation3 + $0x60] sm:$0xf] %vm1523_vm9, %v1476_v23 }
 0x238   : > { %1294 = vst.msk [vmem:[#allocation3 + $0x6c] sm:$0xf] %vm1266_vm8, %v1225_v63  ;;  %3393 = vrot.lane.b32.xlu0 %v4728_v51, %s5021_s15 }
 0x239   : > { %v2973_v29 = vld [vmem:[#allocation4 + $0x40] sm:$0xff]  ;;  %3330 = vrot.lane.b32.xlu1 %v6185_v10, %s5020_s12 }
 0x23a   : > { %v3006_v49 = vmax.f32 %v2973_v29, %v2990_v2  ;;  %v1480_v7 = vpop.permute.xlu0 %1479  ;;  %v2991_v9 = vld [vmem:[#allocation4 + $0x58] sm:$0xff] }
 0x23b   : > { %v1478_v4 = vpop.permute.xlu1 %1477  ;;  %1550 = vst.msk [vmem:[#allocation3 + $0x68] sm:$0xf] %vm1523_vm9, %v1480_v7 }
 0x23c   : > { %3022 = vst.msk [vmem:[#allocation4 + $0x20] sm:$0xff] %vm2936_vm15, %v3006_v49  ;;  %v2974_v12 = vld [vmem:[#allocation4 + $0x48] sm:$0xff]  ;;  %3458 = vrot.lane.b32.xlu0 %v4736_v58, %s5022_s23 }
 0x23d   : > { %1549 = vst.msk [vmem:[#allocation3 + $0x64] sm:$0xf] %vm1523_vm9, %v1478_v4  ;;  %3395 = vrot.lane.b32.xlu1 %v4752_v6, %s5021_s15  ;;  %v3007_v14 = vmax.f32 %v2974_v12, %v2991_v9 }
 0x23e   : > { %v1733_v17 = vpop.permute.xlu0 %1732 }
 0x23f   : > { %v1482_v16 = vpop.permute.xlu1 %1481  ;;  %3023 = vst.msk [vmem:[#allocation4 + $0x28] sm:$0xff] %vm2936_vm15, %v3007_v14 }
 0x240   : > { %1551 = vst.msk [vmem:[#allocation3 + $0x6c] sm:$0xf] %vm1523_vm9, %v1482_v16  ;;  %3524 = vrot.lane.b32.xlu0 %v6185_v10, %s5023_s7 }
 0x241   : > { %1805 = vst.msk [vmem:[#allocation3 + $0x60] sm:$0xf] %vm1780_vm10, %v1733_v17  ;;  %3460 = vrot.lane.b32.xlu1 %v6187_v11, %s5022_s23 }
 0x242   : > { %v1737_v20 = vpop.permute.xlu0 %1736 }
 0x243   : > { %v1735_v19 = vpop.permute.xlu1 %1734  ;;  %1807 = vst.msk [vmem:[#allocation3 + $0x68] sm:$0xf] %vm1780_vm10, %v1737_v20 }
 0x244   : > { %1806 = vst.msk [vmem:[#allocation3 + $0x64] sm:$0xf] %vm1780_vm10, %v1735_v19  ;;  %3589 = vrot.lane.b32.xlu0 %v4752_v6, %s5024_s10 }
 0x246   : > { %v3038_v8 = vld [vmem:[#allocation4 + $0x20] ss:$2 sm:$0xff]  ;;  %v3054_v24 = vld [vmem:[#allocation4 + $0x21] ss:$2 sm:$0xff]  ;;  %v1991_v10 = vpop.permute.xlu0 %1990 }
 0x247   : > { %v1739_v5 = vpop.permute.xlu1 %1738  ;;  %v3067_v26 = vmax.f32 %v3038_v8, %v3054_v24  ;;  %2063 = vst.msk [vmem:[#allocation3 + $0x60] sm:$0xf] %vm2038_vm11, %v1991_v10 }
 0x248   : > { %1808 = vst.msk [vmem:[#allocation3 + $0x6c] sm:$0xf] %vm1780_vm10, %v1739_v5  ;;  %3202 = vrot.lane.b32.xlu0 %v4752_v6, %s5017_s8 }
 0x249   : > { %v3075_v27 = vmax.f32 %v3067_v26, 0.0 }
 0x24a   : > { %v1995_v30 = vpop.permute.xlu0 %1994 }
 0x24b   : > { %v1993_v42 = vpop.permute.xlu1 %1992  ;;  %3111 = vst.msk [vmem:[#allocation5 + $0x31] sm:$0xff] %vm2936_vm15, %v3075_v27 }
 0x24c   : > { %2064 = vst.msk [vmem:[#allocation3 + $0x64] sm:$0xf] %vm2038_vm11, %v1993_v42  ;;  %2065 = vst.msk [vmem:[#allocation3 + $0x68] sm:$0xf] %vm2038_vm11, %v1995_v30  ;;  %3267 = vrot.lane.b32.xlu0 %v6187_v11, %s5018_s9 }
 0x24e   : > { %v2248_v32 = vpop.permute.xlu0 %2247 }
 0x24f   : > { %v1997_v40 = vpop.permute.xlu1 %1996  ;;  %2320 = vst.msk [vmem:[#allocation3 + $0x60] sm:$0xf] %vm2295_vm12, %v2248_v32 }
 0x250   : > { %2066 = vst.msk [vmem:[#allocation3 + $0x6c] sm:$0xf] %vm2038_vm11, %v1997_v40 }
 0x252   : > { %v3298_v34 = vld [vmem:[#allocation5 + $0x30] sm:$0xff]  ;;  %v2252_v35 = vpop.permute.xlu0 %2251 }
 0x253   : > { %v2250_v33 = vpop.permute.xlu1 %2249  ;;  %v3428_v11 = vld [vmem:[#allocation5 + $0x32] sm:$0xff]  ;;  %v4745_v36 = vpack.c.bf16 %v3298_v34, %v3298_v34  ;;  %2322 = vst.msk [vmem:[#allocation3 + $0x68] sm:$0xf] %vm2295_vm12, %v2252_v35 }
 0x254   : > { %2321 = vst.msk [vmem:[#allocation3 + $0x64] sm:$0xf] %vm2295_vm12, %v2250_v33  ;;  %v4761_v46 = vpack.c.bf16 %v3428_v11, %v3428_v11  ;;  %v3363_v37 = vld [vmem:[#allocation5 + $0x31] sm:$0xff] }
 0x255   : > { %3332 = vrot.lane.b32.xlu0 %v4745_v36, %s5020_s12  ;;  %3526 = vrot.lane.b32.xlu1 %v4745_v36, %s5023_s7  ;;  %3161 = vst.msk [vmem:[#allocation6 + $0x18] sm:$0xf] %vm3157_vm2, %v4745_v36  ;;  %v4753_v41 = vpack.c.bf16 %v3363_v37, %v3363_v37 }
 0x256   : > { %3663 = vst.msk [vmem:[#allocation6 + $0xc] sm:$0xf] %vm3157_vm2, %v4761_v46  ;;  %v2505_v38 = vpop.permute.xlu0 %2504 }
 0x257   : > { %v2254_v52 = vpop.permute.xlu1 %2253  ;;  %2577 = vst.msk [vmem:[#allocation3 + $0x60] sm:$0xf] %vm2552_vm13, %v2505_v38 }
 0x258   : > { %2323 = vst.msk [vmem:[#allocation3 + $0x6c] sm:$0xf] %vm2295_vm12, %v2254_v52 }
 0x259   : > { %3397 = vrot.lane.b32.xlu0 %v4753_v41, %s5021_s15  ;;  %3591 = vrot.lane.b32.xlu1 %v4753_v41, %s5024_s10 }
 0x25a   : > { %v713_v44 = vpop.permute.xlu0 %712 }
 0x25b   : > { %v2507_v43 = vpop.permute.xlu1 %2506  ;;  %781 = vst.msk [vmem:[#allocation3 + $0x70] sm:$0xf] %vm752_vm6, %v713_v44 }
 0x25c   : > { %2578 = vst.msk [vmem:[#allocation3 + $0x64] sm:$0xf] %vm2552_vm13, %v2507_v43 }
 0x25d   : > { %3462 = vrot.lane.b32.xlu0 %v4761_v46, %s5022_s23  ;;  %3204 = vrot.lane.b32.xlu1 %v4753_v41, %s5017_s8 }
 0x25e   : > { %v2509_v57 = vpop.permute.xlu0 %2508 }
 0x25f   : > { %v715_v45 = vpop.permute.xlu1 %714  ;;  %2579 = vst.msk [vmem:[#allocation3 + $0x68] sm:$0xf] %vm2552_vm13, %v2509_v57 }
 0x260   : > { %782 = vst.msk [vmem:[#allocation3 + $0x74] sm:$0xf] %vm752_vm6, %v715_v45 }
 0x261   : > { %3269 = vrot.lane.b32.xlu1 %v4761_v46, %s5018_s9 }
 0x262   : > { %v717_v51 = vpop.permute.xlu0 %716 }
 0x263   : > { %v2511_v47 = vpop.permute.xlu1 %2510  ;;  %v4919_v48 = vld [vmem:[#allocation3 + $0x60] sm:$0xff]   ;;  %783 = vst.msk [vmem:[#allocation3 + $0x78] sm:$0xf] %vm752_vm6, %v717_v51 }
 0x264   : > { %2580 = vst.msk [vmem:[#allocation3 + $0x6c] sm:$0xf] %vm2552_vm13, %v2511_v47  ;;  %4838 = vmatprep.mubr.msk.bf16.mxu0 %vm2719_vm14, %v4919_v48 }
 0x266   : > { %v970_v25 = vpop.permute.xlu0 %969 }
 0x267   : > { %v719_v53 = vpop.permute.xlu1 %718  ;;  %1038 = vst.msk [vmem:[#allocation3 + $0x70] sm:$0xf] %vm1009_vm7, %v970_v25 }
 0x268   : > { %784 = vst.msk [vmem:[#allocation3 + $0x7c] sm:$0xf] %vm752_vm6, %v719_v53  ;;  %vm3417_vm6 = vcmask 650752   ;;  %v6388_v53 = vld [vmem:[%s6610_s2] ss:$0 sm:$0xff] }
 0x26a   : > { %v974_v18 = vpop.permute.xlu0 %973 }
 0x26b   : > { %v972_v28 = vpop.permute.xlu1 %971  ;;  %v4920_v54 = vld [vmem:[#allocation3 + $0x68] sm:$0xff]   ;;  %1040 = vst.msk [vmem:[#allocation3 + $0x78] sm:$0xf] %vm1009_vm7, %v974_v18 }
 0x26c   : > { %1039 = vst.msk [vmem:[#allocation3 + $0x74] sm:$0xf] %vm1009_vm7, %v972_v28  ;;  %v4828_v59 = vpop.f32.mrf.mxu0  ;;  %4839 = vmatmul.mubr.msk.bf16.gmra.mxu0 %vm2719_vm14, %v4920_v54 }
 0x26d   : > { %v2866_v55 = vadd.f32 %v4828_v59, %v5984_v0 }
 0x26e   : > { %v2857_v58 = vpop.f32.mrf.mxu0  ;;  %v1227_v60 = vpop.permute.xlu0 %1226 }
 0x26f   : > { %v976_v22 = vpop.permute.xlu1 %975  ;;  %2951 = vst.msk [vmem:[#allocation4 + $0x70] sm:$0xff] %vm2936_vm15, %v2866_v55  ;;  %v2858_v13 = vadd.f32 %v5984_v0, %v2857_v58 }
 0x270   : > { %1041 = vst.msk [vmem:[#allocation3 + $0x7c] sm:$0xf] %vm1009_vm7, %v976_v22  ;;  %v4829_v61 = vpop.f32.mrf.mxu0  ;;  %vm3482_vm7 = vcmask 781952  }
 0x271   : > { %1295 = vst.msk [vmem:[#allocation3 + $0x70] sm:$0xf] %vm1266_vm8, %v1227_v60  ;;  %v2869_v62 = vadd.f32 %v4829_v61, %v5984_v0 }
 0x272   : > { %2949 = vst.msk [vmem:[#allocation4 + $0x60] sm:$0xff] %vm2936_vm15, %v2858_v13  ;;  %v2860_v23 = vpop.f32.mrf.mxu0  ;;  %v1231_v2 = vpop.permute.xlu0 %1230 }
 0x273   : > { %v1229_v63 = vpop.permute.xlu1 %1228  ;;  %2952 = vst.msk [vmem:[#allocation4 + $0x78] sm:$0xff] %vm2936_vm15, %v2869_v62  ;;  %v2861_v1 = vadd.f32 %v5984_v0, %v2860_v23 }
 0x274   : > { %1296 = vst.msk [vmem:[#allocation3 + $0x74] sm:$0xf] %vm1266_vm8, %v1229_v63  ;;  %1297 = vst.msk [vmem:[#allocation3 + $0x78] sm:$0xf] %vm1266_vm8, %v1231_v2 }
 0x275   : > { %2950 = vst.msk [vmem:[#allocation4 + $0x68] sm:$0xff] %vm2936_vm15, %v2861_v1 }
 0x276   : > { %v1484_v49 = vpop.permute.xlu0 %1483  ;;  %v2992_v3 = vld [vmem:[#allocation4 + $0x70] sm:$0xff] }
 0x277   : > { %v1233_v29 = vpop.permute.xlu1 %1232  ;;  %1552 = vst.msk [vmem:[#allocation3 + $0x70] sm:$0xf] %vm1523_vm9, %v1484_v49 }
 0x278   : > { %1298 = vst.msk [vmem:[#allocation3 + $0x7c] sm:$0xf] %vm1266_vm8, %v1233_v29  ;;  %vm3548_vm8 = vcmask 913152  }
 0x279   : > { %v2975_v4 = vld [vmem:[#allocation4 + $0x60] sm:$0xff] }
 0x27a   : > { %v3008_v6 = vmax.f32 %v2975_v4, %v2992_v3  ;;  %v1488_v0 = vpop.permute.xlu0 %1487  ;;  %v2993_v9 = vld [vmem:[#allocation4 + $0x78] sm:$0xff] }
 0x27b   : > { %v1486_v7 = vpop.permute.xlu1 %1485  ;;  %1554 = vst.msk [vmem:[#allocation3 + $0x78] sm:$0xf] %vm1523_vm9, %v1488_v0 }
 0x27c   : > { %3024 = vst.msk [vmem:[#allocation4 + $0x30] sm:$0xff] %vm2936_vm15, %v3008_v6  ;;  %v2976_v12 = vld [vmem:[#allocation4 + $0x68] sm:$0xff] }
 0x27d   : > { %1553 = vst.msk [vmem:[#allocation3 + $0x74] sm:$0xf] %vm1523_vm9, %v1486_v7  ;;  %v3009_v14 = vmax.f32 %v2976_v12, %v2993_v9 }
 0x27e   : > { %v1741_v16 = vpop.permute.xlu0 %1740 }
 0x27f   : > { %v1490_v15 = vpop.permute.xlu1 %1489  ;;  %3025 = vst.msk [vmem:[#allocation4 + $0x38] sm:$0xff] %vm2936_vm15, %v3009_v14 }
 0x280   : > { %1555 = vst.msk [vmem:[#allocation3 + $0x7c] sm:$0xf] %vm1523_vm9, %v1490_v15  ;;  %vm3613_vm9 = vcmask 1044352  }
 0x281   : > { %1809 = vst.msk [vmem:[#allocation3 + $0x70] sm:$0xf] %vm1780_vm10, %v1741_v16 }
 0x282   : > { %v1745_v50 = vpop.permute.xlu0 %1744 }
 0x283   : > { %v1743_v17 = vpop.permute.xlu1 %1742  ;;  %1811 = vst.msk [vmem:[#allocation3 + $0x78] sm:$0xf] %vm1780_vm10, %v1745_v50 }
 0x284   : > { %1810 = vst.msk [vmem:[#allocation3 + $0x74] sm:$0xf] %vm1780_vm10, %v1743_v17 }
 0x286   : > { %v3040_v20 = vld [vmem:[#allocation4 + $0x30] ss:$2 sm:$0xff]  ;;  %v3056_v21 = vld [vmem:[#allocation4 + $0x31] ss:$2 sm:$0xff]  ;;  %v1999_v5 = vpop.permute.xlu0 %1998 }
 0x287   : > { %v1747_v19 = vpop.permute.xlu1 %1746  ;;  %v3068_v8 = vmax.f32 %v3040_v20, %v3056_v21  ;;  %2067 = vst.msk [vmem:[#allocation3 + $0x70] sm:$0xf] %vm2038_vm11, %v1999_v5 }
 0x288   : > { %1812 = vst.msk [vmem:[#allocation3 + $0x7c] sm:$0xf] %vm1780_vm10, %v1747_v19  ;;  %vm3870_vm10 = vcmask 261120  }
 0x289   : > { %v3076_v24 = vmax.f32 %v3068_v8, 0.0 }
 0x28a   : > { %v2003_v26 = vpop.permute.xlu0 %2002 }
 0x28b   : > { %v2001_v10 = vpop.permute.xlu1 %2000  ;;  %3112 = vst.msk [vmem:[#allocation5 + $0x41] sm:$0xff] %vm2936_vm15, %v3076_v24  ;;  %v4934_v24 = vld [vmem:[#allocation6 + $0x4] ss:$8 sps:$4 sm:$0xff]  }
 0x28c   : > { %2068 = vst.msk [vmem:[#allocation3 + $0x74] sm:$0xf] %vm2038_vm11, %v2001_v10  ;;  %2069 = vst.msk [vmem:[#allocation3 + $0x78] sm:$0xf] %vm2038_vm11, %v2003_v26  ;;  %4421 = vmatprep.mubr.msk.bf16.mxu1 %vm2936_vm15, %v4934_v24 }
 0x28e   : > { %v2256_v39 = vpop.permute.xlu0 %2255 }
 0x28f   : > { %v2005_v27 = vpop.permute.xlu1 %2004  ;;  %2324 = vst.msk [vmem:[#allocation3 + $0x70] sm:$0xf] %vm2295_vm12, %v2256_v39 }
 0x290   : > { %2070 = vst.msk [vmem:[#allocation3 + $0x7c] sm:$0xf] %vm2038_vm11, %v2005_v27 }
 0x292   : > { %v3494_v30 = vld [vmem:[#allocation5 + $0x40] sm:$0xff]  ;;  %v2260_v40 = vpop.permute.xlu0 %2259 }
 0x293   : > { %v2258_v42 = vpop.permute.xlu1 %2257  ;;  %v3429_v31 = vld [vmem:[#allocation5 + $0x42] sm:$0xff]  ;;  %v4769_v32 = vpack.c.bf16 %v3494_v30, %v3494_v30  ;;  %2326 = vst.msk [vmem:[#allocation3 + $0x78] sm:$0xf] %vm2295_vm12, %v2260_v40 }
 0x294   : > { %2325 = vst.msk [vmem:[#allocation3 + $0x74] sm:$0xf] %vm2295_vm12, %v2258_v42  ;;  %v4762_v56 = vpack.c.bf16 %v3429_v31, %v3429_v31  ;;  %v3559_v33 = vld [vmem:[#allocation5 + $0x41] sm:$0xff] }
 0x295   : > { %3528 = vrot.lane.b32.xlu0 %v4769_v32, %s5023_s7  ;;  %3334 = vrot.lane.b32.xlu1 %v4769_v32, %s5020_s12  ;;  %3162 = vst.msk [vmem:[#allocation6 + $0x20] sm:$0xf] %vm3157_vm2, %v4769_v32  ;;  %v4777_v35 = vpack.c.bf16 %v3559_v33, %v3559_v33 }
 0x296   : > { %3664 = vst.msk [vmem:[#allocation6 + $0x14] sm:$0xf] %vm3157_vm2, %v4762_v56  ;;  %v2513_v11 = vpop.permute.xlu0 %2512 }
 0x297   : > { %v2262_v34 = vpop.permute.xlu1 %2261  ;;  %2581 = vst.msk [vmem:[#allocation3 + $0x70] sm:$0xf] %vm2552_vm13, %v2513_v11 }
 0x298   : > { %2327 = vst.msk [vmem:[#allocation3 + $0x7c] sm:$0xf] %vm2295_vm12, %v2262_v34 }
 0x299   : > { %3593 = vrot.lane.b32.xlu0 %v4777_v35, %s5024_s10  ;;  %3399 = vrot.lane.b32.xlu1 %v4777_v35, %s5021_s15 }
 0x29a   : > { %v2517_v46 = vpop.permute.xlu0 %2516 }
 0x29b   : > { %v2515_v36 = vpop.permute.xlu1 %2514  ;;  %2583 = vst.msk [vmem:[#allocation3 + $0x78] sm:$0xf] %vm2552_vm13, %v2517_v46 }
 0x29c   : > { %2582 = vst.msk [vmem:[#allocation3 + $0x74] sm:$0xf] %vm2552_vm13, %v2515_v36 }
 0x29d   : > { %3206 = vrot.lane.b32.xlu0 %v4777_v35, %s5017_s8  ;;  %3464 = vrot.lane.b32.xlu1 %v4762_v56, %s5022_s23 }
 0x29e   : > { %v3199_v52 = vpop.permute.xlu0 %3198 }
 0x29f   : > { %v2519_v37 = vpop.permute.xlu1 %2518  ;;  %3223 = vst.msk [vmem:[#allocation6] sm:$0xf] %vm3222_vm3, %v3199_v52 }
 0x2a0   : > { %2584 = vst.msk [vmem:[#allocation3 + $0x7c] sm:$0xf] %vm2552_vm13, %v2519_v37 }
 0x2a1   : > { %3271 = vrot.lane.b32.xlu0 %v4762_v56, %s5018_s9 }
 0x2a2   : > { %v3264_v43 = vpop.permute.xlu0 %3263 }
 0x2a3   : > { %v3201_v38 = vpop.permute.xlu1 %3200  ;;  %v4921_v41 = vld [vmem:[#allocation3 + $0x70] sm:$0xff]   ;;  %3288 = vst.msk [vmem:[#allocation6] sm:$0xf] %vm3287_vm4, %v3264_v43 }
 0x2a4   : > { %3224 = vst.msk [vmem:[#allocation6 + $0x8] sm:$0xf] %vm3222_vm3, %v3201_v38  ;;  %4842 = vmatprep.mubr.msk.bf16.mxu0 %vm2719_vm14, %v4921_v41 }
 0x2a6   : > { %v3329_v57 = vpop.permute.xlu0 %3328 }
 0x2a7   : > { %v3266_v44 = vpop.permute.xlu1 %3265  ;;  %v4922_v45 = vld [vmem:[#allocation3 + $0x78] sm:$0xff]   ;;  %3353 = vst.msk [vmem:[#allocation6] sm:$0xf] %vm3352_vm5, %v3329_v57 }
 0x2a8   : > { %3289 = vst.msk [vmem:[#allocation6 + $0x8] sm:$0xf] %vm3287_vm4, %v3266_v44  ;;  %4843 = vmatmul.mubr.msk.bf16.gmra.mxu0 %vm2719_vm14, %v4922_v45 }
 0x2aa   : > { %v3394_v48 = vpop.permute.xlu0 %3393 }
 0x2ab   : > { %v3331_v47 = vpop.permute.xlu1 %3330  ;;  %3418 = vst.msk [vmem:[#allocation6] sm:$0xf] %vm3417_vm6, %v3394_v48 }
 0x2ac   : > { %3354 = vst.msk [vmem:[#allocation6 + $0x8] sm:$0xf] %vm3352_vm5, %v3331_v47  ;;  %v4832_v51 = vpop.f32.mrf.mxu0 }
 0x2ad   : > { %v2882_v25 = vadd.f32 %v6388_v53, %v4832_v51 }
 0x2ae   : > { %v2873_v54 = vpop.f32.mrf.mxu0  ;;  %v3459_v59 = vpop.permute.xlu0 %3458 }
 0x2af   : > { %v3396_v28 = vpop.permute.xlu1 %3395  ;;  %2955 = vst.msk [vmem:[#allocation4 + $0x90] sm:$0xff] %vm2936_vm15, %v2882_v25  ;;  %v2874_v18 = vadd.f32 %v6388_v53, %v2873_v54 }
 0x2b0   : > { %3419 = vst.msk [vmem:[#allocation6 + $0x8] sm:$0xf] %vm3417_vm6, %v3396_v28  ;;  %v4833_v55 = vpop.f32.mrf.mxu0 }
 0x2b1   : > { %3483 = vst.msk [vmem:[#allocation6] sm:$0xf] %vm3482_vm7, %v3459_v59  ;;  %v2885_v22 = vadd.f32 %v6388_v53, %v4833_v55 }
 0x2b2   : > { %2953 = vst.msk [vmem:[#allocation4 + $0x80] sm:$0xff] %vm2936_vm15, %v2874_v18  ;;  %v2876_v13 = vpop.f32.mrf.mxu0  ;;  %v3525_v61 = vpop.permute.xlu0 %3524 }
 0x2b3   : > { %v3461_v58 = vpop.permute.xlu1 %3460  ;;  %2956 = vst.msk [vmem:[#allocation4 + $0x98] sm:$0xff] %vm2936_vm15, %v2885_v22  ;;  %v2877_v60 = vadd.f32 %v6388_v53, %v2876_v13 }
 0x2b4   : > { %3484 = vst.msk [vmem:[#allocation6 + $0x8] sm:$0xf] %vm3482_vm7, %v3461_v58 }
 0x2b5   : > { %3549 = vst.msk [vmem:[#allocation6] sm:$0xf] %vm3548_vm8, %v3525_v61 }
 0x2b6   : > { %2954 = vst.msk [vmem:[#allocation4 + $0x88] sm:$0xff] %vm2936_vm15, %v2877_v60  ;;  %v3590_v62 = vpop.permute.xlu0 %3589  ;;  %v2994_v63 = vld [vmem:[#allocation4 + $0x90] sm:$0xff] }
 0x2b7   : > { %3614 = vst.msk [vmem:[#allocation6] sm:$0xf] %vm3613_vm9, %v3590_v62 }
 0x2b9   : > { %v2977_v23 = vld [vmem:[#allocation4 + $0x80] sm:$0xff] }
 0x2ba   : > { %v3010_v1 = vmax.f32 %v2977_v23, %v2994_v63  ;;  %v3203_v2 = vpop.permute.xlu0 %3202  ;;  %v2995_v29 = vld [vmem:[#allocation4 + $0x98] sm:$0xff] }
 0x2bb   : > { %3225 = vst.msk [vmem:[#allocation6 + $0x10] sm:$0xf] %vm3222_vm3, %v3203_v2 }
 0x2bc   : > { %3026 = vst.msk [vmem:[#allocation4 + $0x40] sm:$0xff] %vm2936_vm15, %v3010_v1 }
 0x2bd   : > { %v2978_v49 = vld [vmem:[#allocation4 + $0x88] sm:$0xff] }
 0x2be   : > { %v3011_v3 = vmax.f32 %v2978_v49, %v2995_v29  ;;  %v3268_v4 = vpop.permute.xlu0 %3267 }
 0x2bf   : > { %3290 = vst.msk [vmem:[#allocation6 + $0x10] sm:$0xf] %vm3287_vm4, %v3268_v4 }
 0x2c0   : > { %3027 = vst.msk [vmem:[#allocation4 + $0x48] sm:$0xff] %vm2936_vm15, %v3011_v3 }
 0x2c7   : > { %v3042_v6 = vld [vmem:[#allocation4 + $0x40] ss:$2 sm:$0xff]  ;;  %v3058_v7 = vld [vmem:[#allocation4 + $0x41] ss:$2 sm:$0xff]  ;;  %v3333_v0 = vpop.permute.xlu0 %3332  ;;  %v3527_v9 = vpop.permute.xlu1 %3526 }
 0x2c8   : > { %v3069_v12 = vmax.f32 %v3042_v6, %v3058_v7  ;;  %3355 = vst.msk [vmem:[#allocation6 + $0x10] sm:$0xf] %vm3352_vm5, %v3333_v0 }
 0x2c9   : > { %3550 = vst.msk [vmem:[#allocation6 + $0x8] sm:$0xf] %vm3548_vm8, %v3527_v9 }
 0x2ca   : > { %v3077_v14 = vmax.f32 %v3069_v12, 0.0 }
 0x2cb   : > { %v3398_v15 = vpop.permute.xlu0 %3397  ;;  %v3592_v16 = vpop.permute.xlu1 %3591 }
 0x2cc   : > { %3113 = vst.msk [vmem:[#allocation5 + $0x51] sm:$0xff] %vm2936_vm15, %v3077_v14 }
 0x2cd   : > { %3420 = vst.msk [vmem:[#allocation6 + $0x10] sm:$0xf] %vm3417_vm6, %v3398_v15 }
 0x2ce   : > { %3615 = vst.msk [vmem:[#allocation6 + $0x8] sm:$0xf] %vm3613_vm9, %v3592_v16 }
 0x2cf   : > { %v3463_v17 = vpop.permute.xlu0 %3462  ;;  %v3205_v50 = vpop.permute.xlu1 %3204 }
 0x2d0   : > { %3485 = vst.msk [vmem:[#allocation6 + $0x10] sm:$0xf] %vm3482_vm7, %v3463_v17 }
 0x2d1   : > { %3226 = vst.msk [vmem:[#allocation6 + $0x18] sm:$0xf] %vm3222_vm3, %v3205_v50 }
 0x2d3   : > { %v3300_v19 = vld [vmem:[#allocation5 + $0x50] sm:$0xff]  ;;  %v3270_v21 = vpop.permute.xlu1 %3269 }
 0x2d4   : > { %v3430_v20 = vld [vmem:[#allocation5 + $0x52] sm:$0xff]  ;;  %v4747_v5 = vpack.c.bf16 %v3300_v19, %v3300_v19  ;;  %3291 = vst.msk [vmem:[#allocation6 + $0x18] sm:$0xf] %vm3287_vm4, %v3270_v21 }
 0x2d5   : > { %v4932_v8 = vld [vmem:[#allocation6] ss:$8 sps:$4 sm:$0xff]   ;;  %v4763_v10 = vpack.c.bf16 %v3430_v20, %v3430_v20  ;;  %v3365_v26 = vld [vmem:[#allocation5 + $0x51] sm:$0xff] }
 0x2d6   : > { %3336 = vrot.lane.b32.xlu0 %v4747_v5, %s5020_s12  ;;  %3530 = vrot.lane.b32.xlu1 %v4747_v5, %s5023_s7  ;;  %3163 = vst.msk [vmem:[#allocation6 + $0x28] sm:$0xf] %vm3157_vm2, %v4747_v5  ;;  %v4755_v27 = vpack.c.bf16 %v3365_v26, %v3365_v26 }
 0x2d7   : > { %3665 = vst.msk [vmem:[#allocation6 + $0x1c] sm:$0xf] %vm3157_vm2, %v4763_v10  ;;  %3838 = vmatmul.mubr.bf16.vlgmr.msra.gmra.mxu1 %v4932_v8 }
 0x2da   : > { %3401 = vrot.lane.b32.xlu0 %v4755_v27, %s5021_s15  ;;  %3595 = vrot.lane.b32.xlu1 %v4755_v27, %s5024_s10 }
 0x2de   : > { %3466 = vrot.lane.b32.xlu0 %v4763_v10, %s5022_s23  ;;  %3208 = vrot.lane.b32.xlu1 %v4755_v27, %s5017_s8  ;;  %v4935_v24 = vld [vmem:[#allocation6 + $0x14] ss:$8 sps:$4 sm:$0xff]  }
 0x2df   : > { %4422 = vmatprep.mubr.msk.bf16.mxu1 %vm2936_vm15, %v4935_v24 }
 0x2e2   : > { %3273 = vrot.lane.b32.xlu1 %v4763_v10, %s5018_s9 }
 0x2ec   : > { %v4836_v39 = vpop.f32.mrf.mxu0 }
 0x2ed   : > { %v2898_v42 = vadd.f32 %v6388_v53, %v4836_v39 }
 0x2ee   : > { %v2889_v30 = vpop.f32.mrf.mxu0 }
 0x2ef   : > { %2959 = vst.msk [vmem:[#allocation4 + $0xb0] sm:$0xff] %vm2936_vm15, %v2898_v42  ;;  %v2890_v31 = vadd.f32 %v6388_v53, %v2889_v30 }
 0x2f0   : > { %v4837_v40 = vpop.f32.mrf.mxu0 }
 0x2f1   : > { %2957 = vst.msk [vmem:[#allocation4 + $0xa0] sm:$0xff] %vm2936_vm15, %v2890_v31  ;;  %v2901_v32 = vadd.f32 %v6388_v53, %v4837_v40 }
 0x2f2   : > { %v2892_v56 = vpop.f32.mrf.mxu0 }
 0x2f3   : > { %2960 = vst.msk [vmem:[#allocation4 + $0xb8] sm:$0xff] %vm2936_vm15, %v2901_v32  ;;  %v2893_v33 = vadd.f32 %v6388_v53, %v2892_v56 }
 0x2f5   : > { %2958 = vst.msk [vmem:[#allocation4 + $0xa8] sm:$0xff] %vm2936_vm15, %v2893_v33 }
 0x2f6   : > { %v2996_v34 = vld [vmem:[#allocation4 + $0xb0] sm:$0xff] }
 0x2f8   : > { %v2979_v11 = vld [vmem:[#allocation4 + $0xa0] sm:$0xff] }
 0x2f9   : > { %v3012_v35 = vmax.f32 %v2979_v11, %v2996_v34 }
 0x2fa   : > { %v2997_v36 = vld [vmem:[#allocation4 + $0xb8] sm:$0xff] }
 0x2fb   : > { %3028 = vst.msk [vmem:[#allocation4 + $0x50] sm:$0xff] %vm2936_vm15, %v3012_v35 }
 0x2fc   : > { %v2980_v46 = vld [vmem:[#allocation4 + $0xa8] sm:$0xff] }
 0x2fd   : > { %v3013_v37 = vmax.f32 %v2980_v46, %v2997_v36 }
 0x2ff   : > { %3029 = vst.msk [vmem:[#allocation4 + $0x58] sm:$0xff] %vm2936_vm15, %v3013_v37 }
 0x306   : > { %v3044_v52 = vld [vmem:[#allocation4 + $0x50] ss:$2 sm:$0xff]  ;;  %v3060_v38 = vld [vmem:[#allocation4 + $0x51] ss:$2 sm:$0xff] }
 0x307   : > { %v3529_v41 = vpop.permute.xlu0 %3528  ;;  %v3335_v43 = vpop.permute.xlu1 %3334  ;;  %v3070_v44 = vmax.f32 %v3044_v52, %v3060_v38 }
 0x308   : > { %3551 = vst.msk [vmem:[#allocation6 + $0x10] sm:$0xf] %vm3548_vm8, %v3529_v41 }
 0x309   : > { %3356 = vst.msk [vmem:[#allocation6 + $0x18] sm:$0xf] %vm3352_vm5, %v3335_v43  ;;  %v3078_v45 = vmax.f32 %v3070_v44, 0.0 }
 0x30b   : > { %v3594_v57 = vpop.permute.xlu0 %3593  ;;  %v3400_v47 = vpop.permute.xlu1 %3399  ;;  %3114 = vst.msk [vmem:[#allocation5 + $0x61] sm:$0xff] %vm2936_vm15, %v3078_v45 }
 0x30c   : > { %3616 = vst.msk [vmem:[#allocation6 + $0x10] sm:$0xf] %vm3613_vm9, %v3594_v57 }
 0x30d   : > { %3421 = vst.msk [vmem:[#allocation6 + $0x18] sm:$0xf] %vm3417_vm6, %v3400_v47 }
 0x30f   : > { %v3207_v48 = vpop.permute.xlu0 %3206  ;;  %v3465_v51 = vpop.permute.xlu1 %3464 }
 0x310   : > { %3227 = vst.msk [vmem:[#allocation6 + $0x20] sm:$0xf] %vm3222_vm3, %v3207_v48 }
 0x311   : > { %3486 = vst.msk [vmem:[#allocation6 + $0x18] sm:$0xf] %vm3482_vm7, %v3465_v51 }
 0x312   : > { %v3496_v25 = vld [vmem:[#allocation5 + $0x60] sm:$0xff] }
 0x313   : > { %v3431_v28 = vld [vmem:[#allocation5 + $0x62] sm:$0xff]  ;;  %v3272_v54 = vpop.permute.xlu0 %3271  ;;  %v4771_v18 = vpack.c.bf16 %v3496_v25, %v3496_v25 }
 0x314   : > { %v4764_v59 = vpack.c.bf16 %v3431_v28, %v3431_v28  ;;  %3292 = vst.msk [vmem:[#allocation6 + $0x20] sm:$0xf] %vm3287_vm4, %v3272_v54  ;;  %v3561_v55 = vld [vmem:[#allocation5 + $0x61] sm:$0xff] }
 0x315   : > { %3532 = vrot.lane.b32.xlu0 %v4771_v18, %s5023_s7  ;;  %3338 = vrot.lane.b32.xlu1 %v4771_v18, %s5020_s12  ;;  %3164 = vst.msk [vmem:[#allocation6 + $0x30] sm:$0xf] %vm3157_vm2, %v4771_v18  ;;  %v4779_v22 = vpack.c.bf16 %v3561_v55, %v3561_v55  ;;  %v3629_v55 = vld [vmem:[#allocation5 + $0x92] sm:$0xff] }
 0x316   : > { %3666 = vst.msk [vmem:[#allocation6 + $0x24] sm:$0xf] %vm3157_vm2, %v4764_v59 }
 0x319   : > { %3597 = vrot.lane.b32.xlu0 %v4779_v22, %s5024_s10  ;;  %3403 = vrot.lane.b32.xlu1 %v4779_v22, %s5021_s15 }
 0x31d   : > { %3210 = vrot.lane.b32.xlu0 %v4779_v22, %s5017_s8  ;;  %3468 = vrot.lane.b32.xlu1 %v4764_v59, %s5022_s23 }
 0x321   : > { %3275 = vrot.lane.b32.xlu0 %v4764_v59, %s5018_s9 }
 0x32c   : > { %v4840_v58 = vpop.f32.mrf.mxu0 }
 0x32d   : > { %v2914_v13 = vadd.f32 %v6388_v53, %v4840_v58 }
 0x32e   : > { %v2905_v60 = vpop.f32.mrf.mxu0 }
 0x32f   : > { %2963 = vst.msk [vmem:[#allocation4 + $0xd0] sm:$0xff] %vm2936_vm15, %v2914_v13  ;;  %v2906_v61 = vadd.f32 %v6388_v53, %v2905_v60  ;;  %v4790_v13 = vpack.c.bf16 %v3629_v55, %v3629_v55  ;;  %v6506_v60 = vld [vmem:[%s6612_s4] ss:$0 sm:$0xff] }
 0x330   : > { %v4841_v62 = vpop.f32.mrf.mxu0 }
 0x331   : > { %2961 = vst.msk [vmem:[#allocation4 + $0xc0] sm:$0xff] %vm2936_vm15, %v2906_v61  ;;  %v2917_v63 = vadd.f32 %v6388_v53, %v4841_v62  ;;  %v3499_v61 = vld [vmem:[#allocation5 + $0x90] sm:$0xff] }
 0x332   : > { %v2908_v23 = vpop.f32.mrf.mxu0  ;;  %3669 = vst.msk [vmem:[#allocation6 + $0x3c] sm:$0xf] %vm3157_vm2, %v4790_v13 }
 0x333   : > { %2964 = vst.msk [vmem:[#allocation4 + $0xd8] sm:$0xff] %vm2936_vm15, %v2917_v63  ;;  %v2909_v1 = vadd.f32 %v6388_v53, %v2908_v23 }
 0x335   : > { %2962 = vst.msk [vmem:[#allocation4 + $0xc8] sm:$0xff] %vm2936_vm15, %v2909_v1  ;;  %v4774_v1 = vpack.c.bf16 %v3499_v61, %v3499_v61 }
 0x336   : > { %v2998_v2 = vld [vmem:[#allocation4 + $0xd0] sm:$0xff] }
 0x338   : > { %v2981_v29 = vld [vmem:[#allocation4 + $0xc0] sm:$0xff] }
 0x339   : > { %v3014_v49 = vmax.f32 %v2981_v29, %v2998_v2  ;;  %v3564_v2 = vld [vmem:[#allocation5 + $0x91] sm:$0xff] }
 0x33a   : > { %v2999_v3 = vld [vmem:[#allocation4 + $0xd8] sm:$0xff] }
 0x33b   : > { %3030 = vst.msk [vmem:[#allocation4 + $0x60] sm:$0xff] %vm2936_vm15, %v3014_v49 }
 0x33c   : > { %v2982_v4 = vld [vmem:[#allocation4 + $0xc8] sm:$0xff] }
 0x33d   : > { %v3015_v6 = vmax.f32 %v2982_v4, %v2999_v3  ;;  %v4782_v4 = vpack.c.bf16 %v3564_v2, %v3564_v2 }
 0x33f   : > { %3031 = vst.msk [vmem:[#allocation4 + $0x68] sm:$0xff] %vm2936_vm15, %v3015_v6 }
 0x346   : > { %v3046_v7 = vld [vmem:[#allocation4 + $0x60] ss:$2 sm:$0xff]  ;;  %v3062_v0 = vld [vmem:[#allocation4 + $0x61] ss:$2 sm:$0xff] }
 0x347   : > { %v3071_v14 = vmax.f32 %v3046_v7, %v3062_v0 }
 0x348   : > { %v3337_v9 = vpop.permute.xlu0 %3336  ;;  %v3531_v12 = vpop.permute.xlu1 %3530 }
 0x349   : > { %3357 = vst.msk [vmem:[#allocation6 + $0x20] sm:$0xf] %vm3352_vm5, %v3337_v9  ;;  %v3079_v15 = vmax.f32 %v3071_v14, 0.0 }
 0x34a   : > { %3552 = vst.msk [vmem:[#allocation6 + $0x18] sm:$0xf] %vm3548_vm8, %v3531_v12 }
 0x34b   : > { %3115 = vst.msk [vmem:[#allocation5 + $0x71] sm:$0xff] %vm2936_vm15, %v3079_v15 }
 0x34c   : > { %v3402_v16 = vpop.permute.xlu0 %3401  ;;  %v3596_v17 = vpop.permute.xlu1 %3595 }
 0x34d   : > { %3422 = vst.msk [vmem:[#allocation6 + $0x20] sm:$0xf] %vm3417_vm6, %v3402_v16 }
 0x34e   : > { %3617 = vst.msk [vmem:[#allocation6 + $0x18] sm:$0xf] %vm3613_vm9, %v3596_v17 }
 0x350   : > { %v3467_v50 = vpop.permute.xlu0 %3466  ;;  %v3209_v19 = vpop.permute.xlu1 %3208 }
 0x351   : > { %3487 = vst.msk [vmem:[#allocation6 + $0x20] sm:$0xf] %vm3482_vm7, %v3467_v50 }
 0x352   : > { %3228 = vst.msk [vmem:[#allocation6 + $0x28] sm:$0xf] %vm3222_vm3, %v3209_v19  ;;  %v3302_v20 = vld [vmem:[#allocation5 + $0x70] sm:$0xff] }
 0x353   : > { %v3432_v21 = vld [vmem:[#allocation5 + $0x72] sm:$0xff]  ;;  %v4749_v8 = vpack.c.bf16 %v3302_v20, %v3302_v20 }
 0x354   : > { %v3274_v5 = vpop.permute.xlu1 %3273  ;;  %v4765_v26 = vpack.c.bf16 %v3432_v21, %v3432_v21  ;;  %v3367_v27 = vld [vmem:[#allocation5 + $0x71] sm:$0xff] }
 0x355   : > { %v4937_v10 = vld [vmem:[#allocation6 + $0x10] ss:$8 sps:$4 sm:$0xff]   ;;  %3293 = vst.msk [vmem:[#allocation6 + $0x28] sm:$0xf] %vm3287_vm4, %v3274_v5  ;;  %3340 = vrot.lane.b32.xlu0 %v4749_v8, %s5020_s12  ;;  %3534 = vrot.lane.b32.xlu1 %v4749_v8, %s5023_s7  ;;  %v4757_v39 = vpack.c.bf16 %v3367_v27, %v3367_v27 }
 0x356   : > { %3165 = vst.msk [vmem:[#allocation6 + $0x38] sm:$0xf] %vm3157_vm2, %v4749_v8  ;;  %3667 = vst.msk [vmem:[#allocation6 + $0x2c] sm:$0xf] %vm3157_vm2, %v4765_v26  ;;  %3846 = vmatmul.mubr.bf16.gmra.mxu1 %v4937_v10 }
 0x359   : > { %3405 = vrot.lane.b32.xlu0 %v4757_v39, %s5021_s15  ;;  %3599 = vrot.lane.b32.xlu1 %v4757_v39, %s5024_s10 }
 0x35d   : > { %3470 = vrot.lane.b32.xlu0 %v4765_v26, %s5022_s23  ;;  %3212 = vrot.lane.b32.xlu1 %v4757_v39, %s5017_s8  ;;  %v4938_v19 = vld [vmem:[#allocation6 + $0x24] ss:$8 sps:$4 sm:$0xff]  }
 0x35e   : > { %4423 = vmatprep.mubr.msk.bf16.mxu1 %vm2936_vm15, %v4938_v19 }
 0x361   : > { %3277 = vrot.lane.b32.xlu1 %v4765_v26, %s5018_s9 }
 0x368   : > { %v4844_v42 = vpop.f32.mrf.mxu0 }
 0x369   : > { %v2930_v30 = vadd.f32 %v6388_v53, %v4844_v42 }
 0x36a   : > { %v2921_v31 = vpop.f32.mrf.mxu0 }
 0x36b   : > { %2967 = vst.msk [vmem:[#allocation4 + $0xf0] sm:$0xff] %vm2936_vm15, %v2930_v30  ;;  %v2922_v40 = vadd.f32 %v6388_v53, %v2921_v31 }
 0x36c   : > { %v4845_v32 = vpop.f32.mrf.mxu0 }
 0x36d   : > { %2965 = vst.msk [vmem:[#allocation4 + $0xe0] sm:$0xff] %vm2936_vm15, %v2922_v40  ;;  %v2933_v56 = vadd.f32 %v6388_v53, %v4845_v32 }
 0x36e   : > { %v2924_v33 = vpop.f32.mrf.mxu0 }
 0x36f   : > { %2968 = vst.msk [vmem:[#allocation4 + $0xf8] sm:$0xff] %vm2936_vm15, %v2933_v56  ;;  %v2925_v34 = vadd.f32 %v6388_v53, %v2924_v33 }
 0x371   : > { %2966 = vst.msk [vmem:[#allocation4 + $0xe8] sm:$0xff] %vm2936_vm15, %v2925_v34 }
 0x372   : > { %v3000_v11 = vld [vmem:[#allocation4 + $0xf0] sm:$0xff] }
 0x374   : > { %v2983_v35 = vld [vmem:[#allocation4 + $0xe0] sm:$0xff] }
 0x375   : > { %v3016_v36 = vmax.f32 %v2983_v35, %v3000_v11 }
 0x376   : > { %v3001_v46 = vld [vmem:[#allocation4 + $0xf8] sm:$0xff] }
 0x377   : > { %3032 = vst.msk [vmem:[#allocation4 + $0x70] sm:$0xff] %vm2936_vm15, %v3016_v36 }
 0x378   : > { %v2984_v37 = vld [vmem:[#allocation4 + $0xe8] sm:$0xff] }
 0x379   : > { %v3017_v52 = vmax.f32 %v2984_v37, %v3001_v46 }
 0x37b   : > { %3033 = vst.msk [vmem:[#allocation4 + $0x78] sm:$0xff] %vm2936_vm15, %v3017_v52 }
 0x382   : > { %v3048_v38 = vld [vmem:[#allocation4 + $0x70] ss:$2 sm:$0xff]  ;;  %v3064_v41 = vld [vmem:[#allocation4 + $0x71] ss:$2 sm:$0xff] }
 0x383   : > { %v3072_v43 = vmax.f32 %v3048_v38, %v3064_v41 }
 0x385   : > { %v3080_v44 = vmax.f32 %v3072_v43, 0.0 }
 0x387   : > { %v3533_v45 = vpop.permute.xlu0 %3532  ;;  %v3339_v57 = vpop.permute.xlu1 %3338  ;;  %3116 = vst.msk [vmem:[#allocation5 + $0x81] sm:$0xff] %vm2936_vm15, %v3080_v44 }
 0x388   : > { %3553 = vst.msk [vmem:[#allocation6 + $0x20] sm:$0xf] %vm3548_vm8, %v3533_v45 }
 0x389   : > { %3358 = vst.msk [vmem:[#allocation6 + $0x28] sm:$0xf] %vm3352_vm5, %v3339_v57 }
 0x38b   : > { %v3598_v53 = vpop.permute.xlu0 %3597  ;;  %v3404_v47 = vpop.permute.xlu1 %3403 }
 0x38c   : > { %3618 = vst.msk [vmem:[#allocation6 + $0x20] sm:$0xf] %vm3613_vm9, %v3598_v53 }
 0x38d   : > { %3423 = vst.msk [vmem:[#allocation6 + $0x28] sm:$0xf] %vm3417_vm6, %v3404_v47 }
 0x38e   : > { %v3498_v48 = vld [vmem:[#allocation5 + $0x80] sm:$0xff] }
 0x38f   : > { %v3433_v51 = vld [vmem:[#allocation5 + $0x82] sm:$0xff]  ;;  %v3211_v25 = vpop.permute.xlu0 %3210  ;;  %v3469_v28 = vpop.permute.xlu1 %3468  ;;  %v4773_v54 = vpack.c.bf16 %v3498_v48, %v3498_v48 }
 0x390   : > { %v4766_v18 = vpack.c.bf16 %v3433_v51, %v3433_v51  ;;  %3229 = vst.msk [vmem:[#allocation6 + $0x30] sm:$0xf] %vm3222_vm3, %v3211_v25  ;;  %v3563_v59 = vld [vmem:[#allocation5 + $0x81] sm:$0xff] }
 0x391   : > { %3488 = vst.msk [vmem:[#allocation6 + $0x28] sm:$0xf] %vm3482_vm7, %v3469_v28  ;;  %3536 = vrot.lane.b32.xlu0 %v4773_v54, %s5023_s7  ;;  %3342 = vrot.lane.b32.xlu1 %v4773_v54, %s5020_s12  ;;  %v4781_v58 = vpack.c.bf16 %v3563_v59, %v3563_v59  ;;  %s215_s12 = sand.u32 1, %s4997_s19  }
 0x392   : > { %3668 = vst.msk [vmem:[#allocation6 + $0x34] sm:$0xf] %vm3157_vm2, %v4766_v18 }
 0x393   : > { %v3276_v22 = vpop.permute.xlu0 %3275 }
 0x394   : > { %3294 = vst.msk [vmem:[#allocation6 + $0x30] sm:$0xf] %vm3287_vm4, %v3276_v22 }
 0x395   : > { %3601 = vrot.lane.b32.xlu0 %v4781_v58, %s5024_s10  ;;  %3407 = vrot.lane.b32.xlu1 %v4781_v58, %s5021_s15  ;;  %s4005_s15 = sshll.u32 %s215_s12, 4 }
 0x397   : > { %v3839_v62 = vpop.f32.mrf.mxu1 }
 0x398   : > { %v3840_v63 = vadd.f32 %v6506_v60, %v3839_v62 }
 0x399   : > { %3472 = vrot.lane.b32.xlu1 %v4766_v18, %s5022_s23  ;;  %v3841_v23 = vpop.f32.mrf.mxu1  ;;  %v4941_v40 = vld [vmem:[#allocation6 + $0x34] ss:$8 sps:$4 sm:$0xff]   ;;  %s6541_s23 = scalar_lea.vmem [#allocation8], %s4005_s15 }
 0x39a   : > { %3871 = vst.msk [vmem:[#allocation7] sm:$0xff] %vm3870_vm10, %v3840_v63 }
 0x39b   : > { %v3842_v29 = vpop.f32.mrf.mxu1 }
 0x39c   : > { %v3843_v49 = vadd.f32 %v6506_v60, %v3842_v29 }
 0x39d   : > { %3538 = vrot.lane.b32.xlu1 %v4774_v1, %s5023_s7  ;;  %v3844_v3 = vpop.f32.mrf.mxu1  ;;  %s4791_s7 = sshll.u32 %s5079_s22, 8  ;;  %s6568_s22 = scalar_lea.sflag [#allocation9], %s215_s12 }
 0x39e   : > { %3872 = vst.msk [vmem:[#allocation7 + $0x8] sm:$0xff] %vm3870_vm10, %v3843_v49  ;;  %s6560_s16 = scalar_lea.hbm %s6613_s5, %s4791_s7 }
 0x3a1   : > { %3603 = vrot.lane.b32.xlu1 %v4782_v4, %s5024_s10  ;;  %v3879_v6 = vld [vmem:[#allocation7] sm:$0xff]  ;;  %s3939_s10 = sshll.u32 %s6541_s23, 4  ;;  %s6562_s10 = int_to_ptr.vmem [resolvable:$true] %s3939_s10 }
 0x3a2   : > { %s4945_s17 = scalar_lea.vmem %s6562_s10, 256  ;;  %p4952_p0 = scmp.lt.s32.totalorder %s6562_s10, %s4950_s26 }
 0x3a3   : > { %p4946_p11 = scmp.ne.s32.totalorder %s6562_s10, %s4945_s17  ;;  %p4953_p1 = scmp.lt.s32.totalorder %s4951_s30, %s4945_s17 }
 0x3a5   : > { %v3884_v7 = vld [vmem:[#allocation7 + $0x8] sm:$0xff]  ;;  %p4947_p12 = pnand %p4946_p11, %p5096_p5  ;;  %p4954_p2 = por %p4953_p1, %p4952_p0 }
 0x3a6   : > { %v3888_v0 = vmax.f32 %v3879_v6, %v3884_v7 }
 0x3a7   : > { %p4948_p13 = pneg %p4947_p12 }
 0x3a8   : > { %3892 = vst.msk [vmem:[#allocation7] sm:$0xff] %vm3870_vm10, %v3888_v0 }
 0x3a9   : > { %p4955_p3 = pnand %p4954_p2, %p4948_p13 }
 0x3af   : > { %v3896_v36 = vld [vmem:[#allocation7] ss:$2 sm:$0xf]  ;;  %v3904_v46 = vld [vmem:[#allocation7 + $0x1] ss:$2 sm:$0xf] }
 0x3b0   : > { %v3911_v38 = vmax.f32 %v3896_v36, %v3904_v46 }
 0x3c7   : > { %v3341_v9 = vpop.permute.xlu0 %3340  ;;  %v3535_v12 = vpop.permute.xlu1 %3534 }
 0x3c8   : > { %3359 = vst.msk [vmem:[#allocation6 + $0x30] sm:$0xf] %vm3352_vm5, %v3341_v9 }
 0x3c9   : > { %3554 = vst.msk [vmem:[#allocation6 + $0x28] sm:$0xf] %vm3548_vm8, %v3535_v12 }
 0x3cb   : > { %v3406_v14 = vpop.permute.xlu0 %3405  ;;  %v3600_v15 = vpop.permute.xlu1 %3599 }
 0x3cc   : > { %3424 = vst.msk [vmem:[#allocation6 + $0x30] sm:$0xf] %vm3417_vm6, %v3406_v14 }
 0x3cd   : > { %3619 = vst.msk [vmem:[#allocation6 + $0x28] sm:$0xf] %vm3613_vm9, %v3600_v15 }
 0x3cf   : > { %v3471_v16 = vpop.permute.xlu0 %3470  ;;  %v3213_v17 = vpop.permute.xlu1 %3212 }
 0x3d0   : > { %3489 = vst.msk [vmem:[#allocation6 + $0x30] sm:$0xf] %vm3482_vm7, %v3471_v16 }
 0x3d1   : > { %3230 = vst.msk [vmem:[#allocation6 + $0x38] sm:$0xf] %vm3222_vm3, %v3213_v17 }
 0x3d3   : > { %v3278_v50 = vpop.permute.xlu1 %3277 }
 0x3d4   : > { %v4940_v20 = vld [vmem:[#allocation6 + $0x20] ss:$8 sps:$4 sm:$0xff]   ;;  %3295 = vst.msk [vmem:[#allocation6 + $0x38] sm:$0xf] %vm3287_vm4, %v3278_v50 }
 0x3d5   : > { %3854 = vmatmul.mubr.bf16.gmra.mxu1 %v4940_v20 }
 0x3d6   : > { %4424 = vmatprep.mubr.msk.bf16.mxu1 %vm2936_vm15, %v4941_v40 }
 0x403   : > { %v3537_v21 = vpop.permute.xlu0 %3536  ;;  %v3343_v5 = vpop.permute.xlu1 %3342 }
 0x404   : > { %3555 = vst.msk [vmem:[#allocation6 + $0x30] sm:$0xf] %vm3548_vm8, %v3537_v21 }
 0x405   : > { %3360 = vst.msk [vmem:[#allocation6 + $0x38] sm:$0xf] %vm3352_vm5, %v3343_v5 }
 0x407   : > { %v3602_v8 = vpop.permute.xlu0 %3601  ;;  %v3408_v24 = vpop.permute.xlu1 %3407 }
 0x408   : > { %3620 = vst.msk [vmem:[#allocation6 + $0x30] sm:$0xf] %vm3613_vm9, %v3602_v8 }
 0x409   : > { %3425 = vst.msk [vmem:[#allocation6 + $0x38] sm:$0xf] %vm3417_vm6, %v3408_v24 }
 0x40b   : > { %v3473_v10 = vpop.permute.xlu1 %3472 }
 0x40c   : > { %3490 = vst.msk [vmem:[#allocation6 + $0x38] sm:$0xf] %vm3482_vm7, %v3473_v10 }
 0x40f   : > { %v3539_v26 = vpop.permute.xlu1 %3538 }
 0x410   : > { %3556 = vst.msk [vmem:[#allocation6 + $0x38] sm:$0xf] %vm3548_vm8, %v3539_v26 }
 0x413   : > { %v3604_v27 = vpop.permute.xlu1 %3603 }
 0x414   : > { %3621 = vst.msk [vmem:[#allocation6 + $0x38] sm:$0xf] %vm3613_vm9, %v3604_v27 }
 0x416   : > { %v3847_v39 = vpop.f32.mrf.mxu1 }
 0x417   : > { %v3848_v42 = vadd.f32 %v6506_v60, %v3847_v39 }
 0x418   : > { %v3849_v30 = vpop.f32.mrf.mxu1 }
 0x419   : > { %3873 = vst.msk [vmem:[#allocation7 + $0x10] sm:$0xff] %vm3870_vm10, %v3848_v42 }
 0x41a   : > { %v3850_v31 = vpop.f32.mrf.mxu1 }
 0x41b   : > { %v4943_v32 = vld [vmem:[#allocation6 + $0x30] ss:$8 sps:$4 sm:$0xff]   ;;  %v3851_v56 = vadd.f32 %v6506_v60, %v3850_v31 }
 0x41c   : > { %v3852_v33 = vpop.f32.mrf.mxu1  ;;  %3862 = vmatmul.mubr.bf16.gmra.mxu1 %v4943_v32 }
 0x41d   : > { %3874 = vst.msk [vmem:[#allocation7 + $0x18] sm:$0xff] %vm3870_vm10, %v3851_v56 }
 0x420   : > { %v3880_v34 = vld [vmem:[#allocation7 + $0x10] sm:$0xff] }
 0x424   : > { %v3885_v11 = vld [vmem:[#allocation7 + $0x18] sm:$0xff] }
 0x425   : > { %v3889_v35 = vmax.f32 %v3880_v34, %v3885_v11 }
 0x427   : > { %3893 = vst.msk [vmem:[#allocation7 + $0x8] sm:$0xff] %vm3870_vm10, %v3889_v35 }
 0x42e   : > { %v3898_v37 = vld [vmem:[#allocation7 + $0x8] ss:$2 sm:$0xf]  ;;  %v3906_v52 = vld [vmem:[#allocation7 + $0x9] ss:$2 sm:$0xf] }
 0x42f   : > { %v3912_v41 = vmax.f32 %v3898_v37, %v3906_v52 }
 0x431   : > { %v3919_v43 = vcombine.low %v3911_v38, %v3912_v41 }
 0x433   : > { %3923 = vst.msk [vmem:[%s6541_s23] sm:$0xff] %vm3870_vm10, %v3919_v43 }
 0x495   : > { %v3855_v44 = vpop.f32.mrf.mxu1 }
 0x496   : > { %v3856_v45 = vadd.f32 %v6506_v60, %v3855_v44 }
 0x497   : > { %v3857_v57 = vpop.f32.mrf.mxu1 }
 0x498   : > { %3875 = vst.msk [vmem:[#allocation7 + $0x20] sm:$0xff] %vm3870_vm10, %v3856_v45 }
 0x499   : > { %v3858_v53 = vpop.f32.mrf.mxu1 }
 0x49a   : > { %v3859_v47 = vadd.f32 %v6506_v60, %v3858_v53 }
 0x49b   : > { %v3860_v48 = vpop.f32.mrf.mxu1 }
 0x49c   : > { %3876 = vst.msk [vmem:[#allocation7 + $0x28] sm:$0xff] %vm3870_vm10, %v3859_v47 }
 0x49f   : > { %v3881_v51 = vld [vmem:[#allocation7 + $0x20] sm:$0xff] }
 0x4a3   : > { %v3886_v25 = vld [vmem:[#allocation7 + $0x28] sm:$0xff] }
 0x4a4   : > { %v3890_v28 = vmax.f32 %v3881_v51, %v3886_v25 }
 0x4a6   : > { %3894 = vst.msk [vmem:[#allocation7 + $0x10] sm:$0xff] %vm3870_vm10, %v3890_v28 }
 0x4ad   : > { %v3900_v63 = vld [vmem:[#allocation7 + $0x10] ss:$2 sm:$0xf]  ;;  %v3908_v23 = vld [vmem:[#allocation7 + $0x11] ss:$2 sm:$0xf] }
 0x4ae   : > { %v3913_v29 = vmax.f32 %v3900_v63, %v3908_v23 }
 0x4dc   : > { %v3863_v54 = vpop.f32.mrf.mxu1 }
 0x4dd   : > { %v3864_v18 = vadd.f32 %v6506_v60, %v3863_v54 }
 0x4de   : > { %v3865_v59 = vpop.f32.mrf.mxu1 }
 0x4df   : > { %3877 = vst.msk [vmem:[#allocation7 + $0x30] sm:$0xff] %vm3870_vm10, %v3864_v18 }
 0x4e0   : > { %v3866_v55 = vpop.f32.mrf.mxu1 }
 0x4e1   : > { %v3867_v22 = vadd.f32 %v6506_v60, %v3866_v55 }
 0x4e2   : > { %v3868_v58 = vpop.f32.mrf.mxu1 }
 0x4e3   : > { %3878 = vst.msk [vmem:[#allocation7 + $0x38] sm:$0xff] %vm3870_vm10, %v3867_v22 }
 0x4e6   : > { %v3882_v13 = vld [vmem:[#allocation7 + $0x30] sm:$0xff] }
 0x4ea   : > { %v3887_v61 = vld [vmem:[#allocation7 + $0x38] sm:$0xff] }
 0x4eb   : > { %v3891_v62 = vmax.f32 %v3882_v13, %v3887_v61 }
 0x4ed   : > { %3895 = vst.msk [vmem:[#allocation7 + $0x18] sm:$0xff] %vm3870_vm10, %v3891_v62 }
 0x4f4   : > { %v3902_v1 = vld [vmem:[#allocation7 + $0x18] ss:$2 sm:$0xf]  ;;  %v3910_v2 = vld [vmem:[#allocation7 + $0x19] ss:$2 sm:$0xf] }
 0x4f5   : > { %v3914_v49 = vmax.f32 %v3902_v1, %v3910_v2 }
 0x4f7   : > { %v3920_v60 = vcombine.low %v3913_v29, %v3914_v49 }
 0x4f9   : > { %3924 = vst.msk [vmem:[%s6541_s23 + $0x8] sm:$0xff] %vm3870_vm10, %v3920_v60 }
 0x4fa   : > { %4958 = shalt.err (!%p4955_p3)
}
 0x4fb   : > { %s4959_s6 = scalar_lea.hbm %s6560_s16, 256  ;;  %s4963_s9 = scalar_lea.hbm %s6613_s5, 512 }
 0x4fc   : > { %p4960_p4 = scmp.ne.s32.totalorder %s6560_s16, %s4959_s6  ;;  %p4964_p9 = scmp.lt.s32.totalorder %s6560_s16, %s6613_s5 }
 0x4fd   : > { %p4965_p10 = scmp.lt.s32.totalorder %s4963_s9, %s4959_s6 }
 0x4fe   : > { %p4961_p7 = pnand %p4960_p4, %p5096_p5 }
 0x4ff   : > { %p4966_p11 = por %p4965_p10, %p4964_p9 }
 0x500   : > { %p4962_p8 = pneg %p4961_p7 }
 0x502   : > { %p4967_p12 = pnand %p4966_p11, %p4962_p8 }
 0x504   : > { %4970 = shalt.err (!%p4967_p12)
}
 0x505   : > { %s5026_s23 = smov 128   ;;  %s5027_s7 = smov 8  }
 0x506   : > { %4846 = dma.vmem_to_hbm [thread:$0]  (%p5096_p5), %s6562_s10, 256, %s6560_s16, %s6568_s22, %s5026_s23, %s5026_s23, %s5027_s7  }
 0x507 PF: > { %p4852_p13 = scmp.ge.s32.totalorder %s5005_s21, 2  ;;  %s3954_s13 = sand.u32 1, %s4993_s18  }
 0x508   : > { %s3955_s14 = scalar_lea.sflag [#allocation9], %s3954_s13 }
 0x509   : > { %p4849_p0 = pnand %p4852_p13, %p5100_p6 }
 0x50b   : > { %p4850_p1 = pneg %p4849_p0 }
 0x50d   : > { %4988 = dma.done.wait (%p4850_p1), %s3955_s14, 256  }
 0x50e   : > { %4990 = vsyncadd (%p4850_p1), %s3955_s14, 4294967040  ;;  %p15_p2 = scmp.ge.s32.totalorder %s5083_s24, 4   ;;  %s6616_s18 = smov %s4997_s19 }
 0x50f   : > { %s6617_s19 = smov %s5001_s20  ;;  %s6618_s20 = smov %s5094_s27 }
 0x510   : > { %s6619_s21 = smov %s5083_s24  ;;  %17 = sbr.rel (!%p15_p2) target bundleno = 3 (0x3), region = 105 }
 0x515   :  { %3960 = vsyncpa [#allocation9], 1 }
 0x516   :  { %3962 = vsyncpa [#allocation9 + $0x1], 1 }

</bundles_post_ra>
